<compile_context>
chip_gen: v7x
topology: tpu7x:2x2x1
jax: 0.10.0
libtpu: 0.0.40
codegen_flags: <defaults>
</compile_context>

<pallas_src>
import math

import jax
import jax.numpy as jnp
from jax.experimental import pallas as pl
from jax.experimental.pallas import tpu as pltpu

EMBED = 128
HEADS = 32
HEAD_DIM = EMBED // HEADS       # 4
FF_HIDDEN = 256
INPUT_SIZE = 67
NUM_CLASSES = 1
NUM_LAYERS = 3
LN_EPS = 1e-5
SCALE = 1.0 / math.sqrt(EMBED)  # module scales by embed_size ** 0.5


# ---------------------------------------------------------------------------
# In-kernel helpers
# ---------------------------------------------------------------------------
def _layer_norm(x, gamma, beta):
    mu = jnp.mean(x, axis=-1, keepdims=True)
    xc = x - mu
    var = jnp.mean(xc * xc, axis=-1, keepdims=True)
    inv = jax.lax.rsqrt(var + LN_EPS)
    return xc * inv * gamma + beta


# ---------------------------------------------------------------------------
# Single fused kernel: embed + NUM_LAYERS transformer blocks + classifier
# grid = (NUM_LAYERS,)  [layer axis, "arbitrary": h carried in VMEM scratch]
# ---------------------------------------------------------------------------
def fused_kernel(x_ref, wemb_ref, head_ref, mask_ref,
                 wqkv_ref, wo_ref, wf1_ref, wf2_ref, vec_ref,
                 o_ref, h_ref):
    layer = pl.program_id(0)
    n_batch = o_ref.shape[0]
    seq = h_ref.shape[0] // n_batch

    # ---- input embedding: relu(x @ Wemb + b), layer 0 only ------------------
    @pl.when(layer == 0)
    def _():
        xe = jnp.dot(x_ref[...], wemb_ref[...],
                     preferred_element_type=jnp.float32)
        xe = xe + head_ref[0:1, :]                       # embed bias row
        h_ref[...] = jnp.maximum(xe, 0.0)

    x = h_ref[...]                                       # (N*L, E)

    # ---- fused QKV projection: one (N*L, E) @ (E, 3E) MXU matmul ------------
    qkv = jnp.dot(x, wqkv_ref[0], preferred_element_type=jnp.float32)
    q = qkv[:, :EMBED] * SCALE                           # fold softmax scale once
    k = qkv[:, EMBED:2 * EMBED]
    v = qkv[:, 2 * EMBED:]

    # head-selector mask (precomputed at prep time): mask_h[h, 0, e] = 1 iff
    # lane e belongs to head h
    mask_h = mask_ref[...][:, None, :]                   # (H, 1, E)

    # ---- all 32 heads at once, per batch element (static unrolled N loop) ---
    ctx_parts = []
    for n in range(n_batch):
        qn = q[n * seq:(n + 1) * seq]                    # (L, E)
        kn = k[n * seq:(n + 1) * seq]
        vn = v[n * seq:(n + 1) * seq]

        # stack heads along sublanes: row (h*L + qi) holds Q of head h, query qi
        qb = (qn[None, :, :] * mask_h).reshape(HEADS * seq, EMBED)   # (H*L, E)

        # scores for every (head, query) row in one matmul
        s = jax.lax.dot_general(qb, kn, (((1,), (1,)), ((), ())),
                                preferred_element_type=jnp.float32)  # (H*L, L)

        # one softmax over the key axis for all heads
        m = jnp.max(s, axis=-1, keepdims=True)
        p = jnp.exp(s - m)
        denom = jnp.sum(p, axis=-1, keepdims=True)
        p = p * pl.reciprocal(denom, approx=True)

        # context for all heads in one matmul, fold heads back onto lanes
        c = jnp.dot(p, vn, preferred_element_type=jnp.float32)       # (H*L, E)
        ctx_parts.append(jnp.sum(c.reshape(HEADS, seq, EMBED) * mask_h, axis=0))
    ctx = jnp.concatenate(ctx_parts, axis=0)                          # (N*L, E)

    # ---- packed per-layer vectors ((8, FF_HIDDEN) tile, one DMA) ------------
    vec = vec_ref[0]
    bo = vec[0:1, :EMBED]
    g1 = vec[1:2, :EMBED]
    b1 = vec[2:3, :EMBED]
    bf1 = vec[3:4, :]
    bf2 = vec[4:5, :EMBED]
    g2 = vec[5:6, :EMBED]
    b2 = vec[6:7, :EMBED]

    attn = jnp.dot(ctx, wo_ref[0], preferred_element_type=jnp.float32) + bo

    # ---- residual + LayerNorm 1 (dropout = identity, eval mode) -------------
    h1 = _layer_norm(attn + x, g1, b1)

    # ---- feed-forward: Linear(E->F) + ReLU + Linear(F->E) -------------------
    f = jnp.dot(h1, wf1_ref[0], preferred_element_type=jnp.float32) + bf1
    f = jnp.maximum(f, 0.0)
    f = jnp.dot(f, wf2_ref[0], preferred_element_type=jnp.float32) + bf2

    # ---- residual + LayerNorm 2, carry h in VMEM for next layer -------------
    h_new = _layer_norm(f + h1, g2, b2)
    h_ref[...] = h_new

    # ---- classifier head on the last layer: sigmoid(mean_seq(h) @ Wc + bc) ---
    @pl.when(layer == pl.num_programs(0) - 1)
    def _():
        xm = jnp.mean(h_new.reshape(n_batch, seq, EMBED), axis=1)     # (N, E)
        wc = head_ref[1:2, :]                                         # (1, E)
        bc = head_ref[2:3, 0:1]                                       # (1, 1)
        z = jnp.sum(xm * wc, axis=-1, keepdims=True) + bc             # (N, 1)
        o_ref[...] = (1.0 / (1.0 + jnp.exp(-z))).astype(o_ref.dtype)


def fused_forward(x2d, prep, n_batch, seq):
    """x2d: (N*L, INPUT_SIZE). prep: dict from prepare_params()."""
    nl = n_batch * seq
    rep2 = lambda l: (0, 0)
    rep3 = lambda l: (l, 0, 0)
    cost = pl.CostEstimate(flops=20_000_000, transcendentals=20_000,
                           bytes_accessed=1_800_000)
    # NOTE(v7x): on a 2-TC chip one could instead use grid=(N, NUM_LAYERS) with
    # dimension_semantics=("parallel", "arbitrary") to shard the batch across
    # TensorCores; on single-TC v5e/v6e folding the batch onto sublanes (done
    # here) minimizes grid steps and weight re-DMA.
    return pl.pallas_call(
        fused_kernel,
        out_shape=jax.ShapeDtypeStruct((n_batch, 1), jnp.float32),
        grid=(NUM_LAYERS,),
        in_specs=[
            pl.BlockSpec((nl, INPUT_SIZE), rep2),            # x (unpadded)
            pl.BlockSpec((INPUT_SIZE, EMBED), rep2),         # embed weight
            pl.BlockSpec((8, EMBED), rep2),                  # packed head params
            pl.BlockSpec((HEADS, EMBED), rep2),              # head-selector mask
            pl.BlockSpec((1, EMBED, 3 * EMBED), rep3),       # stacked Wqkv
            pl.BlockSpec((1, EMBED, EMBED), rep3),           # stacked Wo
            pl.BlockSpec((1, EMBED, FF_HIDDEN), rep3),       # stacked Wf1
            pl.BlockSpec((1, FF_HIDDEN, EMBED), rep3),       # stacked Wf2
            pl.BlockSpec((1, 8, FF_HIDDEN), rep3),           # packed layer vectors
        ],
        out_specs=pl.BlockSpec((n_batch, 1), rep2),
        scratch_shapes=[pltpu.VMEM((nl, EMBED), jnp.float32)],
        compiler_params=pltpu.CompilerParams(
            dimension_semantics=("arbitrary",)),
        cost_estimate=cost,
    )(x2d, prep["w_emb"], prep["head"], prep["mask"],
      prep["wqkv"], prep["wo"], prep["wf1"], prep["wf2"], prep["vecs"])


# ---------------------------------------------------------------------------
# One-time parameter preparation (hoisted out of the forward path)
# ---------------------------------------------------------------------------
def prepare_params(params):
    layers = params["layers"]

    wqkv_s = jnp.stack([jnp.concatenate([l["wq"].T, l["wk"].T, l["wv"].T], axis=1)
                        for l in layers])                       # (NL, E, 3E)
    wo_s = jnp.stack([l["wo"].T for l in layers])               # (NL, E, E)
    wf1_s = jnp.stack([l["wf1"].T for l in layers])             # (NL, E, F)
    wf2_s = jnp.stack([l["wf2"].T for l in layers])             # (NL, F, E)

    def pack_vec(l):
        t = jnp.zeros((8, FF_HIDDEN), jnp.float32)
        t = t.at[0, :EMBED].set(l["bo"])
        t = t.at[1, :EMBED].set(l["g1"])
        t = t.at[2, :EMBED].set(l["b1"])
        t = t.at[3, :].set(l["bf1"])
        t = t.at[4, :EMBED].set(l["bf2"])
        t = t.at[5, :EMBED].set(l["g2"])
        t = t.at[6, :EMBED].set(l["b2"])
        return t
    vecs_s = jnp.stack([pack_vec(l) for l in layers])           # (NL, 8, F)

    head = jnp.zeros((8, EMBED), jnp.float32)
    head = head.at[0].set(params["b1"])                         # embed bias
    head = head.at[1].set(params["wc"][0])                      # classifier weight
    head = head.at[2, 0].set(params["bc"][0])                   # classifier bias

    lane = jax.lax.broadcasted_iota(jnp.int32, (HEADS, EMBED), 1)
    hidx = jax.lax.broadcasted_iota(jnp.int32, (HEADS, EMBED), 0)
    mask_h = (lane // HEAD_DIM == hidx).astype(jnp.float32)     # (H, E)

    prep = dict(w_emb=params["w1"].T, head=head, mask=mask_h,
                wqkv=wqkv_s, wo=wo_s, wf1=wf1_s, wf2=wf2_s, vecs=vecs_s)
    return jax.tree_util.tree_map(jax.block_until_ready, prep)


# ---------------------------------------------------------------------------
# Full forward (wrapper: one reshape + one pallas_call)
# ---------------------------------------------------------------------------
def transformer_encoder_forward(x, prep):
    """x: (N, L, INPUT_SIZE) or (N, INPUT_SIZE). prep: from prepare_params()."""
    if x.ndim == 2:
        x = x[:, None, :]
    n_batch, seq, _ = x.shape
    x2d = x.reshape(n_batch * seq, INPUT_SIZE)
    out = fused_forward(x2d, prep, n_batch, seq)                # (N, 1)
    return out.squeeze(-1)


# ---------------------------------------------------------------------------
# Pure-JAX reference mirroring the PyTorch module (for verification)
# ---------------------------------------------------------------------------
def _ln_ref(x, gamma, beta):
    mu = x.mean(axis=-1, keepdims=True)
    var = ((x - mu) ** 2).mean(axis=-1, keepdims=True)
    return (x - mu) / jnp.sqrt(var + LN_EPS) * gamma + beta


def reference_forward(x, params):
    if x.ndim == 2:
        x = x[:, None, :]
    N, L, _ = x.shape
    h = jax.nn.relu(x @ params["w1"].T + params["b1"])
    for lyr in params["layers"]:
        q = (h @ lyr["wq"].T).reshape(N, L, HEADS, HEAD_DIM)
        k = (h @ lyr["wk"].T).reshape(N, L, HEADS, HEAD_DIM)
        v = (h @ lyr["wv"].T).reshape(N, L, HEADS, HEAD_DIM)
        energy = jnp.einsum("nqhd,nkhd->nhqk", q, k)
        attn = jax.nn.softmax(energy / math.sqrt(EMBED), axis=3)
        ctx = jnp.einsum("nhqk,nkhd->nqhd", attn, v).reshape(N, L, EMBED)
        attn_out = ctx @ lyr["wo"].T + lyr["bo"]
        h1 = _ln_ref(attn_out + h, lyr["g1"], lyr["b1"])
        f = jax.nn.relu(h1 @ lyr["wf1"].T + lyr["bf1"]) @ lyr["wf2"].T + lyr["bf2"]
        h = _ln_ref(f + h1, lyr["g2"], lyr["b2"])
    z = h.mean(axis=1) @ params["wc"].T + params["bc"]
    return jax.nn.sigmoid(z).squeeze(-1)


if __name__ == "__main__":
    key = jax.random.PRNGKey(0)
    N, L = 2, 8

    def uniform(k, shape, fan_in):
        bound = 1.0 / math.sqrt(fan_in)
        return jax.random.uniform(k, shape, jnp.float32, -bound, bound)

    keys = jax.random.split(key, 64)
    ki = iter(keys)

    params = {
        "w1": uniform(next(ki), (EMBED, INPUT_SIZE), INPUT_SIZE),
        "b1": uniform(next(ki), (EMBED,), INPUT_SIZE),
        "wc": uniform(next(ki), (NUM_CLASSES, EMBED), EMBED),
        "bc": uniform(next(ki), (NUM_CLASSES,), EMBED),
        "layers": [],
    }
    for _ in range(NUM_LAYERS):
        params["layers"].append({
            "wq": uniform(next(ki), (EMBED, EMBED), EMBED),
            "wk": uniform(next(ki), (EMBED, EMBED), EMBED),
            "wv": uniform(next(ki), (EMBED, EMBED), EMBED),
            "wo": uniform(next(ki), (EMBED, EMBED), EMBED),
            "bo": uniform(next(ki), (EMBED,), EMBED),
            "g1": 1.0 + 0.1 * jax.random.normal(next(ki), (EMBED,), jnp.float32),
            "b1": 0.1 * jax.random.normal(next(ki), (EMBED,), jnp.float32),
            "wf1": uniform(next(ki), (FF_HIDDEN, EMBED), EMBED),
            "bf1": uniform(next(ki), (FF_HIDDEN,), EMBED),
            "wf2": uniform(next(ki), (EMBED, FF_HIDDEN), FF_HIDDEN),
            "bf2": uniform(next(ki), (EMBED,), FF_HIDDEN),
            "g2": 1.0 + 0.1 * jax.random.normal(next(ki), (EMBED,), jnp.float32),
            "b2": 0.1 * jax.random.normal(next(ki), (EMBED,), jnp.float32),
        })

    x = jax.random.normal(next(ki), (N, L, INPUT_SIZE), jnp.float32)

    # one-time weight layout prep (hoisted out of the hot path)
    prep = prepare_params(params)

    fwd = jax.jit(transformer_encoder_forward)
    out = fwd(x, prep)
    out = jax.block_until_ready(out)

    ref = reference_forward(x, params)
    assert out.shape == (N,)
    assert jnp.allclose(out, ref, rtol=2e-3, atol=2e-3), (
        f"mismatch vs reference: {out} vs {ref}")

    print("KERNEL_OK")
</pallas_src>

<mosaic_0001>
module attributes {stable_mosaic.version = 11 : i64} {
  func.func @fused_kernel(%arg0: i32, %arg1: memref<16x67xf32, #tpu.memory_space<vmem>>, %arg2: memref<67x128xf32, #tpu.memory_space<vmem>>, %arg3: memref<8x128xf32, #tpu.memory_space<vmem>>, %arg4: memref<32x128xf32, #tpu.memory_space<vmem>>, %arg5: memref<1x128x384xf32, #tpu.memory_space<vmem>>, %arg6: memref<1x128x128xf32, #tpu.memory_space<vmem>>, %arg7: memref<1x128x256xf32, #tpu.memory_space<vmem>>, %arg8: memref<1x256x128xf32, #tpu.memory_space<vmem>>, %arg9: memref<1x8x256xf32, #tpu.memory_space<vmem>>, %arg10: memref<2x1xf32, #tpu.memory_space<vmem>>, %arg11: memref<16x128xf32, #tpu.memory_space<vmem>>) attributes {dimension_semantics = [#tpu.dimension_semantics<arbitrary>], iteration_bounds = array<i64: 3>, scalar_prefetch = 0 : i64, scratch_operands = 1 : i64, tpu.core_type = #tpu.core_type<tc>, window_params = [{pipeline_mode = #tpu.pipeline_mode<synchronous>, transform_indices = @transform_0, window_bounds = array<i64: 16, 67>}, {pipeline_mode = #tpu.pipeline_mode<synchronous>, transform_indices = @transform_1, window_bounds = array<i64: 67, 128>}, {pipeline_mode = #tpu.pipeline_mode<synchronous>, transform_indices = @transform_2, window_bounds = array<i64: 8, 128>}, {pipeline_mode = #tpu.pipeline_mode<synchronous>, transform_indices = @transform_3, window_bounds = array<i64: 32, 128>}, {transform_indices = @transform_4, window_bounds = array<i64: 1, 128, 384>}, {transform_indices = @transform_5, window_bounds = array<i64: 1, 128, 128>}, {transform_indices = @transform_6, window_bounds = array<i64: 1, 128, 256>}, {transform_indices = @transform_7, window_bounds = array<i64: 1, 256, 128>}, {transform_indices = @transform_8, window_bounds = array<i64: 1, 8, 256>}, {pipeline_mode = #tpu.pipeline_mode<synchronous>, transform_indices = @transform_9, window_bounds = array<i64: 2, 1>}]} {
    %c0_i32 = arith.constant 0 : i32
    %0 = arith.cmpi eq, %arg0, %c0_i32 : i32
    %1 = arith.extui %0 : i1 to i32
    %c0_i32_0 = arith.constant 0 : i32
    %2 = arith.cmpi ne, %1, %c0_i32_0 : i32
    scf.if %2 {
      %c0_47 = arith.constant 0 : index
      %c0_48 = arith.constant 0 : index
      %135 = vector.load %arg1[%c0_47, %c0_48] : memref<16x67xf32, #tpu.memory_space<vmem>>, vector<16x67xf32>
      %c0_49 = arith.constant 0 : index
      %c0_50 = arith.constant 0 : index
      %136 = vector.load %arg2[%c0_49, %c0_50] : memref<67x128xf32, #tpu.memory_space<vmem>>, vector<67x128xf32>
      %cst_51 = arith.constant dense<0.000000e+00> : vector<16x128xf32>
      %137 = tpu.matmul %135, %136, %cst_51 {dimension_numbers = #tpu.dot_dimension_numbers<[1], [0], [0], [1], [0, 0, 1, 1], [], []>} : vector<16x67xf32>, vector<67x128xf32>, vector<16x128xf32> -> vector<16x128xf32>
      %c0_52 = arith.constant 0 : index
      %c0_53 = arith.constant 0 : index
      %138 = vector.load %arg3[%c0_52, %c0_53] : memref<8x128xf32, #tpu.memory_space<vmem>>, vector<1x128xf32>
      %139 = vector.broadcast %138 : vector<1x128xf32> to vector<16x128xf32>
      %140 = arith.addf %137, %139 : vector<16x128xf32>
      %cst_54 = arith.constant 0.000000e+00 : f32
      %141 = vector.broadcast %cst_54 : f32 to vector<16x128xf32>
      %142 = arith.maximumf %140, %141 : vector<16x128xf32>
      %c0_55 = arith.constant 0 : index
      %c0_56 = arith.constant 0 : index
      %143 = vector.load %arg11[%c0_55, %c0_56] : memref<16x128xf32, #tpu.memory_space<vmem>>, vector<16x128xf32>
      tpu.vector_store %arg11[%c0_55, %c0_56], %142 {strides = array<i32>} : memref<16x128xf32, #tpu.memory_space<vmem>>, vector<16x128xf32>,
    } else {
    }
    %c0 = arith.constant 0 : index
    %c0_1 = arith.constant 0 : index
    %3 = vector.load %arg11[%c0, %c0_1] : memref<16x128xf32, #tpu.memory_space<vmem>>, vector<16x128xf32>
    %c0_2 = arith.constant 0 : index
    %c0_3 = arith.constant 0 : index
    %c0_4 = arith.constant 0 : index
    %4 = vector.load %arg5[%c0_2, %c0_3, %c0_4] : memref<1x128x384xf32, #tpu.memory_space<vmem>>, vector<1x128x384xf32>
    %5 = vector.shape_cast %4 : vector<1x128x384xf32> to vector<128x384xf32>
    %cst = arith.constant dense<0.000000e+00> : vector<16x384xf32>
    %6 = tpu.matmul %3, %5, %cst {dimension_numbers = #tpu.dot_dimension_numbers<[1], [0], [0], [1], [0, 0, 1, 1], [], []>} : vector<16x128xf32>, vector<128x384xf32>, vector<16x384xf32> -> vector<16x384xf32>
    %7 = vector.extract_strided_slice %6 {offsets = [0, 0], sizes = [16, 128], strides = [1, 1]} : vector<16x384xf32> to vector<16x128xf32>
    %cst_5 = arith.constant 0.0883883461 : f32
    %8 = vector.broadcast %cst_5 : f32 to vector<16x128xf32>
    %9 = arith.mulf %7, %8 : vector<16x128xf32>
    %10 = vector.extract_strided_slice %6 {offsets = [0, 128], sizes = [16, 128], strides = [1, 1]} : vector<16x384xf32> to vector<16x128xf32>
    %11 = vector.extract_strided_slice %6 {offsets = [0, 256], sizes = [16, 128], strides = [1, 1]} : vector<16x384xf32> to vector<16x128xf32>
    %c0_6 = arith.constant 0 : index
    %c0_7 = arith.constant 0 : index
    %12 = vector.load %arg4[%c0_6, %c0_7] : memref<32x128xf32, #tpu.memory_space<vmem>>, vector<32x128xf32>
    %13 = vector.shape_cast %12 : vector<32x128xf32> to vector<32x1x128xf32>
    %14 = vector.extract_strided_slice %9 {offsets = [0, 0], sizes = [8, 128], strides = [1, 1]} : vector<16x128xf32> to vector<8x128xf32>
    %15 = vector.extract_strided_slice %10 {offsets = [0, 0], sizes = [8, 128], strides = [1, 1]} : vector<16x128xf32> to vector<8x128xf32>
    %16 = vector.extract_strided_slice %11 {offsets = [0, 0], sizes = [8, 128], strides = [1, 1]} : vector<16x128xf32> to vector<8x128xf32>
    %17 = vector.shape_cast %14 : vector<8x128xf32> to vector<1x8x128xf32>
    %18 = vector.broadcast %17 : vector<1x8x128xf32> to vector<32x8x128xf32>
    %19 = vector.broadcast %13 : vector<32x1x128xf32> to vector<32x8x128xf32>
    %20 = arith.mulf %18, %19 : vector<32x8x128xf32>
    %21 = vector.shape_cast %20 : vector<32x8x128xf32> to vector<256x128xf32>
    %cst_8 = arith.constant dense<0.000000e+00> : vector<256x8xf32>
    %22 = tpu.matmul %21, %15, %cst_8 {dimension_numbers = #tpu.dot_dimension_numbers<[1], [1], [0], [0], [0, 0, 1, 0], [], []>} : vector<256x128xf32>, vector<8x128xf32>, vector<256x8xf32> -> vector<256x8xf32>
    %cst_9 = arith.constant dense<0xFF800000> : vector<256xf32>
    %23 = vector.multi_reduction <maximumf>, %22, %cst_9 [1] : vector<256x8xf32> to vector<256xf32>
    %24 = vector.shape_cast %23 : vector<256xf32> to vector<256x1xf32>
    %25 = vector.broadcast %24 : vector<256x1xf32> to vector<256x8xf32>
    %26 = arith.subf %22, %25 : vector<256x8xf32>
    %27 = math.exp %26 : vector<256x8xf32>
    %cst_10 = arith.constant dense<0.000000e+00> : vector<256xf32>
    %28 = vector.multi_reduction <add>, %27, %cst_10 [1] : vector<256x8xf32> to vector<256xf32>
    %29 = vector.shape_cast %28 : vector<256xf32> to vector<256x1xf32>
    %30 = tpu.reciprocal %29 {approx = true} : vector<256x1xf32> -> vector<256x1xf32>
    %31 = vector.broadcast %30 : vector<256x1xf32> to vector<256x8xf32>
    %32 = arith.mulf %27, %31 : vector<256x8xf32>
    %cst_11 = arith.constant dense<0.000000e+00> : vector<256x128xf32>
    %33 = tpu.matmul %32, %16, %cst_11 {dimension_numbers = #tpu.dot_dimension_numbers<[1], [0], [0], [1], [0, 0, 1, 1], [], []>} : vector<256x8xf32>, vector<8x128xf32>, vector<256x128xf32> -> vector<256x128xf32>
    %34 = vector.shape_cast %33 : vector<256x128xf32> to vector<32x8x128xf32>
    %35 = vector.broadcast %13 : vector<32x1x128xf32> to vector<32x8x128xf32>
    %36 = arith.mulf %34, %35 : vector<32x8x128xf32>
    %cst_12 = arith.constant dense<0.000000e+00> : vector<8x128xf32>
    %37 = vector.multi_reduction <add>, %36, %cst_12 [0] : vector<32x8x128xf32> to vector<8x128xf32>
    %38 = vector.extract_strided_slice %9 {offsets = [8, 0], sizes = [8, 128], strides = [1, 1]} : vector<16x128xf32> to vector<8x128xf32>
    %39 = vector.extract_strided_slice %10 {offsets = [8, 0], sizes = [8, 128], strides = [1, 1]} : vector<16x128xf32> to vector<8x128xf32>
    %40 = vector.extract_strided_slice %11 {offsets = [8, 0], sizes = [8, 128], strides = [1, 1]} : vector<16x128xf32> to vector<8x128xf32>
    %41 = vector.shape_cast %38 : vector<8x128xf32> to vector<1x8x128xf32>
    %42 = vector.broadcast %41 : vector<1x8x128xf32> to vector<32x8x128xf32>
    %43 = vector.broadcast %13 : vector<32x1x128xf32> to vector<32x8x128xf32>
    %44 = arith.mulf %42, %43 : vector<32x8x128xf32>
    %45 = vector.shape_cast %44 : vector<32x8x128xf32> to vector<256x128xf32>
    %cst_13 = arith.constant dense<0.000000e+00> : vector<256x8xf32>
    %46 = tpu.matmul %45, %39, %cst_13 {dimension_numbers = #tpu.dot_dimension_numbers<[1], [1], [0], [0], [0, 0, 1, 0], [], []>} : vector<256x128xf32>, vector<8x128xf32>, vector<256x8xf32> -> vector<256x8xf32>
    %cst_14 = arith.constant dense<0xFF800000> : vector<256xf32>
    %47 = vector.multi_reduction <maximumf>, %46, %cst_14 [1] : vector<256x8xf32> to vector<256xf32>
    %48 = vector.shape_cast %47 : vector<256xf32> to vector<256x1xf32>
    %49 = vector.broadcast %48 : vector<256x1xf32> to vector<256x8xf32>
    %50 = arith.subf %46, %49 : vector<256x8xf32>
    %51 = math.exp %50 : vector<256x8xf32>
    %cst_15 = arith.constant dense<0.000000e+00> : vector<256xf32>
    %52 = vector.multi_reduction <add>, %51, %cst_15 [1] : vector<256x8xf32> to vector<256xf32>
    %53 = vector.shape_cast %52 : vector<256xf32> to vector<256x1xf32>
    %54 = tpu.reciprocal %53 {approx = true} : vector<256x1xf32> -> vector<256x1xf32>
    %55 = vector.broadcast %54 : vector<256x1xf32> to vector<256x8xf32>
    %56 = arith.mulf %51, %55 : vector<256x8xf32>
    %cst_16 = arith.constant dense<0.000000e+00> : vector<256x128xf32>
    %57 = tpu.matmul %56, %40, %cst_16 {dimension_numbers = #tpu.dot_dimension_numbers<[1], [0], [0], [1], [0, 0, 1, 1], [], []>} : vector<256x8xf32>, vector<8x128xf32>, vector<256x128xf32> -> vector<256x128xf32>
    %58 = vector.shape_cast %57 : vector<256x128xf32> to vector<32x8x128xf32>
    %59 = vector.broadcast %13 : vector<32x1x128xf32> to vector<32x8x128xf32>
    %60 = arith.mulf %58, %59 : vector<32x8x128xf32>
    %cst_17 = arith.constant dense<0.000000e+00> : vector<8x128xf32>
    %61 = vector.multi_reduction <add>, %60, %cst_17 [0] : vector<32x8x128xf32> to vector<8x128xf32>
    %62 = tpu.concatenate %37, %61 in 0 : vector<8x128xf32>, vector<8x128xf32> -> vector<16x128xf32>
    %c0_18 = arith.constant 0 : index
    %c0_19 = arith.constant 0 : index
    %c0_20 = arith.constant 0 : index
    %63 = vector.load %arg9[%c0_18, %c0_19, %c0_20] : memref<1x8x256xf32, #tpu.memory_space<vmem>>, vector<1x8x256xf32>
    %64 = vector.shape_cast %63 : vector<1x8x256xf32> to vector<8x256xf32>
    %65 = vector.extract_strided_slice %64 {offsets = [0, 0], sizes = [1, 128], strides = [1, 1]} : vector<8x256xf32> to vector<1x128xf32>
    %66 = vector.extract_strided_slice %64 {offsets = [1, 0], sizes = [1, 128], strides = [1, 1]} : vector<8x256xf32> to vector<1x128xf32>
    %67 = vector.extract_strided_slice %64 {offsets = [2, 0], sizes = [1, 128], strides = [1, 1]} : vector<8x256xf32> to vector<1x128xf32>
    %68 = vector.extract_strided_slice %64 {offsets = [3, 0], sizes = [1, 256], strides = [1, 1]} : vector<8x256xf32> to vector<1x256xf32>
    %69 = vector.extract_strided_slice %64 {offsets = [4, 0], sizes = [1, 128], strides = [1, 1]} : vector<8x256xf32> to vector<1x128xf32>
    %70 = vector.extract_strided_slice %64 {offsets = [5, 0], sizes = [1, 128], strides = [1, 1]} : vector<8x256xf32> to vector<1x128xf32>
    %71 = vector.extract_strided_slice %64 {offsets = [6, 0], sizes = [1, 128], strides = [1, 1]} : vector<8x256xf32> to vector<1x128xf32>
    %c0_21 = arith.constant 0 : index
    %c0_22 = arith.constant 0 : index
    %c0_23 = arith.constant 0 : index
    %72 = vector.load %arg6[%c0_21, %c0_22, %c0_23] : memref<1x128x128xf32, #tpu.memory_space<vmem>>, vector<1x128x128xf32>
    %73 = vector.shape_cast %72 : vector<1x128x128xf32> to vector<128x128xf32>
    %cst_24 = arith.constant dense<0.000000e+00> : vector<16x128xf32>
    %74 = tpu.matmul %62, %73, %cst_24 {dimension_numbers = #tpu.dot_dimension_numbers<[1], [0], [0], [1], [0, 0, 1, 1], [], []>} : vector<16x128xf32>, vector<128x128xf32>, vector<16x128xf32> -> vector<16x128xf32>
    %75 = vector.broadcast %65 : vector<1x128xf32> to vector<16x128xf32>
    %76 = arith.addf %74, %75 : vector<16x128xf32>
    %77 = arith.addf %76, %3 : vector<16x128xf32>
    %cst_25 = arith.constant dense<0.000000e+00> : vector<16xf32>
    %78 = vector.multi_reduction <add>, %77, %cst_25 [1] : vector<16x128xf32> to vector<16xf32>
    %79 = vector.shape_cast %78 : vector<16xf32> to vector<16x1xf32>
    %cst_26 = arith.constant 1.280000e+02 : f32
    %80 = vector.broadcast %cst_26 : f32 to vector<16x1xf32>
    %81 = arith.divf %79, %80 : vector<16x1xf32>
    %82 = vector.broadcast %81 : vector<16x1xf32> to vector<16x128xf32>
    %83 = arith.subf %77, %82 : vector<16x128xf32>
    %84 = arith.mulf %83, %83 : vector<16x128xf32>
    %cst_27 = arith.constant dense<0.000000e+00> : vector<16xf32>
    %85 = vector.multi_reduction <add>, %84, %cst_27 [1] : vector<16x128xf32> to vector<16xf32>
    %86 = vector.shape_cast %85 : vector<16xf32> to vector<16x1xf32>
    %cst_28 = arith.constant 1.280000e+02 : f32
    %87 = vector.broadcast %cst_28 : f32 to vector<16x1xf32>
    %88 = arith.divf %86, %87 : vector<16x1xf32>
    %cst_29 = arith.constant 9.99999974E-6 : f32
    %89 = vector.broadcast %cst_29 : f32 to vector<16x1xf32>
    %90 = arith.addf %88, %89 : vector<16x1xf32>
    %91 = math.rsqrt %90 : vector<16x1xf32>
    %92 = vector.broadcast %91 : vector<16x1xf32> to vector<16x128xf32>
    %93 = arith.mulf %83, %92 : vector<16x128xf32>
    %94 = vector.broadcast %66 : vector<1x128xf32> to vector<16x128xf32>
    %95 = arith.mulf %93, %94 : vector<16x128xf32>
    %96 = vector.broadcast %67 : vector<1x128xf32> to vector<16x128xf32>
    %97 = arith.addf %95, %96 : vector<16x128xf32>
    %c0_30 = arith.constant 0 : index
    %c0_31 = arith.constant 0 : index
    %c0_32 = arith.constant 0 : index
    %98 = vector.load %arg7[%c0_30, %c0_31, %c0_32] : memref<1x128x256xf32, #tpu.memory_space<vmem>>, vector<1x128x256xf32>
    %99 = vector.shape_cast %98 : vector<1x128x256xf32> to vector<128x256xf32>
    %cst_33 = arith.constant dense<0.000000e+00> : vector<16x256xf32>
    %100 = tpu.matmul %97, %99, %cst_33 {dimension_numbers = #tpu.dot_dimension_numbers<[1], [0], [0], [1], [0, 0, 1, 1], [], []>} : vector<16x128xf32>, vector<128x256xf32>, vector<16x256xf32> -> vector<16x256xf32>
    %101 = vector.broadcast %68 : vector<1x256xf32> to vector<16x256xf32>
    %102 = arith.addf %100, %101 : vector<16x256xf32>
    %cst_34 = arith.constant 0.000000e+00 : f32
    %103 = vector.broadcast %cst_34 : f32 to vector<16x256xf32>
    %104 = arith.maximumf %102, %103 : vector<16x256xf32>
    %c0_35 = arith.constant 0 : index
    %c0_36 = arith.constant 0 : index
    %c0_37 = arith.constant 0 : index
    %105 = vector.load %arg8[%c0_35, %c0_36, %c0_37] : memref<1x256x128xf32, #tpu.memory_space<vmem>>, vector<1x256x128xf32>
    %106 = vector.shape_cast %105 : vector<1x256x128xf32> to vector<256x128xf32>
    %cst_38 = arith.constant dense<0.000000e+00> : vector<16x128xf32>
    %107 = tpu.matmul %104, %106, %cst_38 {dimension_numbers = #tpu.dot_dimension_numbers<[1], [0], [0], [1], [0, 0, 1, 1], [], []>} : vector<16x256xf32>, vector<256x128xf32>, vector<16x128xf32> -> vector<16x128xf32>
    %108 = vector.broadcast %69 : vector<1x128xf32> to vector<16x128xf32>
    %109 = arith.addf %107, %108 : vector<16x128xf32>
    %110 = arith.addf %109, %97 : vector<16x128xf32>
    %cst_39 = arith.constant dense<0.000000e+00> : vector<16xf32>
    %111 = vector.multi_reduction <add>, %110, %cst_39 [1] : vector<16x128xf32> to vector<16xf32>
    %112 = vector.shape_cast %111 : vector<16xf32> to vector<16x1xf32>
    %cst_40 = arith.constant 1.280000e+02 : f32
    %113 = vector.broadcast %cst_40 : f32 to vector<16x1xf32>
    %114 = arith.divf %112, %113 : vector<16x1xf32>
    %115 = vector.broadcast %114 : vector<16x1xf32> to vector<16x128xf32>
    %116 = arith.subf %110, %115 : vector<16x128xf32>
    %117 = arith.mulf %116, %116 : vector<16x128xf32>
    %cst_41 = arith.constant dense<0.000000e+00> : vector<16xf32>
    %118 = vector.multi_reduction <add>, %117, %cst_41 [1] : vector<16x128xf32> to vector<16xf32>
    %119 = vector.shape_cast %118 : vector<16xf32> to vector<16x1xf32>
    %cst_42 = arith.constant 1.280000e+02 : f32
    %120 = vector.broadcast %cst_42 : f32 to vector<16x1xf32>
    %121 = arith.divf %119, %120 : vector<16x1xf32>
    %cst_43 = arith.constant 9.99999974E-6 : f32
    %122 = vector.broadcast %cst_43 : f32 to vector<16x1xf32>
    %123 = arith.addf %121, %122 : vector<16x1xf32>
    %124 = math.rsqrt %123 : vector<16x1xf32>
    %125 = vector.broadcast %124 : vector<16x1xf32> to vector<16x128xf32>
    %126 = arith.mulf %116, %125 : vector<16x128xf32>
    %127 = vector.broadcast %70 : vector<1x128xf32> to vector<16x128xf32>
    %128 = arith.mulf %126, %127 : vector<16x128xf32>
    %129 = vector.broadcast %71 : vector<1x128xf32> to vector<16x128xf32>
    %130 = arith.addf %128, %129 : vector<16x128xf32>
    %c0_44 = arith.constant 0 : index
    %c0_45 = arith.constant 0 : index
    %131 = vector.load %arg11[%c0_44, %c0_45] : memref<16x128xf32, #tpu.memory_space<vmem>>, vector<16x128xf32>
    tpu.vector_store %arg11[%c0_44, %c0_45], %130 {strides = array<i32>} : memref<16x128xf32, #tpu.memory_space<vmem>>, vector<16x128xf32>,
    %c2_i32 = arith.constant 2 : i32
    %132 = arith.cmpi eq, %arg0, %c2_i32 : i32
    %133 = arith.extui %132 : i1 to i32
    %c0_i32_46 = arith.constant 0 : i32
    %134 = arith.cmpi ne, %133, %c0_i32_46 : i32
    scf.if %134 {
      %135 = vector.shape_cast %130 : vector<16x128xf32> to vector<2x8x128xf32>
      %cst_47 = arith.constant dense<0.000000e+00> : vector<2x128xf32>
      %136 = vector.multi_reduction <add>, %135, %cst_47 [1] : vector<2x8x128xf32> to vector<2x128xf32>
      %cst_48 = arith.constant 8.000000e+00 : f32
      %137 = vector.broadcast %cst_48 : f32 to vector<2x128xf32>
      %138 = arith.divf %136, %137 : vector<2x128xf32>
      %c1 = arith.constant 1 : index
      %c0_49 = arith.constant 0 : index
      %139 = vector.load %arg3[%c1, %c0_49] : memref<8x128xf32, #tpu.memory_space<vmem>>, vector<1x128xf32>
      %c2 = arith.constant 2 : index
      %c0_50 = arith.constant 0 : index
      %140 = vector.load %arg3[%c2, %c0_50] : memref<8x128xf32, #tpu.memory_space<vmem>>, vector<1x1xf32>
      %141 = vector.broadcast %139 : vector<1x128xf32> to vector<2x128xf32>
      %142 = arith.mulf %138, %141 : vector<2x128xf32>
      %cst_51 = arith.constant dense<0.000000e+00> : vector<2xf32>
      %143 = vector.multi_reduction <add>, %142, %cst_51 [1] : vector<2x128xf32> to vector<2xf32>
      %144 = vector.shape_cast %143 : vector<2xf32> to vector<2x1xf32>
      %145 = vector.broadcast %140 : vector<1x1xf32> to vector<2x1xf32>
      %146 = arith.addf %144, %145 : vector<2x1xf32>
      %cst_52 = arith.constant 0.000000e+00 : f32
      %147 = vector.broadcast %cst_52 : f32 to vector<2x1xf32>
      %148 = arith.subf %147, %146 : vector<2x1xf32>
      %149 = math.exp %148 : vector<2x1xf32>
      %cst_53 = arith.constant 1.000000e+00 : f32
      %150 = vector.broadcast %cst_53 : f32 to vector<2x1xf32>
      %151 = arith.addf %150, %149 : vector<2x1xf32>
      %cst_54 = arith.constant 1.000000e+00 : f32
      %152 = vector.broadcast %cst_54 : f32 to vector<2x1xf32>
      %153 = arith.divf %152, %151 : vector<2x1xf32>
      %c0_55 = arith.constant 0 : index
      %c0_56 = arith.constant 0 : index
      %154 = vector.load %arg10[%c0_55, %c0_56] : memref<2x1xf32, #tpu.memory_space<vmem>>, vector<2x1xf32>
      tpu.vector_store %arg10[%c0_55, %c0_56], %153 {strides = array<i32>} : memref<2x1xf32, #tpu.memory_space<vmem>>, vector<2x1xf32>,
    } else {
    }
    return
  }
  func.func @transform_0(%arg0: i32) -> (i32, i32) {
    %c0_i32 = arith.constant 0 : i32
    %c0_i32_0 = arith.constant 0 : i32
    %c0_i32_1 = arith.constant 0 : i32
    return %c0_i32, %c0_i32_0 : i32, i32
  }
  func.func @transform_1(%arg0: i32) -> (i32, i32) {
    %c0_i32 = arith.constant 0 : i32
    %c0_i32_0 = arith.constant 0 : i32
    %c0_i32_1 = arith.constant 0 : i32
    return %c0_i32, %c0_i32_0 : i32, i32
  }
  func.func @transform_2(%arg0: i32) -> (i32, i32) {
    %c0_i32 = arith.constant 0 : i32
    %c0_i32_0 = arith.constant 0 : i32
    %c0_i32_1 = arith.constant 0 : i32
    return %c0_i32, %c0_i32_0 : i32, i32
  }
  func.func @transform_3(%arg0: i32) -> (i32, i32) {
    %c0_i32 = arith.constant 0 : i32
    %c0_i32_0 = arith.constant 0 : i32
    %c0_i32_1 = arith.constant 0 : i32
    return %c0_i32, %c0_i32_0 : i32, i32
  }
  func.func @transform_4(%arg0: i32) -> (i32, i32, i32) {
    %c0_i32 = arith.constant 0 : i32
    %c0_i32_0 = arith.constant 0 : i32
    %c0_i32_1 = arith.constant 0 : i32
    return %arg0, %c0_i32, %c0_i32_0 : i32, i32, i32
  }
  func.func @transform_5(%arg0: i32) -> (i32, i32, i32) {
    %c0_i32 = arith.constant 0 : i32
    %c0_i32_0 = arith.constant 0 : i32
    %c0_i32_1 = arith.constant 0 : i32
    return %arg0, %c0_i32, %c0_i32_0 : i32, i32, i32
  }
  func.func @transform_6(%arg0: i32) -> (i32, i32, i32) {
    %c0_i32 = arith.constant 0 : i32
    %c0_i32_0 = arith.constant 0 : i32
    %c0_i32_1 = arith.constant 0 : i32
    return %arg0, %c0_i32, %c0_i32_0 : i32, i32, i32
  }
  func.func @transform_7(%arg0: i32) -> (i32, i32, i32) {
    %c0_i32 = arith.constant 0 : i32
    %c0_i32_0 = arith.constant 0 : i32
    %c0_i32_1 = arith.constant 0 : i32
    return %arg0, %c0_i32, %c0_i32_0 : i32, i32, i32
  }
  func.func @transform_8(%arg0: i32) -> (i32, i32, i32) {
    %c0_i32 = arith.constant 0 : i32
    %c0_i32_0 = arith.constant 0 : i32
    %c0_i32_1 = arith.constant 0 : i32
    return %arg0, %c0_i32, %c0_i32_0 : i32, i32, i32
  }
  func.func @transform_9(%arg0: i32) -> (i32, i32) {
    %c0_i32 = arith.constant 0 : i32
    %c0_i32_0 = arith.constant 0 : i32
    %c0_i32_1 = arith.constant 0 : i32
    return %c0_i32, %c0_i32_0 : i32, i32
  }
}

</mosaic_0001>

<bundles_post_ra>
// kernel: transformer_encoder_forward.1
= control target key start
LH: loop header
LB: loop body
LE: loop exit
PB: predicated region body
PF: predicated region fallthrough
CT: control target
= control target key end

     0   :  { %s6990_s0 = inlined_call_operand.hbm [shape: f32[16,67], index: 0, kind: input, shape index: {}]   ;;  %s6991_s1 = inlined_call_operand.hbm [shape: f32[67,128], index: 1, kind: input, shape index: {}]   ;;  %s6992_s2 = inlined_call_operand.hbm [shape: f32[8,128], index: 2, kind: input, shape index: {}]   ;;  %s6993_s3 = inlined_call_operand.hbm [shape: f32[32,128], index: 3, kind: input, shape index: {}]   ;;  %s6994_s4 = inlined_call_operand.hbm [shape: f32[3,128,384], index: 4, kind: input, shape index: {}]   ;;  %s6995_s5 = inlined_call_operand.hbm [shape: f32[3,128,128], index: 5, kind: input, shape index: {}]   ;;  %s6996_s6 = inlined_call_operand.hbm [shape: f32[3,128,256], index: 6, kind: input, shape index: {}]   ;;  %s6997_s7 = inlined_call_operand.hbm [shape: f32[3,256,128], index: 7, kind: input, shape index: {}]   ;;  %s6998_s8 = inlined_call_operand.hbm [shape: f32[3,8,256], index: 8, kind: input, shape index: {}]   ;;  %s6999_s9 = inlined_call_operand.vmem [shape: f32[2,1], index: 9, kind: output, shape index: {}]  }
   0x1   :  { %7124 = sst [smem:[#allocation78_spill]] %s6990_s0 }
   0x2   :  { %7125 = sst [smem:[#allocation79_spill]] %s6994_s4 }
   0x3   :  { %7126 = sst [smem:[#allocation80_spill]] %s6995_s5 }
   0x4   :  { %7127 = sst [smem:[#allocation81_spill]] %s6996_s6 }
   0x5   :  { %7128 = sst [smem:[#allocation82_spill]] %s6998_s8 }
   0x6   :  { %7129 = sst [smem:[#allocation83_spill]] %s6999_s9 }
   0x7   :  { %14 = vsyncpa [#allocation4], 0 }
   0x8   :  { %15 = vsyncpa [#allocation6], 0 }
   0x9   :  { %16 = vsyncpa [#allocation9], 0  ;;  %s5369_s30 = smov 0   ;;  %s5371_s10 = smov 0  }
   0xa   :  { %s5373_s11 = smov 0   ;;  %s5375_s12 = smov 0  }
   0xb LB: > { %7130 = sst [smem:[#allocation19_spill]] %s5292_s10  ;;  %s5388_s13 = sadd.s32 4294967295, %s5300_s12   ;;  %s5300_s12 = sphi %s5375_s12, %s7302_s12   ;;  %s5296_s11 = sphi %s5373_s11, %s7305_s11   ;;  %s5292_s10 = sphi %s5371_s10, %s7304_s10   ;;  %s5288_s30 = sphi %s5369_s30, %s7303_s30  }
   0xc   : > { %7131 = sst [smem:[#allocation20_spill]] %s5296_s11  ;;  %s5391_s14 = sadd.s32 1, %s5300_s12  }
   0xd   : > { %7132 = sst [smem:[#allocation21_spill]] %s5388_s13  ;;  %s110_s15 = ssub.s32 %s5300_s12, %s5391_s14 }
   0xe   : > { %7133 = sst [smem:[#allocation22_spill]] %s5391_s14  ;;  %s113_s16 = sadd.s32 1, %s5296_s11 }
   0xf   : > { %p111_p0 = scmp.eq.s32.totalorder %s110_s15, 0  ;;  %p120_p1 = scmp.ne.s32.totalorder %s5296_s11, %s5292_s10 }
  0x10   : > { %p121_p2 = scmp.eq.s32.totalorder %s5300_s12, 0  ;;  %p126_p3 = scmp.ne.s32.totalorder %s5292_s10, %s5288_s30 }
  0x11   : > { %s5401_s17 = scalar_select %p111_p0, %s5296_s11, %s113_s16  }
  0x12   : > { %p5403_p4 = por %p121_p2, %p120_p1  ;;  %p7000_p5 = scmp.eq.s32.totalorder %s5388_s13, 0 }
  0x13   : > { %7134 = sst [smem:[#allocation23_spill]] %s5401_s17  ;;  %p3815_p6 = scmp.ge.s32.totalorder %s5300_s12, 1 }
  0x14   : > { %s7135_s18 = scalar_select %p5403_p4, 1, 0 }
  0x15   : > { %p262_p7 = scmp.lt.s32.totalorder %s5300_s12, 4  ;;  %p5412_p8 = por %p7000_p5, %p126_p3 }
  0x16   : > { %s5302_s21 = smov [#allocation3]   ;;  %s325_s24 = sand.u32 1, %s5300_s12  }
  0x17   : > { %s7136_s19 = scalar_select %p5412_p8, 1, 0 }
  0x18   : > { %p5417_p10 = pnand %p3815_p6, %p262_p7  ;;  %s274_s22 = sshll.u32 %s5302_s21, 4  ;;  %s275_s22 = int_to_ptr.vmem [resolvable:$true] %s274_s22 }
  0x19   : > { %7137 = sst [smem:[#allocation24_spill]] %s7136_s19  ;;  %s5432_s25 = sand.u32 1, %s5296_s11  }
  0x1a   : > { %s7138_s20 = scalar_select %p5417_p10, 1, 0 }
  0x1b   : > { %p4636_p11 = pneg %p5417_p10  ;;  %s7141_s0 = sld [smem:[#allocation78_spill]] }
  0x1c   : > { %7139 = sst [smem:[#allocation25_spill]] %s7138_s20 }
  0x1d   : > { %p5425_p12 = pnand %p4636_p11, %p7000_p5 }
  0x1f   : > { %s7140_s23 = scalar_select %p5425_p12, 1, 0 }
  0x20   : > { %p5442_p1 = pneg %p5425_p12 }
  0x21   : > { %s4992_s28 = scalar_lea.hbm %s7141_s0, 256 }
  0x22   : > { %p4993_p0 = scmp.ne.s32.totalorder %s7141_s0, %s4992_s28  ;;  %p4999_p6 = scmp.lt.u32.totalorder %s4992_s28, %s7141_s0 }
  0x23   : > { %s7142_s15 = scalar_select %p5442_p1, 1, 0 }
  0x24   : > { %p4995_p2 = pnand %p5442_p1, %p4993_p0 }
  0x26   : > { %p4996_p3 = pneg %p4995_p2 }
  0x28   : > { %p5001_p7 = pnand %p4999_p6, %p4996_p3 }
  0x2a   : > { %5004 = shalt.err (!%p5001_p7)
}
  0x2b   : > { %s5005_s26 = scalar_lea.vmem %s275_s22, 256  ;;  %p5013_p13 = scmp.lt.s32.totalorder %s275_s22, %s275_s22 }
  0x2c   : > { %p5006_p11 = scmp.ne.s32.totalorder %s275_s22, %s5005_s26  ;;  %p5014_p8 = scmp.lt.s32.totalorder %s5005_s26, %s5005_s26 }
  0x2e   : > { %p5008_p9 = pnand %p5006_p11, %p5442_p1  ;;  %p5015_p10 = por %p5014_p8, %p5013_p13 }
  0x30   : > { %p5009_p5 = pneg %p5008_p9 }
  0x32   : > { %p5016_p4 = pnand %p5015_p10, %p5009_p5 }
  0x34   : > { %5019 = shalt.err (!%p5016_p4)
}
  0x35   : > { %s7006_s27 = smov 128   ;;  %s7012_s28 = smov 8  }
  0x36   : > { %4639 = dma.hbm_to_vmem [thread:$0]  (!%p5425_p12), %s7141_s0, 256, %s275_s22, [#allocation4], %s7006_s27, %s7006_s27, %s7012_s28  }
  0x37   : > { %s4607_s16 = smul.u32 384, %s5432_s25  ;;  %p7143_p9 = scmp.ne.s32.totalorder %s7135_s18, 0 }
  0x38   : > { %p7144_p8 = scmp.lt.s32.totalorder %s5300_s12, 3  ;;  %s4608_s26 = smul.u32 6144, %s5300_s12 }
  0x39   : > { %s7146_s4 = sld [smem:[#allocation79_spill]]  ;;  %s329_s29 = scalar_lea.vmem [#allocation10], %s4607_s16 }
  0x3a   : > { %p5466_p5 = pnand %p7144_p8, %p7143_p9  ;;  %s336_s22 = sshll.u32 %s329_s29, 4  ;;  %s5476_s22 = int_to_ptr.vmem [resolvable:$true] %s336_s22 }
  0x3b   : > { %s5478_s18 = scalar_lea.sflag [#allocation4], %s325_s24 }
  0x3c   : > { %s7145_s21 = scalar_select %p5466_p5, 1, 0 }
  0x3d   : > { %p5484_p10 = pneg %p5466_p5 }
  0x3f   : > { %s5474_s14 = scalar_lea.hbm %s7146_s4, %s4608_s26  ;;  %s5025_s16 = scalar_lea.hbm %s7146_s4, 18432 }
  0x40   : > { %s5020_s30 = scalar_lea.hbm %s5474_s14, 6144  ;;  %p5026_p2 = scmp.lt.u32.totalorder %s5474_s14, %s7146_s4 }
  0x41   : > { %p5021_p4 = scmp.ne.s32.totalorder %s5474_s14, %s5020_s30  ;;  %p5027_p3 = scmp.lt.u32.totalorder %s5025_s16, %s5020_s30 }
  0x42   : > { %s7147_s27 = scalar_select %p5484_p10, 1, 0 }
  0x43   : > { %p5023_p13 = pnand %p5484_p10, %p5021_p4  ;;  %p5028_p6 = por %p5027_p3, %p5026_p2 }
  0x44   : > { %p5029_p7 = scmp.lt.u32.totalorder %s5020_s30, %s5474_s14 }
  0x45   : > { %p5024_p0 = pneg %p5023_p13 }
  0x46   : > { %p5030_p11 = por %p5029_p7, %p5028_p6 }
  0x48   : > { %p5031_p9 = pnand %p5030_p11, %p5024_p0 }
  0x4a   : > { %5034 = shalt.err (!%p5031_p9)
}
  0x4b   : > { %s5035_s24 = scalar_lea.vmem %s5476_s22, 6144  ;;  %s5305_s11 = smov [#allocation10]  }
  0x4c   : > { %p5036_p8 = scmp.ne.s32.totalorder %s5476_s22, %s5035_s24  ;;  %s5040_s17 = sshll.u32 %s5305_s11, 4  ;;  %s5041_s17 = int_to_ptr.vmem [resolvable:$false] %s5040_s17 }
  0x4d   : > { %s5042_s26 = scalar_lea.vmem %s5041_s17, 12288  ;;  %p5043_p12 = scmp.lt.s32.totalorder %s5476_s22, %s5041_s17 }
  0x4e   : > { %p5038_p4 = pnand %p5036_p8, %p5484_p10  ;;  %p5044_p1 = scmp.lt.s32.totalorder %s5042_s26, %s5035_s24 }
  0x50   : > { %p5039_p13 = pneg %p5038_p4  ;;  %p5045_p2 = por %p5044_p1, %p5043_p12 }
  0x52   : > { %p5046_p3 = pnand %p5045_p2, %p5039_p13 }
  0x54   : > { %5049 = shalt.err (!%p5046_p3)
}
  0x55   : > { %s5306_s30 = smov 384   ;;  %s5307_s16 = smov 24  }
  0x56   : > { %4652 = dma.hbm_to_vmem [thread:$0]  (!%p5466_p5), %s5474_s14, 6144, %s5476_s22, %s5478_s18, %s5306_s30, %s5306_s30, %s5307_s16  }
  0x57   : > { %s3822_s29 = sshll.u32 %s5432_s25, 7  ;;  %s3917_s11 = sshll.u32 %s5300_s12, 11 }
  0x58   : > { %s7148_s5 = sld [smem:[#allocation80_spill]]  ;;  %s350_s26 = scalar_lea.vmem [#allocation11], %s3822_s29 }
  0x59   : > { %s357_s0 = sshll.u32 %s350_s26, 4  ;;  %s7014_s4 = sshll.u32 %s5432_s25, 8  ;;  %s5516_s0 = int_to_ptr.vmem [resolvable:$true] %s357_s0 }
  0x5e   : > { %s5513_s24 = scalar_lea.hbm %s7148_s5, %s3917_s11  ;;  %s5055_s28 = scalar_lea.hbm %s7148_s5, 6144 }
  0x5f   : > { %s5050_s9 = scalar_lea.hbm %s5513_s24, 2048  ;;  %p5056_p6 = scmp.lt.u32.totalorder %s5513_s24, %s7148_s5 }
  0x60   : > { %p5051_p12 = scmp.ne.s32.totalorder %s5513_s24, %s5050_s9  ;;  %p5057_p7 = scmp.lt.u32.totalorder %s5055_s28, %s5050_s9 }
  0x61   : > { %p5059_p9 = scmp.lt.u32.totalorder %s5050_s9, %s5513_s24 }
  0x62   : > { %p5053_p1 = pnand %p5051_p12, %p5484_p10  ;;  %p5058_p11 = por %p5057_p7, %p5056_p6 }
  0x64   : > { %p5054_p0 = pneg %p5053_p1  ;;  %p5060_p8 = por %p5059_p9, %p5058_p11 }
  0x66   : > { %p5061_p4 = pnand %p5060_p8, %p5054_p0 }
  0x68   : > { %5064 = shalt.err (!%p5061_p4)
}
  0x69   : > { %s5065_s29 = scalar_lea.vmem %s5516_s0, 2048  ;;  %s5308_s11 = smov [#allocation11]  }
  0x6a   : > { %p5066_p13 = scmp.ne.s32.totalorder %s5516_s0, %s5065_s29  ;;  %s5070_s17 = sshll.u32 %s5308_s11, 4  ;;  %s5071_s17 = int_to_ptr.vmem [resolvable:$false] %s5070_s17 }
  0x6b   : > { %s5072_s26 = scalar_lea.vmem %s5071_s17, 4096  ;;  %p5073_p12 = scmp.lt.s32.totalorder %s5516_s0, %s5071_s17 }
  0x6c   : > { %p5068_p2 = pnand %p5066_p13, %p5484_p10  ;;  %p5074_p1 = scmp.lt.s32.totalorder %s5072_s26, %s5065_s29 }
  0x6e   : > { %p5069_p3 = pneg %p5068_p2  ;;  %p5075_p6 = por %p5074_p1, %p5073_p12 }
  0x70   : > { %p5076_p7 = pnand %p5075_p6, %p5069_p3 }
  0x72   : > { %5079 = shalt.err (!%p5076_p7)
}
  0x73   : > { %s7149_s9 = smov 8   ;;  %s7150_s14 = smov 128  }
  0x74   : > { %4655 = dma.hbm_to_vmem [thread:$0]  (!%p5466_p5), %s5513_s24, 2048, %s5516_s0, %s5478_s18, %s7150_s14, %s7150_s14, %s7149_s9  }
  0x75   : > { %s3918_s22 = sshll.u32 %s5300_s12, 12  ;;  %s371_s28 = scalar_lea.vmem [#allocation12], %s7014_s4 }
  0x76   : > { %s378_s30 = sshll.u32 %s371_s28, 4  ;;  %s7151_s6 = sld [smem:[#allocation81_spill]]  ;;  %s5553_s30 = int_to_ptr.vmem [resolvable:$true] %s378_s30 }
  0x7c   : > { %s5551_s11 = scalar_lea.hbm %s7151_s6, %s3918_s22  ;;  %s5085_s26 = scalar_lea.hbm %s7151_s6, 12288 }
  0x7d   : > { %s5080_s17 = scalar_lea.hbm %s5551_s11, 4096  ;;  %p5086_p8 = scmp.lt.u32.totalorder %s5551_s11, %s7151_s6 }
  0x7e   : > { %p5081_p0 = scmp.ne.s32.totalorder %s5551_s11, %s5080_s17  ;;  %p5087_p4 = scmp.lt.u32.totalorder %s5085_s26, %s5080_s17 }
  0x7f   : > { %p5089_p2 = scmp.lt.u32.totalorder %s5080_s17, %s5551_s11 }
  0x80   : > { %p5083_p11 = pnand %p5081_p0, %p5484_p10  ;;  %p5088_p13 = por %p5087_p4, %p5086_p8 }
  0x82   : > { %p5084_p9 = pneg %p5083_p11  ;;  %p5090_p3 = por %p5089_p2, %p5088_p13 }
  0x84   : > { %p5091_p12 = pnand %p5090_p3, %p5084_p9 }
  0x86   : > { %5094 = shalt.err (!%p5091_p12)
}
  0x87   : > { %s5095_s16 = scalar_lea.vmem %s5553_s30, 4096  ;;  %s5309_s29 = smov [#allocation12]  }
  0x88   : > { %p5096_p1 = scmp.ne.s32.totalorder %s5553_s30, %s5095_s16  ;;  %s5100_s0 = sshll.u32 %s5309_s29, 4  ;;  %s5101_s0 = int_to_ptr.vmem [resolvable:$false] %s5100_s0 }
  0x89   : > { %s5102_s4 = scalar_lea.vmem %s5101_s0, 8192  ;;  %p5103_p0 = scmp.lt.s32.totalorder %s5553_s30, %s5101_s0 }
  0x8a   : > { %p5098_p6 = pnand %p5096_p1, %p5484_p10  ;;  %p5104_p11 = scmp.lt.s32.totalorder %s5102_s4, %s5095_s16 }
  0x8c   : > { %p5099_p7 = pneg %p5098_p6  ;;  %p5105_p8 = por %p5104_p11, %p5103_p0 }
  0x8e   : > { %p5106_p4 = pnand %p5105_p8, %p5099_p7 }
  0x90   : > { %5109 = shalt.err (!%p5106_p4)
}
  0x91   : > { %s5310_s17 = smov 256   ;;  %s5311_s24 = smov 16  }
  0x92   : > { %4658 = dma.hbm_to_vmem [thread:$0]  (!%p5466_p5), %s5551_s11, 4096, %s5553_s30, %s5478_s18, %s5310_s17, %s5310_s17, %s5311_s24  }
  0x93   : > { %s5312_s26 = smov [#allocation5]   ;;  %s5582_s16 = scalar_lea.hbm %s6997_s7, %s3918_s22 }
  0x94   : > { %s287_s28 = sshll.u32 %s5312_s26, 4  ;;  %s7152_s4 = sshll.u32 %s5432_s25, 8  ;;  %s288_s28 = int_to_ptr.vmem [resolvable:$true] %s287_s28 }
  0x95   : > { %s392_s5 = scalar_lea.vmem [#allocation13], %s7152_s4  ;;  %s5110_s13 = scalar_lea.hbm %s6991_s1, 1152 }
  0x96   : > { %s399_s6 = sshll.u32 %s392_s5, 4  ;;  %p5111_p9 = scmp.ne.s32.totalorder %s6991_s1, %s5110_s13  ;;  %s5607_s6 = int_to_ptr.vmem [resolvable:$true] %s399_s6 }
  0x97   : > { %p7153_p13 = scmp.ne.s32.totalorder %s7142_s15, 0  ;;  %p5117_p12 = scmp.lt.u32.totalorder %s5110_s13, %s6991_s1 }
  0x99   : > { %p5113_p2 = pnand %p5111_p9, %p7153_p13 }
  0x9b   : > { %p5114_p3 = pneg %p5113_p2 }
  0x9d   : > { %p5119_p1 = pnand %p5117_p12, %p5114_p3 }
  0x9f   : > { %5122 = shalt.err (!%p5119_p1)
}
  0xa0   : > { %s5123_s22 = scalar_lea.vmem %s288_s28, 1152  ;;  %p5131_p11 = scmp.lt.s32.totalorder %s288_s28, %s288_s28 }
  0xa1   : > { %p5124_p6 = scmp.ne.s32.totalorder %s288_s28, %s5123_s22  ;;  %p5132_p8 = scmp.lt.s32.totalorder %s5123_s22, %s5123_s22 }
  0xa3   : > { %p5126_p7 = pnand %p5124_p6, %p7153_p13  ;;  %p5133_p4 = por %p5132_p8, %p5131_p11 }
  0xa5   : > { %p5127_p0 = pneg %p5126_p7 }
  0xa7   : > { %p5134_p5 = pnand %p5133_p4, %p5127_p0 }
  0xa9   : > { %5137 = shalt.err (!%p5134_p5)
}
  0xaa   : > { %p7154_p9 = scmp.ne.s32.totalorder %s7140_s23, 0  ;;  %s5138_s10 = scalar_lea.hbm %s5582_s16, 4096 }
  0xab   : > { %p5139_p2 = scmp.ne.s32.totalorder %s5582_s16, %s5138_s10  ;;  %s5143_s20 = scalar_lea.hbm %s6997_s7, 12288 }
  0xac   : > { %4642 = dma.hbm_to_vmem [thread:$0]  (!%p7154_p9), %s6991_s1, 1152, %s288_s28, [#allocation6], %s7150_s14, %s7150_s14, %s7149_s9  }
  0xad   : > { %p5141_p5 = pnand %p5139_p2, %p5484_p10  ;;  %p5144_p12 = scmp.lt.u32.totalorder %s5582_s16, %s6997_s7 }
  0xae   : > { %p5145_p1 = scmp.lt.u32.totalorder %s5143_s20, %s5138_s10  ;;  %p5147_p7 = scmp.lt.u32.totalorder %s5138_s10, %s5582_s16 }
  0xaf   : > { %p5142_p3 = pneg %p5141_p5 }
  0xb0   : > { %p5146_p6 = por %p5145_p1, %p5144_p12 }
  0xb2   : > { %p5148_p0 = por %p5147_p7, %p5146_p6 }
  0xb4   : > { %p5149_p11 = pnand %p5148_p0, %p5142_p3 }
  0xb6   : > { %5152 = shalt.err (!%p5149_p11)
}
  0xb7   : > { %s5153_s26 = scalar_lea.vmem %s5607_s6, 4096  ;;  %s5313_s28 = smov [#allocation13]  }
  0xb8   : > { %p5154_p8 = scmp.ne.s32.totalorder %s5607_s6, %s5153_s26  ;;  %s5158_s29 = sshll.u32 %s5313_s28, 4  ;;  %s5159_s29 = int_to_ptr.vmem [resolvable:$false] %s5158_s29 }
  0xb9   : > { %s5160_s0 = scalar_lea.vmem %s5159_s29, 8192  ;;  %p5161_p5 = scmp.lt.s32.totalorder %s5607_s6, %s5159_s29 }
  0xba   : > { %p5156_p4 = pnand %p5154_p8, %p5484_p10  ;;  %p5162_p9 = scmp.lt.s32.totalorder %s5160_s0, %s5153_s26 }
  0xbc   : > { %p5157_p2 = pneg %p5156_p4  ;;  %p5163_p12 = por %p5162_p9, %p5161_p5 }
  0xbe   : > { %p5164_p1 = pnand %p5163_p12, %p5157_p2 }
  0xc0   : > { %5167 = shalt.err (!%p5164_p1)
}
  0xc1   : > { %p7155_p3 = scmp.ne.s32.totalorder %s7145_s21, 0  ;;  %s5314_s4 = smov [#allocation7]  }
  0xc2   : > { %s301_s30 = sshll.u32 %s5314_s4, 4  ;;  %s5315_s11 = smov [#allocation8]   ;;  %s302_s30 = int_to_ptr.vmem [resolvable:$true] %s301_s30 }
  0xc3   : > { %4661 = dma.hbm_to_vmem [thread:$0]  (!%p7155_p3), %s5582_s16, 4096, %s5607_s6, %s5478_s18, %s7150_s14, %s7150_s14, %s7149_s9  }
  0xc4   : > { %s311_s22 = sshll.u32 %s5315_s11, 4  ;;  %s5168_s10 = scalar_lea.hbm %s6992_s2, 128  ;;  %s312_s22 = int_to_ptr.vmem [resolvable:$true] %s311_s22 }
  0xc5   : > { %p5169_p9 = scmp.ne.s32.totalorder %s6992_s2, %s5168_s10  ;;  %p5175_p0 = scmp.lt.u32.totalorder %s5168_s10, %s6992_s2 }
  0xc7   : > { %p5171_p6 = pnand %p5169_p9, %p7153_p13 }
  0xc9   : > { %p5172_p7 = pneg %p5171_p6 }
  0xcb   : > { %p5177_p11 = pnand %p5175_p0, %p5172_p7 }
  0xcd   : > { %5180 = shalt.err (!%p5177_p11)
}
  0xce   : > { %s5181_s6 = scalar_lea.vmem %s302_s30, 128  ;;  %p5189_p5 = scmp.lt.s32.totalorder %s302_s30, %s302_s30 }
  0xcf   : > { %p5182_p8 = scmp.ne.s32.totalorder %s302_s30, %s5181_s6  ;;  %p5190_p12 = scmp.lt.s32.totalorder %s5181_s6, %s5181_s6 }
  0xd1   : > { %p5184_p4 = pnand %p5182_p8, %p7153_p13  ;;  %p5191_p1 = por %p5190_p12, %p5189_p5 }
  0xd3   : > { %p5185_p2 = pneg %p5184_p4 }
  0xd5   : > { %p5192_p3 = pnand %p5191_p1, %p5185_p2 }
  0xd7   : > { %5195 = shalt.err (!%p5192_p3)
}
  0xd8   : > { %p7156_p9 = scmp.ne.s32.totalorder %s7140_s23, 0  ;;  %s3831_s26 = sshll.u32 %s5432_s25, 4 }
  0xd9   : > { %s5196_s0 = scalar_lea.hbm %s6993_s3, 512 }
  0xda   : > { %4645 = dma.hbm_to_vmem [thread:$0]  (!%p7156_p9), %s6992_s2, 128, %s302_s30, [#allocation6]  }
  0xdb   : > { %p5197_p6 = scmp.ne.s32.totalorder %s6993_s3, %s5196_s0  ;;  %p5203_p0 = scmp.lt.u32.totalorder %s5196_s0, %s6993_s3 }
  0xdd   : > { %p5199_p3 = pnand %p5197_p6, %p7153_p13 }
  0xdf   : > { %p5200_p7 = pneg %p5199_p3 }
  0xe1   : > { %p5205_p11 = pnand %p5203_p0, %p5200_p7 }
  0xe3   : > { %5208 = shalt.err (!%p5205_p11)
}
  0xe4   : > { %s5209_s30 = scalar_lea.vmem %s312_s22, 512  ;;  %p5217_p5 = scmp.lt.s32.totalorder %s312_s22, %s312_s22 }
  0xe5   : > { %p5210_p8 = scmp.ne.s32.totalorder %s312_s22, %s5209_s30  ;;  %p5218_p12 = scmp.lt.s32.totalorder %s5209_s30, %s5209_s30 }
  0xe7   : > { %p5212_p4 = pnand %p5210_p8, %p7153_p13  ;;  %p5219_p1 = por %p5218_p12, %p5217_p5 }
  0xe9   : > { %p5213_p2 = pneg %p5212_p4 }
  0xeb   : > { %p5220_p10 = pnand %p5219_p1, %p5213_p2 }
  0xed   : > { %5223 = shalt.err (!%p5220_p10)
}
  0xee   : > { %4648 = dma.hbm_to_vmem [thread:$0]  (!%p7156_p9), %s6993_s3, 512, %s312_s22, [#allocation9], %s7150_s14, %s7150_s14, %s7149_s9  }
  0xef   : > { %s3920_s13 = sshll.u32 %s5300_s12, 8  ;;  %s7157_s20 = sld [smem:[#allocation82_spill]] }
  0xf0   : > { %s413_s23 = scalar_lea.vmem [#allocation14], %s3831_s26  ;;  %p7158_p13 = scmp.ne.s32.totalorder %s7147_s27, 0 }
  0xf1   : > { %s421_s6 = sshll.u32 %s413_s23, 4  ;;  %s422_s6 = int_to_ptr.vmem [resolvable:$true] %s421_s6 }
  0xf5   : > { %s5678_s17 = scalar_lea.hbm %s7157_s20, %s3920_s13  ;;  %s5229_s12 = scalar_lea.hbm %s7157_s20, 768 }
  0xf6   : > { %s5224_s16 = scalar_lea.hbm %s5678_s17, 256  ;;  %p5230_p9 = scmp.lt.u32.totalorder %s5678_s17, %s7157_s20 }
  0xf7   : > { %p5225_p10 = scmp.ne.s32.totalorder %s5678_s17, %s5224_s16  ;;  %p5231_p7 = scmp.lt.u32.totalorder %s5229_s12, %s5224_s16 }
  0xf8   : > { %p5233_p11 = scmp.lt.u32.totalorder %s5224_s16, %s5678_s17 }
  0xf9   : > { %p5227_p6 = pnand %p5225_p10, %p7158_p13  ;;  %p5232_p0 = por %p5231_p7, %p5230_p9 }
  0xfb   : > { %p5228_p3 = pneg %p5227_p6  ;;  %p5234_p8 = por %p5233_p11, %p5232_p0 }
  0xfd   : > { %p5235_p4 = pnand %p5234_p8, %p5228_p3 }
  0xff   : > { %5238 = shalt.err (!%p5235_p4)
}
 0x100   : > { %s5239_s26 = scalar_lea.vmem %s422_s6, 256  ;;  %s5316_s28 = smov [#allocation14]  }
 0x101   : > { %p5240_p2 = scmp.ne.s32.totalorder %s422_s6, %s5239_s26  ;;  %s5244_s29 = sshll.u32 %s5316_s28, 4  ;;  %s5245_s29 = int_to_ptr.vmem [resolvable:$false] %s5244_s29 }
 0x102   : > { %s5246_s0 = scalar_lea.vmem %s5245_s29, 512  ;;  %p5247_p1 = scmp.lt.s32.totalorder %s422_s6, %s5245_s29 }
 0x103   : > { %p5242_p5 = pnand %p5240_p2, %p7158_p13  ;;  %p5248_p10 = scmp.lt.s32.totalorder %s5246_s0, %s5239_s26 }
 0x105   : > { %p5243_p12 = pneg %p5242_p5  ;;  %p5249_p6 = por %p5248_p10, %p5247_p1 }
 0x107   : > { %p5250_p7 = pnand %p5249_p6, %p5243_p12 }
 0x109   : > { %5253 = shalt.err (!%p5250_p7)
}
 0x10a   : > { %p7159_p9 = scmp.ne.s32.totalorder %s7145_s21, 0  ;;  %s7160_s4 = sld [smem:[#allocation25_spill]] }
 0x10c   : > { %4664 = dma.hbm_to_vmem [thread:$0]  (!%p7159_p9), %s5678_s17, 256, %s422_s6, %s5478_s18  }
 0x110   : > { %p7161_p3 = scmp.ne.s32.totalorder %s7160_s4, 0 }
 0x112   : > { %430 = sbr.rel (%p7161_p3) target bundleno = 3187 (0xc73), region = 56 }
 0x119   : > { %s7162_s27 = sld [smem:[#allocation21_spill]] }
 0x11f   : > { %p7163_p13 = scmp.eq.s32.totalorder %s7162_s27, 0 }
 0x121   : > { %5271 = dma.done.wait (%p7163_p13), [#allocation4], 256   ;;  %p7164_p0 = pmov %p7163_p13 }
 0x123   : > { %5273 = vsyncadd (%p7164_p0), [#allocation4], 4294967040  ;;  %p7165_p11 = pmov %p7164_p0 }
 0x124   : > { %p7166_p8 = pmov %p7164_p0 }
 0x125   : > { %5275 = dma.done.wait (%p7165_p11), [#allocation6], 1280  }
 0x126   : > { %5277 = vsyncadd (%p7166_p8), [#allocation6], 4294966016  ;;  %p7167_p4 = pmov %p7164_p0 }
 0x127   : > { %p7168_p2 = pmov %p7164_p0 }
 0x128   : > { %5279 = dma.done.wait (%p7167_p4), [#allocation9], 512  }
 0x129   : > { %5281 = vsyncadd (%p7168_p2), [#allocation9], 4294966784  ;;  %s7169_s21 = sld [smem:[#allocation19_spill]]  ;;  %s7170_s18 = sld [smem:[#allocation24_spill]] }
 0x12a   : > { %s448_s11 = sand.u32 1, %s7162_s27  }
 0x12b   : > { %s449_s30 = scalar_lea.sflag [#allocation4], %s448_s11 }
 0x12f   : > { %s450_s5 = sand.u32 1, %s7169_s21   ;;  %p7171_p5 = scmp.ne.s32.totalorder %s7170_s18, 0 }
 0x130   : > { %s4609_s8 = smul.u32 384, %s450_s5 }
 0x132   : > { %s5714_s25 = scalar_lea.vmem [#allocation10], %s4609_s8 }
 0x133   : > { %5283 = dma.done.wait (%p7171_p5), %s449_s30, 16640  }
 0x134   : > { %5285 = vsyncadd (%p7171_p5), %s449_s30, 4294950656  ;;  %s3839_s10 = sshll.u32 %s450_s5, 7  ;;  %s3840_s13 = sshll.u32 %s450_s5, 8 }
 0x135   : > { %s3842_s15 = sshll.u32 %s450_s5, 4  ;;  %s5720_s19 = scalar_lea.vmem [#allocation11], %s3839_s10 }
 0x136   : > { %s5722_s17 = scalar_lea.vmem [#allocation12], %s3840_s13  ;;  %s5724_s23 = scalar_lea.vmem [#allocation13], %s3840_s13 }
 0x137   : > { %s5726_s6 = scalar_lea.vmem [#allocation14], %s3842_s15  ;;  %p7172_p12 = scmp.ne.s32.totalorder %s7162_s27, 0 }
 0x138   : > { %v544_v0 = vld [vmem:[#allocation5] sm:$0xff] (!%p7172_p12)  ;;  %v545_v1 = vld [vmem:[#allocation5 + $0x8] sm:$0xff] (!%p7172_p12)  ;;  %v546_v2 = vld [vmem:[#allocation5 + $0x10] sm:$0xff] (!%p7172_p12)  ;;  %vm558_vm0 = vcmask (!%p7172_p12), 547840   ;;  %vm565_vm1 = vcmask (!%p7172_p12), 1042432  }
 0x139   : > { %541 = sbr.rel (%p7172_p12) target bundleno = 551 (0x227), region = 96  ;;  %v4429_v3 = vpack.c.bf16 (!%p7172_p12), %v545_v1, %v544_v0  ;;  %v547_v4 = vld [vmem:[#allocation5 + $0x18] sm:$0xff] (!%p7172_p12)  ;;  %v548_v6 = vld [vmem:[#allocation5 + $0x20] sm:$0xff] (!%p7172_p12)  ;;  %v549_v7 = vld [vmem:[#allocation5 + $0x28] sm:$0xff] (!%p7172_p12) }
 0x13a   : > { %v4433_v5 = vpack.c.bf16 (!%p7172_p12), %v547_v4, %v546_v2  ;;  %v542_v8 = vld [vmem:[#allocation3] sm:$0xff] (!%p7172_p12)  ;;  %v4437_v9 = vpack.c.bf16 (!%p7172_p12), %v549_v7, %v548_v6  ;;  %v551_v11 = vld [vmem:[#allocation5 + $0x38] sm:$0xff] (!%p7172_p12)  ;;  %v552_v13 = vld [vmem:[#allocation5 + $0x40] sm:$0x7] (!%p7172_p12) }
 0x13b   : > { %4430 = vmatprep.subr.bf16.mxu0 (!%p7172_p12), %v4429_v3  ;;  %4156 = vmatprep.mubr.msk.f32.mxu0 (!%p7172_p12), %vm558_vm0, %v542_v8  ;;  %v550_v10 = vld [vmem:[#allocation5 + $0x30] sm:$0xff] (!%p7172_p12)  ;;  %v543_v14 = vld [vmem:[#allocation3 + $0x8] sm:$0xff] (!%p7172_p12)  ;;  %v3844_v15 = vld [vmem:[#allocation7] ss:$0 sm:$0xff] (!%p7172_p12) }
 0x13c   : > { %4432 = vmatpush3.bf16.msra.mxu0 (!%p7172_p12), %v4429_v3  ;;  %v4441_v12 = vpack.c.bf16 (!%p7172_p12), %v551_v11, %v550_v10 }
 0x13d   : > { %4434 = vmatprep.subr.bf16.mxu0 (!%p7172_p12), %v4433_v5 }
 0x140   : > { %4436 = vmatpush3.bf16.msra.mxu0 %v4433_v5 }
 0x141   : > { %4438 = vmatprep.subr.bf16.mxu0 %v4437_v9 }
 0x144   : > { %4440 = vmatpush3.bf16.msra.mxu0 %v4437_v9 }
 0x145   : > { %4442 = vmatprep.subr.bf16.mxu0 %v4441_v12 }
 0x148   : > { %4444 = vmatpush3.bf16.msra.mxu0 %v4441_v12 }
 0x149   : > { %4154 = vmatprep.subr.msk.mxu0 %vm565_vm1, %v552_v13 }
 0x14c   : > { %4155 = vmatpush3.msk.msra.mxu0 %vm565_vm1, %v552_v13 }
 0x14d   : > { %4157 = vmatmul.mubr.msk.f32.vlgmr.msra.gmra.mrb[0].mxu0 %vm558_vm0, %v543_v14 }
 0x220   : > { %v4158_v16 = vpop.f32.mrb[0].mxu0 }
 0x221   : > { %v641_v17 = vadd.f32 %v4158_v16, %v3844_v15  ;;  %v635_v18 = vpop.f32.mrb[1].mxu0 }
 0x222   : > { %v636_v19 = vadd.f32 %v3844_v15, %v635_v18 }
 0x223   : > { %v645_v20 = vmax.f32 %v641_v17, 0.0 }
 0x224   : > { %v644_v21 = vmax.f32 %v636_v19, 0.0 }
 0x225   : > { %647 = vst [vmem:[#allocation2 + $0x8] sm:$0xff] %v645_v20 }
 0x226   : > { %646 = vst [vmem:[#allocation2] sm:$0xff] %v644_v21 }
 0x227 PF: > { %v651_v22 = vld [vmem:[%s5714_s25 + $0x8] sm:$0xff]  ;;  %v654_v23 = vld [vmem:[%s5714_s25 + $0x20] sm:$0xff]  ;;  %v653_v26 = vld [vmem:[%s5714_s25 + $0x18] sm:$0xff]  ;;  %v7026_v29 = vmov 0.0   ;;  %vm1473_vm2 = vcmask 64512   ;;  %s7300_s16 = sld [smem:[#allocation21_spill]] }
 0x228   : > { %v650_v24 = vld [vmem:[%s5714_s25] sm:$0xff]  ;;  %v4445_v25 = vpack.c.bf16 %v654_v23, %v651_v22  ;;  %v657_v27 = vld [vmem:[%s5714_s25 + $0x38] sm:$0xff]  ;;  %v660_v28 = vld [vmem:[%s5714_s25 + $0x50] sm:$0xff]  ;;  %762 = vmatprep.mubr.f32.mxu0 %v7026_v29 }
 0x229   : > { %v4447_v30 = vpack.c.bf16 %v653_v26, %v650_v24  ;;  %v4449_v31 = vpack.c.bf16 %v660_v28, %v657_v27  ;;  %v656_v32 = vld [vmem:[%s5714_s25 + $0x30] sm:$0xff]  ;;  %v659_v33 = vld [vmem:[%s5714_s25 + $0x48] sm:$0xff]  ;;  %v666_v35 = vld [vmem:[%s5714_s25 + $0x80] sm:$0xff] }
 0x22a   : > { %v663_v34 = vld [vmem:[%s5714_s25 + $0x68] sm:$0xff]  ;;  %4446 = vmatprep.subr.bf16.mxu0 %v4445_v25  ;;  %v4451_v36 = vpack.c.bf16 %v659_v33, %v656_v32  ;;  %v662_v38 = vld [vmem:[%s5714_s25 + $0x60] sm:$0xff]  ;;  %v665_v39 = vld [vmem:[%s5714_s25 + $0x78] sm:$0xff] }
 0x22b   : > { %4448 = vmatpush1.bf16.msra.mxu0 %v4447_v30  ;;  %v4453_v37 = vpack.c.bf16 %v666_v35, %v663_v34  ;;  %v669_v40 = vld [vmem:[%s5714_s25 + $0x98] sm:$0xff]  ;;  %v672_v41 = vld [vmem:[%s5714_s25 + $0xb0] sm:$0xff]  ;;  %v4455_v42 = vpack.c.bf16 %v665_v39, %v662_v38  ;;  %v671_v45 = vld [vmem:[%s5714_s25 + $0xa8] sm:$0xff]  ;;  %v5318_v34 = vmov 1966171168  }
 0x22c   : > { %4450 = vmatprep.subr.bf16.mxu0 %v4449_v31  ;;  %v4457_v43 = vpack.c.bf16 %v672_v41, %v669_v40  ;;  %v668_v44 = vld [vmem:[%s5714_s25 + $0x90] sm:$0xff]  ;;  %v675_v46 = vld [vmem:[%s5714_s25 + $0xc8] sm:$0xff]  ;;  %v678_v47 = vld [vmem:[%s5714_s25 + $0xe0] sm:$0xff]  ;;  %v862_v35 = vunpack.c.l.s4 %v5318_v34 }
 0x22d   : > { %v5751_v48 = vld [vmem:[#allocation2] sm:$0xff]  ;;  %v655_v50 = vld [vmem:[%s5714_s25 + $0x28] sm:$0xff]  ;;  %v4459_v51 = vpack.c.bf16 %v671_v45, %v668_v44  ;;  %v674_v52 = vld [vmem:[%s5714_s25 + $0xc0] sm:$0xff]  ;;  %v4461_v56 = vpack.c.bf16 %v678_v47, %v675_v46  ;;  %p3912_p1 = scmp.ne.s32.totalorder %s7300_s16, 2 }
 0x22e   : > { %v652_v49 = vld [vmem:[%s5714_s25 + $0x10] sm:$0xff]  ;;  %4191 = vmatprep.mubr.f32.mxu1 %v5751_v48  ;;  %v658_v54 = vld [vmem:[%s5714_s25 + $0x40] sm:$0xff]  ;;  %v661_v55 = vld [vmem:[%s5714_s25 + $0x58] sm:$0xff]  ;;  %vm3637_vm3 = vcmask (!%p3912_p1), 1041409   ;;  %vm3640_vm4 = vcmask (!%p3912_p1), 1041408   ;;  %vm3655_vm5 = vcmask (!%p3912_p1), 1024  }
 0x22f   : > { %4452 = vmatpush1.bf16.msra.mxu0 %v4451_v36  ;;  %v4477_v53 = vpack.c.bf16 %v655_v50, %v652_v49  ;;  %v677_v57 = vld [vmem:[%s5714_s25 + $0xd8] sm:$0xff]  ;;  %v4481_v58 = vpack.c.bf16 %v661_v55, %v658_v54  ;;  %v664_v59 = vld [vmem:[%s5714_s25 + $0x70] sm:$0xff]  ;;  %v667_v60 = vld [vmem:[%s5714_s25 + $0x88] sm:$0xff]  ;;  %v864_v36 = vlaneseq  ;;  %s7301_s12 = sld [smem:[#allocation83_spill]] (!%p3912_p1) }
 0x230   : > { %4454 = vmatprep.subr.bf16.mxu0 %v4453_v37  ;;  %v681_v61 = vld [vmem:[%s5714_s25 + $0xf8] sm:$0xff]  ;;  %v684_v62 = vld [vmem:[%s5714_s25 + $0x110] sm:$0xff]  ;;  %v4463_v63 = vpack.c.bf16 %v677_v57, %v674_v52  ;;  %v4485_v1 = vpack.c.bf16 %v667_v60, %v664_v59  ;;  %v683_v3 = vld [vmem:[%s5714_s25 + $0x108] sm:$0xff]  ;;  %v863_v37 = vunpack.c.0.s8 %v862_v35 }
 0x231   : > { %4478 = vmatprep.subr.bf16.mxu1 %v4477_v53  ;;  %v680_v0 = vld [vmem:[%s5714_s25 + $0xf0] sm:$0xff]  ;;  %v4465_v2 = vpack.c.bf16 %v684_v62, %v681_v61  ;;  %v670_v4 = vld [vmem:[%s5714_s25 + $0xa0] sm:$0xff]  ;;  %v673_v5 = vld [vmem:[%s5714_s25 + $0xb8] sm:$0xff]  ;;  %v5786_v38 = vshrl.u32 %v864_v36, 7 }
 0x232   : > { %4480 = vmatpush3.bf16.msra.mxu1 %v4477_v53  ;;  %v687_v6 = vld [vmem:[%s5714_s25 + $0x128] sm:$0xff]  ;;  %v690_v7 = vld [vmem:[%s5714_s25 + $0x140] sm:$0xff]  ;;  %v4467_v8 = vpack.c.bf16 %v683_v3, %v680_v0  ;;  %v4489_v10 = vpack.c.bf16 %v673_v5, %v670_v4  ;;  %v689_v12 = vld [vmem:[%s5714_s25 + $0x138] sm:$0xff] }
 0x233   : > { %4456 = vmatpush1.bf16.msra.mxu0 %v4455_v42  ;;  %4482 = vmatprep.subr.bf16.mxu1 %v4481_v58  ;;  %v686_v9 = vld [vmem:[%s5714_s25 + $0x120] sm:$0xff]  ;;  %v4469_v11 = vpack.c.bf16 %v690_v7, %v687_v6  ;;  %v676_v13 = vld [vmem:[%s5714_s25 + $0xd0] sm:$0xff]  ;;  %v679_v14 = vld [vmem:[%s5714_s25 + $0xe8] sm:$0xff]  ;;  %7173 = vst [vmem:[#allocation26_spill] sm:$0xff] %v5786_v38  ;;  %v5789_v41 = vsub.s32 %v863_v37, %v5786_v38  ;;  %v5799_v53 = vsub.s32 0, %v5786_v38 }
 0x234   : > { %4458 = vmatprep.subr.bf16.mxu0 %v4457_v43  ;;  %v693_v15 = vld [vmem:[%s5714_s25 + $0x158] sm:$0xff]  ;;  %v696_v16 = vld [vmem:[%s5714_s25 + $0x170] sm:$0xff]  ;;  %v4471_v17 = vpack.c.bf16 %v689_v12, %v686_v9  ;;  %v4493_v19 = vpack.c.bf16 %v679_v14, %v676_v13  ;;  %v695_v21 = vld [vmem:[%s5714_s25 + $0x168] sm:$0xff] }
 0x235   : > { %v692_v18 = vld [vmem:[%s5714_s25 + $0x150] sm:$0xff]  ;;  %v4473_v20 = vpack.c.bf16 %v696_v16, %v693_v15  ;;  %v682_v22 = vld [vmem:[%s5714_s25 + $0x100] sm:$0xff]  ;;  %v685_v23 = vld [vmem:[%s5714_s25 + $0x118] sm:$0xff]  ;;  %7174 = vst [vmem:[#allocation27_spill] sm:$0xff] %v5799_v53 }
 0x236   : > { %4484 = vmatpush3.bf16.msra.mxu1 %v4481_v58  ;;  %v4475_v24 = vpack.c.bf16 %v695_v21, %v692_v18  ;;  %v4497_v25 = vpack.c.bf16 %v685_v23, %v682_v22  ;;  %v688_v26 = vld [vmem:[%s5714_s25 + $0x130] sm:$0xff]  ;;  %v691_v27 = vld [vmem:[%s5714_s25 + $0x148] sm:$0xff]  ;;  %v694_v30 = vld [vmem:[%s5714_s25 + $0x160] sm:$0xff] }
 0x237   : > { %4460 = vmatpush1.bf16.msra.mxu0 %v4459_v51  ;;  %4486 = vmatprep.subr.bf16.mxu1 %v4485_v1  ;;  %v4501_v28 = vpack.c.bf16 %v691_v27, %v688_v26  ;;  %v697_v31 = vld [vmem:[%s5714_s25 + $0x178] sm:$0xff]  ;;  %v852_v39 = vld [vmem:[#allocation8] sm:$0xff]  ;;  %v853_v47 = vld [vmem:[#allocation8 + $0x8] sm:$0xff] }
 0x238   : > { %4462 = vmatprep.subr.bf16.mxu0 %v4461_v56  ;;  %v649_v32 = vld [vmem:[#allocation2 + $0x8] sm:$0xff]  ;;  %v4505_v33 = vpack.c.bf16 %v697_v31, %v694_v30  ;;  %v860_v40 = vcombine.high %v852_v39, %v852_v39  ;;  %v867_v43 = vrot.slane %v852_v39, %v5789_v41  ;;  %v916_v49 = vrot.slane %v853_v47, %v5789_v41  ;;  %v854_v23 = vld [vmem:[#allocation8 + $0x10] sm:$0xff] }
 0x239   : > { %v909_v52 = vcombine.high %v853_v47, %v853_v47  ;;  %v958_v36 = vcombine.high %v854_v23, %v854_v23 }
 0x23a   : > { %4488 = vmatpush3.bf16.msra.mxu1 %v4485_v1  ;;  %v874_v42 = vrot.slane %v860_v40, %v5789_v41  ;;  %v875_v45 = vcombine.high %v867_v43, %v867_v43  ;;  %v883_v50 = vrot.slane %v867_v43, %v5789_v41  ;;  %v924_v56 = vcombine.high %v916_v49, %v916_v49 }
 0x23b   : > { %4464 = vmatpush1.bf16.msra.mxu0 %v4463_v63  ;;  %4490 = vmatprep.subr.bf16.mxu1 %v4489_v10  ;;  %v932_v58 = vrot.slane %v916_v49, %v5789_v41  ;;  %v923_v60 = vrot.slane %v909_v52, %v5789_v41 }
 0x23c   : > { %4466 = vmatprep.subr.bf16.mxu0 %v4465_v2  ;;  %v876_v44 = vcombine.high %v874_v42, %v874_v42  ;;  %v890_v46 = vrot.slane %v874_v42, %v5789_v41  ;;  %v897_v51 = vrot.slane %v875_v45, %v5789_v41  ;;  %v905_v57 = vcombine.high %v883_v50, %v883_v50 }
 0x23d   : > { %v5804_v61 = vrot.slane %v883_v50, %v5799_v53  ;;  %v946_v2 = vrot.slane %v924_v56, %v5789_v41  ;;  %v5822_v6 = vrot.slane %v932_v58, %v5799_v53  ;;  %v954_v7 = vcombine.high %v932_v58, %v932_v58 }
 0x23e   : > { %4492 = vmatpush3.bf16.msra.mxu1 %v4489_v10  ;;  %v906_v54 = vcombine.high %v890_v46, %v890_v46  ;;  %v907_v59 = vcombine.high %v897_v51, %v897_v51  ;;  %v5810_v63 = vrot.slane %v897_v51, %v5799_v53  ;;  %v5819_v5 = vrot.slane %v905_v57, %v5799_v53 }
 0x23f   : > { %4468 = vmatpush1.bf16.msra.mxu0 %v4467_v8  ;;  %4494 = vmatprep.subr.bf16.mxu1 %v4493_v19  ;;  %7175 = vst [vmem:[#allocation28_spill] sm:$0xff] %v5804_v61  ;;  %7180 = vst [vmem:[#allocation33_spill] sm:$0xff] %v5822_v6  ;;  %v939_v9 = vrot.slane %v923_v60, %v5789_v41  ;;  %v925_v10 = vcombine.high %v923_v60, %v923_v60 }
 0x240   : > { %4470 = vmatprep.subr.bf16.mxu0 %v4469_v11  ;;  %v5807_v62 = vrot.slane %v906_v54, %v5799_v53  ;;  %7177 = vst [vmem:[#allocation30_spill] sm:$0xff] %v5810_v63  ;;  %7179 = vst [vmem:[#allocation32_spill] sm:$0xff] %v5819_v5  ;;  %v5825_v8 = vrot.slane %v907_v59, %v5799_v53  ;;  %v5837_v15 = vrot.slane %v946_v2, %v5799_v53 }
 0x241   : > { %v5840_v16 = vrot.slane %v890_v46, %v5799_v53  ;;  %v5849_v21 = vrot.slane %v954_v7, %v5799_v53  ;;  %v955_v34 = vcombine.high %v939_v9, %v939_v9  ;;  %v972_v51 = vrot.slane %v958_v36, %v5789_v41 }
 0x242   : > { %4496 = vmatpush3.bf16.msra.mxu1 %v4493_v19  ;;  %7176 = vst [vmem:[#allocation29_spill] sm:$0xff] %v5807_v62  ;;  %7181 = vst [vmem:[#allocation34_spill] sm:$0xff] %v5825_v8 }
 0x243   : > { %4472 = vmatpush1.bf16.msra.mxu0 %v4471_v17  ;;  %4498 = vmatprep.subr.bf16.mxu1 %v4497_v25  ;;  %7182 = vst [vmem:[#allocation35_spill] sm:$0xff] %v5837_v15  ;;  %7183 = vst [vmem:[#allocation36_spill] sm:$0xff] %v5840_v16  ;;  %v956_v17 = vcombine.high %v946_v2, %v946_v2  ;;  %v5882_v46 = vrot.slane %v955_v34, %v5799_v53 }
 0x244   : > { %4474 = vmatprep.subr.bf16.mxu0 %v4473_v20  ;;  %7184 = vst [vmem:[#allocation37_spill] sm:$0xff] %v5849_v21  ;;  %v974_v59 = vcombine.high %v972_v51, %v972_v51  ;;  %v988_v2 = vrot.slane %v972_v51, %v5789_v41 }
 0x245   : > { %v5861_v30 = vrot.slane %v956_v17, %v5799_v53  ;;  %7190 = vst [vmem:[#allocation43_spill] sm:$0xff] %v5882_v46 }
 0x246   : > { %4500 = vmatpush3.bf16.msra.mxu1 %v4497_v25  ;;  %v965_v25 = vrot.slane %v854_v23, %v5789_v41 }
 0x247   : > { %4476 = vmatpush1.bf16.msra.mxu0 %v4475_v24  ;;  %4502 = vmatprep.subr.bf16.mxu1 %v4501_v28  ;;  %v953_v24 = vrot.slane %v925_v10, %v5789_v41  ;;  %7186 = vst [vmem:[#allocation39_spill] sm:$0xff] %v5861_v30  ;;  %v1002_v10 = vrot.slane %v974_v59, %v5789_v41 }
 0x248   : > { %v973_v43 = vcombine.high %v965_v25, %v965_v25  ;;  %v981_v47 = vrot.slane %v965_v25, %v5789_v41 }
 0x249   : > { %v5871_v35 = vrot.slane %v953_v24, %v5799_v53  ;;  %v957_v42 = vcombine.high %v953_v24, %v953_v24 }
 0x24a   : > { %763 = vmatmul.mubr.f32.vlgmr.msra.gmra.mrb[0].mxu0 %v5751_v48  ;;  %4504 = vmatpush3.bf16.msra.mxu1 %v4501_v28  ;;  %v904_v48 = vrot.slane %v876_v44, %v5789_v41  ;;  %v995_v50 = vrot.slane %v973_v43, %v5789_v41  ;;  %v5895_v54 = vrot.slane %v981_v47, %v5799_v53 }
 0x24b   : > { %768 = vmatprep.mubr.f32.mxu0 %v7026_v29  ;;  %4506 = vmatprep.subr.bf16.mxu1 %v4505_v33  ;;  %7188 = vst [vmem:[#allocation41_spill] sm:$0xff] %v5871_v35  ;;  %v5888_v49 = vrot.slane %v957_v42, %v5799_v53 }
 0x24c   : > { %v908_v55 = vcombine.high %v904_v48, %v904_v48  ;;  %v5858_v28 = vrot.slane %v904_v48, %v5799_v53  ;;  %7192 = vst [vmem:[#allocation45_spill] sm:$0xff] %v5895_v54  ;;  %v5901_v57 = vrot.slane %v995_v50, %v5799_v53  ;;  %v1005_v58 = vcombine.high %v995_v50, %v995_v50 }
 0x24d   : > { %7191 = vst [vmem:[#allocation44_spill] sm:$0xff] %v5888_v49 }
 0x24e   : > { %769 = vmatmul.mubr.f32.gmra.mrb[2].mxu0 %v649_v32  ;;  %4508 = vmatpush3.bf16.msra.mxu1 %v4505_v33  ;;  %v5813_v1 = vrot.slane %v908_v55, %v5799_v53  ;;  %7185 = vst [vmem:[#allocation38_spill] sm:$0xff] %v5858_v28  ;;  %v5868_v33 = vrot.slane %v939_v9, %v5799_v53  ;;  %7193 = vst [vmem:[#allocation46_spill] sm:$0xff] %v5901_v57 }
 0x24f   : > { %v1003_v55 = vcombine.high %v981_v47, %v981_v47  ;;  %v5912_v9 = vrot.slane %v1005_v58, %v5799_v53 }
 0x250   : > { %7178 = vst [vmem:[#allocation31_spill] sm:$0xff] %v5813_v1  ;;  %7187 = vst [vmem:[#allocation40_spill] sm:$0xff] %v5868_v33 }
 0x251   : > { %4192 = vmatmul.mubr.f32.vlgmr.msra.gmra.mrb[0].mxu1 %v649_v32  ;;  %7195 = vst [vmem:[#allocation48_spill] sm:$0xff] %v5912_v9 }
 0x31d   : > { %v764_v0 = vpop.f32.mrb[0].mxu0 }
 0x31e   : > { %v5816_v3 = vmul.f32 0.088388346, %v764_v0  ;;  %v766_v4 = vpop.f32.mrb[1].mxu0  ;;  %v5906_v0 = vrot.slane %v1003_v55, %v5799_v53 }
 0x31f   : > { %4194 = vmatprep.subr.mxu0 %v766_v4  ;;  %4605 = vmatprep.subr.mxu1 %v766_v4 }
 0x320   : > { %4195 = vmatpush3.xpose.msra.mxu0 %v766_v4  ;;  %4606 = vmatpush3.xpose.msra.mxu1 %v766_v4  ;;  %v1216_v11 = vmul.f32 %v5804_v61, %v5816_v3  ;;  %v1222_v12 = vmul.f32 %v5807_v62, %v5816_v3  ;;  %v1217_v13 = vmul.f32 %v5810_v63, %v5816_v3  ;;  %v855_v4 = vld [vmem:[#allocation8 + $0x18] sm:$0xff] }
 0x321   : > { %v1223_v14 = vmul.f32 %v5813_v1, %v5816_v3  ;;  %v5842_v18 = vpop.f32.mrb[2].mxu0  ;;  %v1218_v19 = vmul.f32 %v5819_v5, %v5816_v3  ;;  %v1224_v20 = vmul.f32 %v5822_v6, %v5816_v3  ;;  %v1219_v26 = vmul.f32 %v5825_v8, %v5816_v3  ;;  %7194 = vst [vmem:[#allocation47_spill] sm:$0xff] %v5906_v0 }
 0x322   : > { %4196 = vmatprep.mubr.f32.mxu0 %v1216_v11  ;;  %4205 = vmatprep.mubr.f32.mxu1 %v1222_v12  ;;  %v772_v22 = vpop.f32.mrb[3].mxu0  ;;  %v1225_v27 = vmul.f32 %v5837_v15, %v5816_v3  ;;  %v1220_v31 = vmul.f32 %v5840_v16, %v5816_v3  ;;  %v1226_v32 = vmul.f32 %v5849_v21, %v5816_v3 }
 0x323   : > { %4197 = vmatmul.mubr.f32.vlgmr.msra.gmra.mrb[4].mxu0 %v1217_v13  ;;  %4206 = vmatmul.mubr.f32.vlgmr.msra.gmra.mrb[2].mxu1 %v1223_v14  ;;  %v1221_v39 = vmul.f32 %v5858_v28, %v5816_v3  ;;  %v1227_v40 = vmul.f32 %v5861_v30, %v5816_v3  ;;  %v1228_v45 = vmul.f32 %v5868_v33, %v5816_v3 }
 0x324   : > { %4199 = vmatprep.mubr.f32.mxu0 %v1218_v19  ;;  %4208 = vmatprep.mubr.f32.mxu1 %v1224_v20  ;;  %v5873_v37 = vpop.f32.mrb[0].mxu1  ;;  %v1229_v48 = vmul.f32 %v5871_v35, %v5816_v3  ;;  %v1230_v52 = vmul.f32 %v5882_v46, %v5816_v3  ;;  %v1231_v56 = vmul.f32 %v5888_v49, %v5816_v3 }
 0x325   : > { %4294 = vmatprep.subr.mxu1 %v772_v22  ;;  %7189 = vst [vmem:[#allocation42_spill] sm:$0xff] %v5873_v37  ;;  %v841_v44 = vpop.f32.mrb[1].mxu1  ;;  %v1232_v60 = vmul.f32 %v5895_v54, %v5816_v3  ;;  %v1233_v7 = vmul.f32 %v5901_v57, %v5816_v3  ;;  %v1014_v11 = vrot.slane %v855_v4, %v5789_v41 }
 0x326   : > { %4295 = vmatpush3.xpose.msra.mxu1 %v772_v22  ;;  %4244 = vmatprep.subr.mxu0 %v841_v44  ;;  %v1234_v12 = vmul.f32 %v5906_v0, %v5816_v3  ;;  %v5919_v13 = vrot.slane %v988_v2, %v5799_v53  ;;  %v1004_v14 = vcombine.high %v988_v2, %v988_v2 }
 0x327   : > { %4200 = vmatmul.mubr.f32.gmra.mrb[6].mxu0 %v1219_v26  ;;  %4209 = vmatmul.mubr.f32.gmra.mrb[4].mxu1 %v1225_v27  ;;  %v1007_v17 = vcombine.high %v855_v4, %v855_v4  ;;  %v1235_v19 = vmul.f32 %v5912_v9, %v5816_v3  ;;  %v5924_v20 = vrot.slane %v1002_v10, %v5799_v53 }
 0x328   : > { %4202 = vmatprep.mubr.f32.mxu0 %v1220_v31  ;;  %4211 = vmatprep.mubr.f32.mxu1 %v1226_v32  ;;  %7196 = vst [vmem:[#allocation49_spill] sm:$0xff] %v5919_v13  ;;  %v1006_v22 = vcombine.high %v1002_v10, %v1002_v10  ;;  %v1022_v23 = vcombine.high %v1014_v11, %v1014_v11  ;;  %v5977_v10 = vmul.f32 0.088388346, %v5842_v18 }
 0x329   : > { %4245 = vmatpush3.msra.mxu0 %v841_v44  ;;  %7197 = vst [vmem:[#allocation50_spill] sm:$0xff] %v5924_v20  ;;  %v1236_v24 = vmul.f32 %v5919_v13, %v5816_v3  ;;  %v5929_v25 = vrot.slane %v1004_v14, %v5799_v53  ;;  %v1030_v26 = vrot.slane %v1014_v11, %v5789_v41 }
 0x32a   : > { %4344 = vmatprep.subr.mxu0 %v5873_v37  ;;  %v1237_v27 = vmul.f32 %v5924_v20, %v5816_v3  ;;  %v5935_v31 = vrot.slane %v1006_v22, %v5799_v53  ;;  %v1044_v32 = vrot.slane %v1022_v23, %v5789_v41  ;;  %v1021_v34 = vrot.slane %v1007_v17, %v5789_v41 }
 0x32b   : > { %4203 = vmatmul.mubr.f32.gmra.mrb[8].mxu0 %v1221_v39  ;;  %4212 = vmatmul.mubr.f32.gmra.mrb[6].mxu1 %v1227_v40  ;;  %7198 = vst [vmem:[#allocation51_spill] sm:$0xff] %v5929_v25  ;;  %v1238_v36 = vmul.f32 %v5929_v25, %v5816_v3  ;;  %v5942_v39 = vrot.slane %v1030_v26, %v5799_v53 }
 0x32c   : > { %4214 = vmatprep.mubr.f32.mxu1 %v1228_v45  ;;  %7199 = vst [vmem:[#allocation52_spill] sm:$0xff] %v5935_v31  ;;  %v1052_v40 = vcombine.high %v1030_v26, %v1030_v26  ;;  %v1239_v42 = vmul.f32 %v5935_v31, %v5816_v3  ;;  %v5947_v43 = vrot.slane %v1044_v32, %v5799_v53 }
 0x32d   : > { %7200 = vst [vmem:[#allocation53_spill] sm:$0xff] %v5942_v39  ;;  %v1054_v44 = vcombine.high %v1044_v32, %v1044_v32  ;;  %v1023_v45 = vcombine.high %v1021_v34, %v1021_v34  ;;  %v1240_v47 = vmul.f32 %v5942_v39, %v5816_v3  ;;  %v1037_v50 = vrot.slane %v1021_v34, %v5789_v41 }
 0x32e   : > { %7201 = vst [vmem:[#allocation54_spill] sm:$0xff] %v5947_v43  ;;  %v1241_v51 = vmul.f32 %v5947_v43, %v5816_v3  ;;  %v2210_v17 = vmul.f32 %v5804_v61, %v5977_v10  ;;  %v2211_v18 = vmul.f32 %v5810_v63, %v5977_v10  ;;  %v2212_v22 = vmul.f32 %v5819_v5, %v5977_v10 }
 0x32f   : > { %4215 = vmatmul.mubr.f32.gmra.mrb[8].mxu1 %v1229_v48  ;;  %v5952_v48 = vrot.slane %v1052_v40, %v5799_v53  ;;  %v1051_v55 = vrot.slane %v1023_v45, %v5789_v41  ;;  %v5964_v58 = vrot.slane %v1037_v50, %v5799_v53  ;;  %v1053_v59 = vcombine.high %v1037_v50, %v1037_v50 }
 0x330   : > { %4217 = vmatprep.mubr.f32.mxu1 %v1230_v52  ;;  %v5958_v52 = vrot.slane %v1054_v44, %v5799_v53  ;;  %v2213_v23 = vmul.f32 %v5825_v8, %v5977_v10  ;;  %v2216_v26 = vmul.f32 %v5807_v62, %v5977_v10  ;;  %v2218_v32 = vmul.f32 %v5822_v6, %v5977_v10 }
 0x331   : > { %7202 = vst [vmem:[#allocation55_spill] sm:$0xff] %v5952_v48  ;;  %7204 = vst [vmem:[#allocation57_spill] sm:$0xff] %v5964_v58  ;;  %v5969_v2 = vrot.slane %v1051_v55, %v5799_v53  ;;  %v1055_v4 = vcombine.high %v1051_v55, %v1051_v55  ;;  %v5974_v41 = vrot.slane %v1053_v59, %v5799_v53 }
 0x332   : > { %7203 = vst [vmem:[#allocation56_spill] sm:$0xff] %v5958_v52  ;;  %v2219_v34 = vmul.f32 %v5837_v15, %v5977_v10  ;;  %v2221_v40 = vmul.f32 %v5861_v30, %v5977_v10  ;;  %v2223_v44 = vmul.f32 %v5871_v35, %v5977_v10  ;;  %v2224_v45 = vmul.f32 %v5882_v46, %v5977_v10 }
 0x333   : > { %4218 = vmatmul.mubr.f32.gmra.mrb[10].mxu1 %v1231_v56  ;;  %v1242_v56 = vmul.f32 %v5952_v48, %v5816_v3  ;;  %7205 = vst [vmem:[#allocation58_spill] sm:$0xff] %v5969_v2  ;;  %7206 = vst [vmem:[#allocation59_spill] sm:$0xff] %v5974_v41  ;;  %v1245_v11 = vmul.f32 %v5969_v2, %v5816_v3  ;;  %v1246_v14 = vmul.f32 %v5974_v41, %v5816_v3 }
 0x334   : > { %4220 = vmatprep.mubr.f32.mxu1 %v1232_v60  ;;  %v1243_v60 = vmul.f32 %v5958_v52, %v5816_v3  ;;  %v2226_v50 = vmul.f32 %v5895_v54, %v5977_v10  ;;  %v2228_v55 = vmul.f32 %v5906_v0, %v5977_v10  ;;  %v2230_v59 = vmul.f32 %v5919_v13, %v5977_v10 }
 0x337   : > { %4221 = vmatmul.mubr.f32.gmra.mrb[12].mxu1 %v1233_v7  ;;  %v1244_v7 = vmul.f32 %v5964_v58, %v5816_v3 }
 0x338   : > { %4223 = vmatprep.mubr.f32.mxu1 %v1234_v12  ;;  %v5982_v12 = vrot.slane %v1055_v4, %v5799_v53  ;;  %v2232_v4 = vmul.f32 %v5929_v25, %v5977_v10 }
 0x33a   : > { %7207 = vst [vmem:[#allocation60_spill] sm:$0xff] %v5982_v12 }
 0x33b   : > { %4224 = vmatmul.mubr.f32.gmra.mrb[14].mxu1 %v1235_v19  ;;  %v1247_v19 = vmul.f32 %v5982_v12, %v5816_v3  ;;  %v2215_v3 = vmul.f32 %v5858_v28, %v5977_v10 }
 0x33c   : > { %4226 = vmatprep.mubr.f32.mxu1 %v1236_v24  ;;  %v2214_v24 = vmul.f32 %v5840_v16, %v5977_v10 }
 0x33f   : > { %4227 = vmatmul.mubr.f32.gmra.mrb[16].mxu1 %v1237_v27  ;;  %v2217_v27 = vmul.f32 %v5813_v1, %v5977_v10 }
 0x340   : > { %4229 = vmatprep.mubr.f32.mxu1 %v1238_v36  ;;  %v2220_v36 = vmul.f32 %v5849_v21, %v5977_v10 }
 0x343   : > { %4230 = vmatmul.mubr.f32.gmra.mrb[18].mxu1 %v1239_v42  ;;  %v2222_v42 = vmul.f32 %v5868_v33, %v5977_v10 }
 0x344   : > { %4232 = vmatprep.mubr.f32.mxu1 %v1240_v47  ;;  %v2225_v47 = vmul.f32 %v5888_v49, %v5977_v10 }
 0x347   : > { %4233 = vmatmul.mubr.f32.gmra.mrb[20].mxu1 %v1241_v51  ;;  %v2227_v51 = vmul.f32 %v5901_v57, %v5977_v10 }
 0x348   : > { %4235 = vmatprep.mubr.f32.mxu1 %v1242_v56  ;;  %v2229_v56 = vmul.f32 %v5912_v9, %v5977_v10 }
 0x34b   : > { %4236 = vmatmul.mubr.f32.gmra.mrb[22].mxu1 %v1243_v60  ;;  %v2231_v60 = vmul.f32 %v5924_v20, %v5977_v10 }
 0x34c   : > { %4238 = vmatprep.mubr.f32.mxu1 %v1244_v7  ;;  %v2233_v7 = vmul.f32 %v5935_v31, %v5977_v10 }
 0x34f   : > { %4239 = vmatmul.mubr.f32.gmra.mrb[24].mxu1 %v1245_v11  ;;  %v2234_v11 = vmul.f32 %v5942_v39, %v5977_v10 }
 0x350   : > { %4241 = vmatprep.mubr.f32.mxu1 %v1246_v14  ;;  %v2235_v14 = vmul.f32 %v5947_v43, %v5977_v10 }
 0x353   : > { %4242 = vmatmul.mubr.f32.gmra.mrb[26].mxu1 %v1247_v19  ;;  %v2237_v19 = vmul.f32 %v5958_v52, %v5977_v10 }
 0x354   : > { %4296 = vmatprep.mubr.f32.mxu1 %v2210_v17  ;;  %v2236_v17 = vmul.f32 %v5952_v48, %v5977_v10 }
 0x357   : > { %4297 = vmatmul.mubr.f32.vlgmr.msra.gmra.mrb[28].mxu1 %v2211_v18  ;;  %v2238_v18 = vmul.f32 %v5964_v58, %v5977_v10 }
 0x358   : > { %4299 = vmatprep.mubr.f32.mxu1 %v2212_v22  ;;  %v2239_v22 = vmul.f32 %v5969_v2, %v5977_v10 }
 0x35b   : > { %4300 = vmatmul.mubr.f32.gmra.mrb[30].mxu1 %v2213_v23  ;;  %v2240_v23 = vmul.f32 %v5974_v41, %v5977_v10 }
 0x35c   : > { %4302 = vmatprep.mubr.f32.mxu1 %v2214_v24  ;;  %v2241_v24 = vmul.f32 %v5982_v12, %v5977_v10 }
 0x35f   : > { %4303 = vmatmul.mubr.f32.gmra.mrb[32].mxu1 %v2215_v3 }
 0x360   : > { %4305 = vmatprep.mubr.f32.mxu1 %v2216_v26 }
 0x363   : > { %4306 = vmatmul.mubr.f32.gmra.mrb[34].mxu1 %v2217_v27 }
 0x364   : > { %4308 = vmatprep.mubr.f32.mxu1 %v2218_v32 }
 0x367   : > { %4309 = vmatmul.mubr.f32.gmra.mrb[36].mxu1 %v2219_v34 }
 0x368   : > { %4311 = vmatprep.mubr.f32.mxu1 %v2220_v36 }
 0x36b   : > { %4312 = vmatmul.mubr.f32.gmra.mrb[38].mxu1 %v2221_v40 }
 0x36c   : > { %4314 = vmatprep.mubr.f32.mxu1 %v2222_v42 }
 0x36f   : > { %4315 = vmatmul.mubr.f32.gmra.mrb[40].mxu1 %v2223_v44 }
 0x370   : > { %4317 = vmatprep.mubr.f32.mxu1 %v2224_v45 }
 0x373   : > { %4318 = vmatmul.mubr.f32.gmra.mrb[42].mxu1 %v2225_v47 }
 0x374   : > { %4320 = vmatprep.mubr.f32.mxu1 %v2226_v50 }
 0x377   : > { %4321 = vmatmul.mubr.f32.gmra.mrb[44].mxu1 %v2227_v51 }
 0x378   : > { %4323 = vmatprep.mubr.f32.mxu1 %v2228_v55 }
 0x37b   : > { %4324 = vmatmul.mubr.f32.gmra.mrb[46].mxu1 %v2229_v56 }
 0x37c   : > { %4326 = vmatprep.mubr.f32.mxu1 %v2230_v59 }
 0x37f   : > { %4327 = vmatmul.mubr.f32.gmra.mrb[48].mxu1 %v2231_v60 }
 0x380   : > { %4329 = vmatprep.mubr.f32.mxu1 %v2232_v4 }
 0x383   : > { %4330 = vmatmul.mubr.f32.gmra.mrb[50].mxu1 %v2233_v7 }
 0x384   : > { %4332 = vmatprep.mubr.f32.mxu1 %v2234_v11 }
 0x387   : > { %4333 = vmatmul.mubr.f32.gmra.mrb[52].mxu1 %v2235_v14 }
 0x388   : > { %4335 = vmatprep.mubr.f32.mxu1 %v2236_v17 }
 0x38b   : > { %4336 = vmatmul.mubr.f32.gmra.mrb[54].mxu1 %v2237_v19 }
 0x38c   : > { %4338 = vmatprep.mubr.f32.mxu1 %v2238_v18 }
 0x38f   : > { %4339 = vmatmul.mubr.f32.gmra.mrb[56].mxu1 %v2239_v22 }
 0x390   : > { %4341 = vmatprep.mubr.f32.mxu1 %v2240_v23 }
 0x393   : > { %4342 = vmatmul.mubr.f32.gmra.mrb[58].mxu1 %v2241_v24 }
 0x3f6   : > { %v6052_v3 = vpop.f32.mrb[4].mxu0  ;;  %v6054_v26 = vpop.f32.mrb[2].mxu1 }
 0x3f7   : > { %v6056_v27 = vpop.f32.mrb[5].mxu0  ;;  %v6058_v32 = vpop.f32.mrb[3].mxu1  ;;  %v1495_v34 = vsel %vm1473_vm2, %v6054_v26, -inf  ;;  %v1477_v36 = vsel %vm1473_vm2, %v6052_v3, -inf }
 0x3f8   : > { %1496 = vmax.xlane.f32.xlu1 %v1495_v34  ;;  %1478 = vmax.xlane.f32.xlu0 %v1477_v36  ;;  %v1474_v45 = vsel %vm1473_vm2, %v6056_v27, -inf  ;;  %v1492_v59 = vsel %vm1473_vm2, %v6058_v32, -inf }
 0x3fa   : > { %v6064_v40 = vpop.f32.mrb[6].mxu0  ;;  %v6066_v10 = vpop.f32.mrb[4].mxu1 }
 0x3fb   : > { %v6068_v42 = vpop.f32.mrb[7].mxu0  ;;  %v6070_v44 = vpop.f32.mrb[5].mxu1  ;;  %v1483_v47 = vsel %vm1473_vm2, %v6064_v40, -inf  ;;  %v1501_v60 = vsel %vm1473_vm2, %v6066_v10, -inf }
 0x3fc   : > { %1475 = vmax.xlane.f32.xlu0 %v1474_v45  ;;  %1484 = vmax.xlane.f32.xlu1 %v1483_v47  ;;  %v1498_v11 = vsel %vm1473_vm2, %v6070_v44, -inf  ;;  %v1480_v14 = vsel %vm1473_vm2, %v6068_v42, -inf }
 0x3fe   : > { %v6076_v50 = vpop.f32.mrb[8].mxu0  ;;  %v6078_v51 = vpop.f32.mrb[6].mxu1 }
 0x3ff   : > { %v6080_v55 = vpop.f32.mrb[9].mxu0  ;;  %v6082_v56 = vpop.f32.mrb[7].mxu1  ;;  %v1489_v18 = vsel %vm1473_vm2, %v6076_v50, -inf  ;;  %v1507_v34 = vsel %vm1473_vm2, %v6078_v51, -inf }
 0x400   : > { %1493 = vmax.xlane.f32.xlu0 %v1492_v59  ;;  %1502 = vmax.xlane.f32.xlu1 %v1501_v60  ;;  %v1486_v22 = vsel %vm1473_vm2, %v6080_v55, -inf  ;;  %v1504_v36 = vsel %vm1473_vm2, %v6082_v56, -inf }
 0x402   : > { %v6088_v4 = vpop.f32.mrb[8].mxu1 }
 0x403   : > { %v6090_v7 = vpop.f32.mrb[9].mxu1  ;;  %v1513_v59 = vsel %vm1473_vm2, %v6088_v4, -inf }
 0x404   : > { %1499 = vmax.xlane.f32.xlu0 %v1498_v11  ;;  %1481 = vmax.xlane.f32.xlu1 %v1480_v14  ;;  %v1510_v60 = vsel %vm1473_vm2, %v6090_v7, -inf }
 0x406   : > { %v6096_v17 = vpop.f32.mrb[10].mxu1 }
 0x407   : > { %v6098_v19 = vpop.f32.mrb[11].mxu1 }
 0x408   : > { %1490 = vmax.xlane.f32.xlu1 %v1489_v18  ;;  %1487 = vmax.xlane.f32.xlu0 %v1486_v22  ;;  %v1519_v18 = vsel %vm1473_vm2, %v6096_v17, -inf  ;;  %v1516_v22 = vsel %vm1473_vm2, %v6098_v19, -inf }
 0x40a   : > { %v6104_v23 = vpop.f32.mrb[12].mxu1 }
 0x40b   : > { %v6106_v24 = vpop.f32.mrb[13].mxu1 }
 0x40c   : > { %1508 = vmax.xlane.f32.xlu1 %v1507_v34  ;;  %1505 = vmax.xlane.f32.xlu0 %v1504_v36 }
 0x40e   : > { %v6112_v45 = vpop.f32.mrb[14].mxu1 }
 0x40f   : > { %v6114_v47 = vpop.f32.mrb[15].mxu1 }
 0x410   : > { %1514 = vmax.xlane.f32.xlu1 %v1513_v59  ;;  %1511 = vmax.xlane.f32.xlu0 %v1510_v60  ;;  %v1525_v59 = vsel %vm1473_vm2, %v6104_v23, -inf  ;;  %v1522_v60 = vsel %vm1473_vm2, %v6106_v24, -inf }
 0x412   : > { %v6120_v11 = vpop.f32.mrb[16].mxu1 }
 0x413   : > { %v6122_v14 = vpop.f32.mrb[17].mxu1 }
 0x414   : > { %1520 = vmax.xlane.f32.xlu1 %v1519_v18  ;;  %1517 = vmax.xlane.f32.xlu0 %v1516_v22  ;;  %v1531_v18 = vsel %vm1473_vm2, %v6112_v45, -inf  ;;  %v1528_v22 = vsel %vm1473_vm2, %v6114_v47, -inf }
 0x416   : > { %v6128_v34 = vpop.f32.mrb[18].mxu1 }
 0x417   : > { %v6130_v36 = vpop.f32.mrb[19].mxu1 }
 0x418   : > { %1526 = vmax.xlane.f32.xlu1 %v1525_v59  ;;  %1523 = vmax.xlane.f32.xlu0 %v1522_v60  ;;  %v1537_v59 = vsel %vm1473_vm2, %v6120_v11, -inf  ;;  %v1534_v60 = vsel %vm1473_vm2, %v6122_v14, -inf }
 0x41a   : > { %v6136_v29 = vpop.f32.mrb[20].mxu1 }
 0x41b   : > { %v6138_v38 = vpop.f32.mrb[21].mxu1 }
 0x41c   : > { %1532 = vmax.xlane.f32.xlu1 %v1531_v18  ;;  %1529 = vmax.xlane.f32.xlu0 %v1528_v22  ;;  %v1543_v18 = vsel %vm1473_vm2, %v6128_v34, -inf  ;;  %v1540_v22 = vsel %vm1473_vm2, %v6130_v36, -inf }
 0x41e   : > { %v6144_v53 = vpop.f32.mrb[22].mxu1 }
 0x41f   : > { %v6146_v12 = vpop.f32.mrb[23].mxu1 }
 0x420   : > { %1538 = vmax.xlane.f32.xlu1 %v1537_v59  ;;  %1535 = vmax.xlane.f32.xlu0 %v1534_v60  ;;  %v1549_v59 = vsel %vm1473_vm2, %v6136_v29, -inf  ;;  %v1546_v60 = vsel %vm1473_vm2, %v6138_v38, -inf }
 0x422   : > { %v6152_v41 = vpop.f32.mrb[24].mxu1 }
 0x423   : > { %v6154_v2 = vpop.f32.mrb[25].mxu1 }
 0x424   : > { %1544 = vmax.xlane.f32.xlu1 %v1543_v18  ;;  %1541 = vmax.xlane.f32.xlu0 %v1540_v22  ;;  %v1555_v18 = vsel %vm1473_vm2, %v6144_v53, -inf  ;;  %v1552_v22 = vsel %vm1473_vm2, %v6146_v12, -inf }
 0x426   : > { %v6160_v58 = vpop.f32.mrb[26].mxu1 }
 0x427   : > { %v6162_v52 = vpop.f32.mrb[27].mxu1 }
 0x428   : > { %1550 = vmax.xlane.f32.xlu1 %v1549_v59  ;;  %1547 = vmax.xlane.f32.xlu0 %v1546_v60  ;;  %v1561_v59 = vsel %vm1473_vm2, %v6152_v41, -inf  ;;  %v1558_v60 = vsel %vm1473_vm2, %v6154_v2, -inf }
 0x42a   : > { %v6168_v48 = vpop.f32.mrb[28].mxu1 }
 0x42b   : > { %v6170_v43 = vpop.f32.mrb[29].mxu1  ;;  %v2470_v13 = vsel %vm1473_vm2, %v6168_v48, -inf }
 0x42c   : > { %1556 = vmax.xlane.f32.xlu1 %v1555_v18  ;;  %1553 = vmax.xlane.f32.xlu0 %v1552_v22  ;;  %v1567_v18 = vsel %vm1473_vm2, %v6160_v58, -inf  ;;  %v1564_v22 = vsel %vm1473_vm2, %v6162_v52, -inf  ;;  %v2467_v9 = vsel %vm1473_vm2, %v6170_v43, -inf }
 0x42e   : > { %v6176_v39 = vpop.f32.mrb[30].mxu1 }
 0x42f   : > { %v6178_v31 = vpop.f32.mrb[31].mxu1 }
 0x430   : > { %1562 = vmax.xlane.f32.xlu1 %v1561_v59  ;;  %1559 = vmax.xlane.f32.xlu0 %v1558_v60 }
 0x432   : > { %v6184_v25 = vpop.f32.mrb[32].mxu1 }
 0x433   : > { %v6186_v20 = vpop.f32.mrb[33].mxu1 }
 0x434   : > { %1568 = vmax.xlane.f32.xlu1 %v1567_v18  ;;  %1565 = vmax.xlane.f32.xlu0 %v1564_v22  ;;  %v2476_v18 = vsel %vm1473_vm2, %v6176_v39, -inf  ;;  %v2473_v22 = vsel %vm1473_vm2, %v6178_v31, -inf }
 0x436   : > { %v6196_v59 = vpop.f32.mrb[34].mxu1 }
 0x437   : > { %v6198_v60 = vpop.f32.mrb[35].mxu1 }
 0x438   : > { %2471 = vmax.xlane.f32.xlu1 %v2470_v13  ;;  %2468 = vmax.xlane.f32.xlu0 %v2467_v9  ;;  %v2482_v13 = vsel %vm1473_vm2, %v6184_v25, -inf  ;;  %v2479_v9 = vsel %vm1473_vm2, %v6186_v20, -inf }
 0x43a   : > { %v6200_v0 = vpop.f32.mrb[36].mxu1 }
 0x43b   : > { %v6202_v57 = vpop.f32.mrb[37].mxu1 }
 0x43c   : > { %7208 = vst [vmem:[#allocation61_spill] sm:$0xff] %v6202_v57  ;;  %2477 = vmax.xlane.f32.xlu1 %v2476_v18  ;;  %2474 = vmax.xlane.f32.xlu0 %v2473_v22  ;;  %v2488_v18 = vsel %vm1473_vm2, %v6196_v59, -inf  ;;  %v2485_v22 = vsel %vm1473_vm2, %v6198_v60, -inf }
 0x43e   : > { %v6208_v54 = vpop.f32.mrb[38].mxu1 }
 0x43f   : > { %v6210_v49 = vpop.f32.mrb[39].mxu1 }
 0x440   : > { %7209 = vst [vmem:[#allocation62_spill] sm:$0xff] %v6210_v49  ;;  %2483 = vmax.xlane.f32.xlu1 %v2482_v13  ;;  %2480 = vmax.xlane.f32.xlu0 %v2479_v9  ;;  %v2494_v13 = vsel %vm1473_vm2, %v6200_v0, -inf  ;;  %v2491_v9 = vsel %vm1473_vm2, %v6202_v57, -inf }
 0x442   : > { %v6216_v46 = vpop.f32.mrb[40].mxu1 }
 0x443   : > { %v6218_v35 = vpop.f32.mrb[41].mxu1 }
 0x444   : > { %7210 = vst [vmem:[#allocation63_spill] sm:$0xff] %v6218_v35  ;;  %2489 = vmax.xlane.f32.xlu1 %v2488_v18  ;;  %2486 = vmax.xlane.f32.xlu0 %v2485_v22  ;;  %v2500_v18 = vsel %vm1473_vm2, %v6208_v54, -inf  ;;  %v2497_v22 = vsel %vm1473_vm2, %v6210_v49, -inf  ;;  %v2503_v28 = vsel %vm1473_vm2, %v6218_v35, -inf }
 0x446   : > { %v6224_v33 = vpop.f32.mrb[42].mxu1 }
 0x447   : > { %v6226_v30 = vpop.f32.mrb[43].mxu1 }
 0x448   : > { %7211 = vst [vmem:[#allocation64_spill] sm:$0xff] %v6226_v30  ;;  %2495 = vmax.xlane.f32.xlu1 %v2494_v13  ;;  %2492 = vmax.xlane.f32.xlu0 %v2491_v9  ;;  %v2506_v13 = vsel %vm1473_vm2, %v6216_v46, -inf }
 0x44a   : > { %v6232_v21 = vpop.f32.mrb[44].mxu1 }
 0x44b   : > { %v6234_v15 = vpop.f32.mrb[45].mxu1 }
 0x44c   : > { %7212 = vst [vmem:[#allocation65_spill] sm:$0xff] %v6234_v15  ;;  %2501 = vmax.xlane.f32.xlu1 %v2500_v18  ;;  %2498 = vmax.xlane.f32.xlu0 %v2497_v22  ;;  %v2512_v22 = vsel %vm1473_vm2, %v6224_v33, -inf }
 0x44e   : > { %v6240_v6 = vpop.f32.mrb[46].mxu1 }
 0x44f   : > { %7213 = vst [vmem:[#allocation66_spill] sm:$0xff] %v6240_v6  ;;  %v6242_v1 = vpop.f32.mrb[47].mxu1 }
 0x450   : > { %7214 = vst [vmem:[#allocation67_spill] sm:$0xff] %v6242_v1  ;;  %2507 = vmax.xlane.f32.xlu1 %v2506_v13  ;;  %v2509_v13 = vsel %vm1473_vm2, %v6226_v30, -inf  ;;  %v2521_v57 = vsel %vm1473_vm2, %v6242_v1, -inf }
 0x452   : > { %v6246_v9 = vpop.f32.mrb[48].mxu1 }
 0x453   : > { %7215 = vst [vmem:[#allocation68_spill] sm:$0xff] %v6246_v9  ;;  %v6248_v62 = vpop.f32.mrb[49].mxu1 }
 0x454   : > { %7216 = vst [vmem:[#allocation69_spill] sm:$0xff] %v6248_v62  ;;  %2504 = vmax.xlane.f32.xlu1 %v2503_v28  ;;  %v2518_v28 = vsel %vm1473_vm2, %v6232_v21, -inf }
 0x456   : > { %v6252_v16 = vpop.f32.mrb[50].mxu1 }
 0x457   : > { %7217 = vst [vmem:[#allocation70_spill] sm:$0xff] %v6252_v16  ;;  %v6254_v18 = vpop.f32.mrb[51].mxu1 }
 0x458   : > { %7218 = vst [vmem:[#allocation71_spill] sm:$0xff] %v6254_v18  ;;  %2513 = vmax.xlane.f32.xlu1 %v2512_v22  ;;  %v2515_v22 = vsel %vm1473_vm2, %v6234_v15, -inf  ;;  %v2527_v15 = vsel %vm1473_vm2, %v6248_v62, -inf }
 0x45a   : > { %v6258_v8 = vpop.f32.mrb[52].mxu1 }
 0x45b   : > { %v6260_v5 = vpop.f32.mrb[53].mxu1 }
 0x45c   : > { %7219 = vst [vmem:[#allocation72_spill] sm:$0xff] %v6260_v5  ;;  %2510 = vmax.xlane.f32.xlu1 %v2509_v13  ;;  %v2524_v13 = vsel %vm1473_vm2, %v6240_v6, -inf  ;;  %v2533_v6 = vsel %vm1473_vm2, %v6254_v18, -inf }
 0x45e   : > { %v6264_v61 = vpop.f32.mrb[54].mxu1 }
 0x45f   : > { %v6266_v63 = vpop.f32.mrb[55].mxu1 }
 0x460   : > { %2519 = vmax.xlane.f32.xlu1 %v2518_v28  ;;  %v2530_v28 = vsel %vm1473_vm2, %v6246_v9, -inf }
 0x462   : > { %v6270_v37 = vpop.f32.mrb[56].mxu1 }
 0x463   : > { %v6272_v35 = vpop.f32.mrb[57].mxu1 }
 0x464   : > { %2516 = vmax.xlane.f32.xlu1 %v2515_v22  ;;  %v2536_v22 = vsel %vm1473_vm2, %v6252_v16, -inf }
 0x466   : > { %v6276_v49 = vpop.f32.mrb[58].mxu1 }
 0x467   : > { %v6278_v30 = vpop.f32.mrb[59].mxu1 }
 0x468   : > { %2525 = vmax.xlane.f32.xlu1 %v2524_v13  ;;  %v2542_v13 = vsel %vm1473_vm2, %v6258_v8, -inf }
 0x46c   : > { %2522 = vmax.xlane.f32.xlu1 %v2521_v57  ;;  %v2539_v57 = vsel %vm1473_vm2, %v6260_v5, -inf }
 0x470   : > { %2531 = vmax.xlane.f32.xlu1 %v2530_v28 }
 0x474   : > { %2528 = vmax.xlane.f32.xlu1 %v2527_v15 }
 0x478   : > { %2537 = vmax.xlane.f32.xlu1 %v2536_v22  ;;  %v2548_v22 = vsel %vm1473_vm2, %v6264_v61, -inf }
 0x47c   : > { %2534 = vmax.xlane.f32.xlu1 %v2533_v6 }
 0x480   : > { %2543 = vmax.xlane.f32.xlu1 %v2542_v13 }
 0x484   : > { %2540 = vmax.xlane.f32.xlu1 %v2539_v57  ;;  %v2545_v57 = vsel %vm1473_vm2, %v6266_v63, -inf }
 0x485   : > { %v1497_v28 = vpop.xlane.xlu1 %1496  ;;  %v1479_v1 = vpop.xlane.xlu0 %1478 }
 0x486   : > { %v1577_v15 = vsub.f32 %v6054_v26, %v1497_v28  ;;  %v1571_v62 = vsub.f32 %v6052_v3, %v1479_v1 }
 0x488   : > { %v1604_v16 = vmul.f32 1.442695, %v1571_v62  ;;  %2549 = vmax.xlane.f32.xlu1 %v2548_v22  ;;  %v1616_v6 = vmul.f32 1.442695, %v1577_v15  ;;  %v2554_v62 = vsel %vm1473_vm2, %v6270_v37, -inf }
 0x489   : > { %v1476_v18 = vpop.xlane.xlu0 %1475  ;;  %v1485_v9 = vpop.xlane.xlu1 %1484 }
 0x48a   : > { %v1570_v13 = vsub.f32 %v6056_v27, %v1476_v18  ;;  %4722 = vpow2.f32 %v1604_v16  ;;  %v1573_v3 = vsub.f32 %v6064_v40, %v1485_v9  ;;  %v2551_v18 = vsel %vm1473_vm2, %v6272_v35, -inf }
 0x48b   : > { %4724 = vpow2.f32 %v1616_v6  ;;  %v2557_v40 = vsel %vm1473_vm2, %v6278_v30, -inf }
 0x48c   : > { %2546 = vmax.xlane.f32.xlu1 %v2545_v57  ;;  %v1602_v5 = vmul.f32 1.442695, %v1570_v13  ;;  %v1608_v6 = vmul.f32 1.442695, %v1573_v3 }
 0x48d   : > { %v1494_v26 = vpop.xlane.xlu0 %1493  ;;  %v1503_v28 = vpop.xlane.xlu1 %1502 }
 0x48e   : > { %v1576_v1 = vsub.f32 %v6058_v32, %v1494_v26  ;;  %4726 = vpow2.f32 %v1602_v5  ;;  %v1579_v32 = vsub.f32 %v6066_v10, %v1503_v28 }
 0x490   : > { %2555 = vmax.xlane.f32.xlu1 %v2554_v62  ;;  %v1614_v15 = vmul.f32 1.442695, %v1576_v1  ;;  %v1620_v9 = vmul.f32 1.442695, %v1579_v32 }
 0x491   : > { %v1500_v27 = vpop.xlane.xlu0 %1499  ;;  %v1482_v16 = vpop.xlane.xlu1 %1481 }
 0x492   : > { %4728 = vpow2.f32 %v1614_v15  ;;  %v1572_v1 = vsub.f32 %v6068_v42, %v1482_v16  ;;  %v2560_v15 = vsel %vm1473_vm2, %v6276_v49, -inf }
 0x493   : > { %4730 = vpow2.f32 %v1608_v6 }
 0x494   : > { %2552 = vmax.xlane.f32.xlu1 %v2551_v18  ;;  %v6309_v22 = vpop.eup %4722  ;;  %4732 = vpow2.f32 %v1620_v9  ;;  %v1578_v18 = vsub.f32 %v6070_v44, %v1500_v27 }
 0x495   : > { %7220 = vst [vmem:[#allocation73_spill] sm:$0xff] %v6309_v22  ;;  %v1491_v13 = vpop.xlane.xlu1 %1490  ;;  %v1488_v57 = vpop.xlane.xlu0 %1487  ;;  %v1669_v5 = vsel %vm1473_vm2, %v6309_v22, 0.0 }
 0x496   : > { %v6314_v26 = vpop.eup %4724  ;;  %1670 = vadd.xlane.f32.xlu0 %v1669_v5  ;;  %v1606_v5 = vmul.f32 1.442695, %v1572_v1 }
 0x497   : > { %7221 = vst [vmem:[#allocation74_spill] sm:$0xff] %v6314_v26  ;;  %v1687_v10 = vsel %vm1473_vm2, %v6314_v26, 0.0 }
 0x498   : > { %2558 = vmax.xlane.f32.xlu1 %v2557_v40  ;;  %v6321_v28 = vpop.eup %4726  ;;  %v1618_v40 = vmul.f32 1.442695, %v1578_v18  ;;  %4734 = vpow2.f32 %v1606_v5 }
 0x499   : > { %v1509_v62 = vpop.xlane.xlu1 %1508  ;;  %v1506_v3 = vpop.xlane.xlu0 %1505  ;;  %v1666_v42 = vsel %vm1473_vm2, %v6321_v28, 0.0 }
 0x49a   : > { %1688 = vadd.xlane.f32.xlu0 %v1687_v10  ;;  %v1575_v10 = vsub.f32 %v6076_v50, %v1491_v13  ;;  %4736 = vpow2.f32 %v1618_v40  ;;  %v1581_v27 = vsub.f32 %v6078_v51, %v1509_v62  ;;  %v1574_v13 = vsub.f32 %v6080_v55, %v1488_v57 }
 0x49c   : > { %2561 = vmax.xlane.f32.xlu1 %v2560_v15  ;;  %v6328_v16 = vpop.eup %4728  ;;  %v1612_v44 = vmul.f32 1.442695, %v1575_v10  ;;  %v1624_v5 = vmul.f32 1.442695, %v1581_v27  ;;  %v1610_v10 = vmul.f32 1.442695, %v1574_v13 }
 0x49d   : > { %v1515_v6 = vpop.xlane.xlu1 %1514  ;;  %7222 = vst [vmem:[#allocation75_spill] sm:$0xff] %v6328_v16  ;;  %v1512_v32 = vpop.xlane.xlu0 %1511  ;;  %v1684_v9 = vsel %vm1473_vm2, %v6328_v16, 0.0 }
 0x49e   : > { %1667 = vadd.xlane.f32.xlu0 %v1666_v42  ;;  %v6335_v15 = vpop.eup %4730  ;;  %4738 = vpow2.f32 %v1612_v44 }
 0x49f   : > { %7223 = vst [vmem:[#allocation76_spill] sm:$0xff] %v6335_v15  ;;  %v1675_v18 = vsel %vm1473_vm2, %v6335_v15, 0.0  ;;  %v6344_v50 = vpop.eup %4732  ;;  %4740 = vpow2.f32 %v1624_v5  ;;  %v1582_v5 = vsub.f32 %v6090_v7, %v1512_v32 }
 0x4a0   : > { %7224 = vst [vmem:[#allocation77_spill] sm:$0xff] %v6344_v50  ;;  %v1693_v40 = vsel %vm1473_vm2, %v6344_v50, 0.0  ;;  %4742 = vpow2.f32 %v1610_v10 }
 0x4a1   : > { %v6331_v26 = vpop.xlane.xlu1 %1520  ;;  %v6340_v42 = vpop.xlane.xlu0 %1517 }
 0x4a2   : > { %1685 = vadd.xlane.f32.xlu0 %v1684_v9  ;;  %v6351_v51 = vpop.eup %4734  ;;  %v1580_v9 = vsub.f32 %v6082_v56, %v1506_v3 }
 0x4a3   : > { %v1672_v55 = vsel %vm1473_vm2, %v6351_v51, 0.0 }
 0x4a4   : > { %v6359_v57 = vpop.eup %4736 }
 0x4a5   : > { %v6338_v1 = vpop.xlane.xlu1 %1526  ;;  %v6353_v62 = vpop.xlane.xlu0 %1523 }
 0x4a6   : > { %1676 = vadd.xlane.f32.xlu0 %v1675_v18  ;;  %v1622_v18 = vmul.f32 1.442695, %v1580_v9 }
 0x4a8   : > { %v6367_v3 = vpop.eup %4738 }
 0x4a9   : > { %v6347_v16 = vpop.xlane.xlu1 %1532  ;;  %v6362_v22 = vpop.xlane.xlu0 %1529 }
 0x4aa   : > { %1694 = vadd.xlane.f32.xlu0 %v1693_v40  ;;  %v1583_v40 = vsub.f32 %v6088_v4, %v1515_v6  ;;  %v1681_v6 = vsel %vm1473_vm2, %v6367_v3, 0.0  ;;  %v6373_v9 = vpop.eup %4740 }
 0x4ab   : > { %v6382_v32 = vpop.eup %4742 }
 0x4ac   : > { %v1628_v13 = vmul.f32 1.442695, %v1583_v40 }
 0x4ad   : > { %v1539_v15 = vpop.xlane.xlu1 %1538 }
 0x4ae   : > { %v1591_v44 = vsub.f32 %v6120_v11, %v1539_v15  ;;  %1673 = vadd.xlane.f32.xlu0 %v1672_v55  ;;  %v1690_v11 = vsel %vm1473_vm2, %v6359_v57, 0.0  ;;  %v1585_v55 = vsub.f32 %v6096_v17, %v6331_v26 }
 0x4b0   : > { %v1644_v27 = vmul.f32 1.442695, %v1591_v44  ;;  %v1626_v44 = vmul.f32 1.442695, %v1582_v5 }
 0x4b1   : > { %v1545_v50 = vpop.xlane.xlu1 %1544 }
 0x4b2   : > { %4744 = vpow2.f32 %v1644_v27  ;;  %v1593_v56 = vsub.f32 %v6128_v34, %v1545_v50  ;;  %1691 = vadd.xlane.f32.xlu0 %v1690_v11  ;;  %v6375_v34 = vpop.xlane.xlu0 %1535  ;;  %v1584_v11 = vsub.f32 %v6098_v19, %v6340_v42  ;;  %v1587_v42 = vsub.f32 %v6104_v23, %v6338_v1 }
 0x4b3   : > { %4746 = vpow2.f32 %v1622_v18  ;;  %v1586_v1 = vsub.f32 %v6106_v24, %v6353_v62  ;;  %v1589_v24 = vsub.f32 %v6112_v45, %v6347_v16  ;;  %v1588_v16 = vsub.f32 %v6114_v47, %v6362_v22 }
 0x4b4   : > { %v1648_v15 = vmul.f32 1.442695, %v1593_v56  ;;  %v1632_v56 = vmul.f32 1.442695, %v1585_v55  ;;  %v1630_v19 = vmul.f32 1.442695, %v1584_v11  ;;  %v1590_v22 = vsub.f32 %v6122_v14, %v6375_v34 }
 0x4b5   : > { %v1551_v10 = vpop.xlane.xlu1 %1550  ;;  %v1636_v23 = vmul.f32 1.442695, %v1587_v42  ;;  %v1640_v45 = vmul.f32 1.442695, %v1589_v24  ;;  %v1638_v47 = vmul.f32 1.442695, %v1588_v16 }
 0x4b6   : > { %4748 = vpow2.f32 %v1648_v15  ;;  %v1595_v4 = vsub.f32 %v6136_v29, %v1551_v10  ;;  %1682 = vadd.xlane.f32.xlu0 %v1681_v6  ;;  %v1699_v29 = vsel %vm1473_vm2, %v6373_v9, 0.0  ;;  %v6390_v26 = vpop.xlane.xlu0 %1541 }
 0x4b7   : > { %4750 = vpow2.f32 %v1628_v13  ;;  %v1678_v13 = vsel %vm1473_vm2, %v6382_v32, 0.0  ;;  %v1592_v14 = vsub.f32 %v6130_v36, %v6390_v26 }
 0x4b8   : > { %v1652_v50 = vmul.f32 1.442695, %v1595_v4 }
 0x4b9   : > { %v1557_v27 = vpop.xlane.xlu1 %1556  ;;  %v1646_v36 = vmul.f32 1.442695, %v1592_v14 }
 0x4ba   : > { %4752 = vpow2.f32 %v1652_v50  ;;  %v1597_v7 = vsub.f32 %v6144_v53, %v1557_v27  ;;  %1700 = vadd.xlane.f32.xlu0 %v1699_v29 }
 0x4bb   : > { %4754 = vpow2.f32 %v1626_v44 }
 0x4bc   : > { %v6384_v18 = vpop.eup %4744  ;;  %v1656_v40 = vmul.f32 1.442695, %v1597_v7  ;;  %v6410_v7 = vpop.xlane.xlu0 %1547 }
 0x4bd   : > { %v1563_v15 = vpop.xlane.xlu1 %1562  ;;  %v1729_v17 = vsel %vm1473_vm2, %v6384_v18, 0.0  ;;  %v6395_v5 = vpop.eup %4746  ;;  %v1594_v26 = vsub.f32 %v6138_v38, %v6410_v7 }
 0x4be   : > { %4756 = vpow2.f32 %v1656_v40  ;;  %v1599_v53 = vsub.f32 %v6152_v41, %v1563_v15  ;;  %1730 = vadd.xlane.f32.xlu1 %v1729_v17  ;;  %1679 = vadd.xlane.f32.xlu0 %v1678_v13  ;;  %v1696_v44 = vsel %vm1473_vm2, %v6395_v5, 0.0  ;;  %v1634_v13 = vmul.f32 1.442695, %v1586_v1 }
 0x4bf   : > { %4758 = vpow2.f32 %v1632_v56  ;;  %v1650_v38 = vmul.f32 1.442695, %v1594_v26 }
 0x4c0   : > { %v6397_v10 = vpop.eup %4748  ;;  %v1660_v4 = vmul.f32 1.442695, %v1599_v53 }
 0x4c1   : > { %v1569_v6 = vpop.xlane.xlu1 %1568  ;;  %v1735_v50 = vsel %vm1473_vm2, %v6397_v10, 0.0  ;;  %v6406_v55 = vpop.eup %4750 }
 0x4c2   : > { %4760 = vpow2.f32 %v1660_v4  ;;  %v1601_v41 = vsub.f32 %v6160_v58, %v1569_v6  ;;  %1736 = vadd.xlane.f32.xlu1 %v1735_v50  ;;  %1697 = vadd.xlane.f32.xlu0 %v1696_v44  ;;  %v1705_v11 = vsel %vm1473_vm2, %v6406_v55, 0.0 }
 0x4c3   : > { %4762 = vpow2.f32 %v1630_v19 }
 0x4c4   : > { %v6408_v27 = vpop.eup %4752  ;;  %v1664_v29 = vmul.f32 1.442695, %v1601_v41 }
 0x4c5   : > { %v2472_v40 = vpop.xlane.xlu1 %2471  ;;  %v1741_v58 = vsel %vm1473_vm2, %v6408_v27, 0.0  ;;  %v6419_v15 = vpop.eup %4754 }
 0x4c6   : > { %4764 = vpow2.f32 %v1664_v29  ;;  %v2564_v56 = vsub.f32 %v6168_v48, %v2472_v40  ;;  %1742 = vadd.xlane.f32.xlu1 %v1741_v58  ;;  %1706 = vadd.xlane.f32.xlu0 %v1705_v11  ;;  %v6427_v48 = vpop.xlane.xlu0 %1553  ;;  %v1702_v42 = vsel %vm1473_vm2, %v6419_v15, 0.0 }
 0x4c7   : > { %4766 = vpow2.f32 %v1636_v23  ;;  %v1596_v7 = vsub.f32 %v6146_v12, %v6427_v48 }
 0x4c8   : > { %v6421_v17 = vpop.eup %4756  ;;  %v2597_v53 = vmul.f32 1.442695, %v2564_v56 }
 0x4c9   : > { %v2478_v62 = vpop.xlane.xlu1 %2477  ;;  %v1747_v4 = vsel %vm1473_vm2, %v6421_v17, 0.0  ;;  %v6432_v6 = vpop.eup %4758 }
 0x4ca   : > { %4768 = vpow2.f32 %v2597_v53  ;;  %v2566_v19 = vsub.f32 %v6176_v39, %v2478_v62  ;;  %1748 = vadd.xlane.f32.xlu1 %v1747_v4  ;;  %1703 = vadd.xlane.f32.xlu0 %v1702_v42  ;;  %v1711_v23 = vsel %vm1473_vm2, %v6432_v6, 0.0  ;;  %v6447_v58 = vpop.xlane.xlu0 %1559 }
 0x4cb   : > { %4770 = vpow2.f32 %v1634_v13  ;;  %v1598_v12 = vsub.f32 %v6154_v2, %v6447_v58 }
 0x4cc   : > { %v6434_v50 = vpop.eup %4760  ;;  %v2601_v41 = vmul.f32 1.442695, %v2566_v19  ;;  %v1642_v19 = vmul.f32 1.442695, %v1590_v22 }
 0x4cd   : > { %v2484_v44 = vpop.xlane.xlu1 %2483  ;;  %v1753_v29 = vsel %vm1473_vm2, %v6434_v50, 0.0  ;;  %v6443_v1 = vpop.eup %4762  ;;  %v1658_v26 = vmul.f32 1.442695, %v1598_v12 }
 0x4ce   : > { %4772 = vpow2.f32 %v2601_v41  ;;  %v2568_v39 = vsub.f32 %v6184_v25, %v2484_v44  ;;  %1754 = vadd.xlane.f32.xlu1 %v1753_v29  ;;  %1712 = vadd.xlane.f32.xlu0 %v1711_v23  ;;  %v1708_v13 = vsel %vm1473_vm2, %v6443_v1, 0.0 }
 0x4cf   : > { %4774 = vpow2.f32 %v1640_v45 }
 0x4d0   : > { %v6445_v40 = vpop.eup %4764  ;;  %v2605_v56 = vmul.f32 1.442695, %v2568_v39 }
 0x4d1   : > { %v2490_v11 = vpop.xlane.xlu1 %2489  ;;  %v1759_v25 = vsel %vm1473_vm2, %v6445_v40, 0.0  ;;  %v6456_v24 = vpop.eup %4766 }
 0x4d2   : > { %4776 = vpow2.f32 %v2605_v56  ;;  %v2570_v53 = vsub.f32 %v6196_v59, %v2490_v11  ;;  %1760 = vadd.xlane.f32.xlu1 %v1759_v25  ;;  %1709 = vadd.xlane.f32.xlu0 %v1708_v13  ;;  %v1566_v59 = vpop.xlane.xlu0 %1565  ;;  %v1717_v45 = vsel %vm1473_vm2, %v6456_v24, 0.0 }
 0x4d3   : > { %4778 = vpow2.f32 %v1638_v47  ;;  %v1600_v2 = vsub.f32 %v6162_v52, %v1566_v59 }
 0x4d4   : > { %v6458_v62 = vpop.eup %4768  ;;  %v2609_v4 = vmul.f32 1.442695, %v2570_v53 }
 0x4d5   : > { %v2496_v34 = vpop.xlane.xlu1 %2495  ;;  %v2662_v42 = vsel %vm1473_vm2, %v6458_v62, 0.0  ;;  %v6467_v16 = vpop.eup %4770 }
 0x4d6   : > { %4780 = vpow2.f32 %v2609_v4  ;;  %v2572_v41 = vsub.f32 %v6200_v0, %v2496_v34  ;;  %2663 = vadd.xlane.f32.xlu1 %v2662_v42  ;;  %1718 = vadd.xlane.f32.xlu0 %v1717_v45  ;;  %v1714_v56 = vsel %vm1473_vm2, %v6467_v16, 0.0  ;;  %v2469_v11 = vpop.xlane.xlu0 %2468  ;;  %v1654_v42 = vmul.f32 1.442695, %v1596_v7 }
 0x4d7   : > { %4782 = vpow2.f32 %v1642_v19  ;;  %v2563_v52 = vsub.f32 %v6170_v43, %v2469_v11 }
 0x4d8   : > { %v6469_v44 = vpop.eup %4772  ;;  %v2613_v29 = vmul.f32 1.442695, %v2572_v41 }
 0x4d9   : > { %v2502_v39 = vpop.xlane.xlu1 %2501  ;;  %v2668_v23 = vsel %vm1473_vm2, %v6469_v44, 0.0  ;;  %v6478_v47 = vpop.eup %4774 }
 0x4da   : > { %4784 = vpow2.f32 %v2613_v29  ;;  %v2574_v0 = vsub.f32 %v6208_v54, %v2502_v39  ;;  %2669 = vadd.xlane.f32.xlu1 %v2668_v23  ;;  %1715 = vadd.xlane.f32.xlu0 %v1714_v56  ;;  %v1723_v4 = vsel %vm1473_vm2, %v6478_v47, 0.0  ;;  %v2475_v41 = vpop.xlane.xlu0 %2474 }
 0x4db   : > { %4786 = vpow2.f32 %v1646_v36 }
 0x4dc   : > { %v6480_v22 = vpop.eup %4776  ;;  %v2617_v25 = vmul.f32 1.442695, %v2574_v0 }
 0x4dd   : > { %v2508_v53 = vpop.xlane.xlu1 %2507  ;;  %v2674_v54 = vsel %vm1473_vm2, %v6480_v22, 0.0  ;;  %v6489_v19 = vpop.eup %4778 }
 0x4de   : > { %4788 = vpow2.f32 %v2617_v25  ;;  %v2576_v13 = vsub.f32 %v6216_v46, %v2508_v53  ;;  %2675 = vadd.xlane.f32.xlu1 %v2674_v54  ;;  %1724 = vadd.xlane.f32.xlu0 %v1723_v4  ;;  %v1720_v45 = vsel %vm1473_vm2, %v6489_v19, 0.0  ;;  %v1662_v53 = vmul.f32 1.442695, %v1600_v2 }
 0x4df   : > { %4790 = vpow2.f32 %v1650_v38  ;;  %v2481_v38 = vpop.xlane.xlu0 %2480 }
 0x4e0   : > { %v6491_v14 = vpop.eup %4780  ;;  %v2621_v34 = vmul.f32 1.442695, %v2576_v13 }
 0x4e1   : > { %v6495_v48 = vpop.xlane.xlu1 %2504  ;;  %v2680_v46 = vsel %vm1473_vm2, %v6491_v14, 0.0  ;;  %v6501_v29 = vpop.eup %4782 }
 0x4e2   : > { %4792 = vpow2.f32 %v2621_v34  ;;  %2681 = vadd.xlane.f32.xlu1 %v2680_v46  ;;  %1721 = vadd.xlane.f32.xlu0 %v1720_v45  ;;  %v1726_v0 = vsel %vm1473_vm2, %v6501_v29, 0.0  ;;  %v2595_v34 = vmul.f32 1.442695, %v2563_v52 }
 0x4e3   : > { %4794 = vpow2.f32 %v1654_v42  ;;  %v2565_v42 = vsub.f32 %v6178_v31, %v2475_v41  ;;  %v2487_v12 = vpop.xlane.xlu0 %2486 }
 0x4e4   : > { %v6503_v36 = vpop.eup %4784  ;;  %4796 = vpow2.f32 %v1658_v26 }
 0x4e5   : > { %v2514_v58 = vpop.xlane.xlu1 %2513  ;;  %v2686_v39 = vsel %vm1473_vm2, %v6503_v36, 0.0  ;;  %v6511_v56 = vpop.eup %4786 }
 0x4e6   : > { %v2578_v23 = vsub.f32 %v6224_v33, %v2514_v58  ;;  %2687 = vadd.xlane.f32.xlu1 %v2686_v39  ;;  %1727 = vadd.xlane.f32.xlu0 %v1726_v0  ;;  %v1732_v54 = vsel %vm1473_vm2, %v6511_v56, 0.0  ;;  %v2599_v58 = vmul.f32 1.442695, %v2565_v42  ;;  %v2567_v39 = vsub.f32 %v6186_v20, %v2481_v38  ;;  %v7225_v38 = vld [vmem:[#allocation66_spill] sm:$0xff] }
 0x4e7   : > { %v2493_v0 = vpop.xlane.xlu0 %2492 }
 0x4e8   : > { %v6513_v25 = vpop.eup %4788  ;;  %v2625_v7 = vmul.f32 1.442695, %v2578_v23 }
 0x4e9   : > { %v6516_v59 = vpop.xlane.xlu1 %2510  ;;  %v2692_v33 = vsel %vm1473_vm2, %v6513_v25, 0.0  ;;  %v6522_v13 = vpop.eup %4790 }
 0x4ea   : > { %4798 = vpow2.f32 %v2625_v7  ;;  %2693 = vadd.xlane.f32.xlu1 %v2692_v33  ;;  %1733 = vadd.xlane.f32.xlu0 %v1732_v54  ;;  %v1738_v45 = vsel %vm1473_vm2, %v6522_v13, 0.0  ;;  %v2603_v7 = vmul.f32 1.442695, %v2567_v39 }
 0x4eb   : > { %4800 = vpow2.f32 %v1662_v53  ;;  %v2569_v53 = vsub.f32 %v6198_v60, %v2487_v12  ;;  %v2499_v60 = vpop.xlane.xlu0 %2498 }
 0x4ec   : > { %v6524_v4 = vpop.eup %4792  ;;  %4802 = vpow2.f32 %v2595_v34 }
 0x4ed   : > { %v2520_v43 = vpop.xlane.xlu1 %2519  ;;  %v2698_v11 = vsel %vm1473_vm2, %v6524_v4, 0.0  ;;  %v6532_v26 = vpop.eup %4794 }
 0x4ee   : > { %v2580_v46 = vsub.f32 %v6232_v21, %v2520_v43  ;;  %2699 = vadd.xlane.f32.xlu1 %v2698_v11  ;;  %1739 = vadd.xlane.f32.xlu0 %v1738_v45  ;;  %v1744_v41 = vsel %vm1473_vm2, %v6532_v26, 0.0  ;;  %v6539_v23 = vpop.eup %4796  ;;  %v2607_v43 = vmul.f32 1.442695, %v2569_v53  ;;  %v7226_v11 = vld [vmem:[#allocation61_spill] sm:$0xff] }
 0x4ef   : > { %v1750_v54 = vsel %vm1473_vm2, %v6539_v23, 0.0 }
 0x4f0   : > { %v2629_v2 = vmul.f32 1.442695, %v2580_v46  ;;  %v2571_v46 = vsub.f32 %v7226_v11, %v2493_v0  ;;  %v7229_v0 = vld [vmem:[#allocation68_spill] sm:$0xff] }
 0x4f1   : > { %v6535_v31 = vpop.xlane.xlu1 %2516 }
 0x4f2   : > { %4804 = vpow2.f32 %v2629_v2  ;;  %1745 = vadd.xlane.f32.xlu0 %v1744_v41  ;;  %v2611_v39 = vmul.f32 1.442695, %v2571_v46  ;;  %v7228_v41 = vld [vmem:[#allocation62_spill] sm:$0xff] }
 0x4f3   : > { %4806 = vpow2.f32 %v2599_v58 }
 0x4f4   : > { %v6541_v21 = vpop.eup %4798  ;;  %4808 = vpow2.f32 %v2603_v7 }
 0x4f5   : > { %v2526_v52 = vpop.xlane.xlu1 %2525  ;;  %v2704_v20 = vsel %vm1473_vm2, %v6541_v21, 0.0  ;;  %v6549_v34 = vpop.eup %4800 }
 0x4f6   : > { %v2582_v33 = vsub.f32 %v7225_v38, %v2526_v52  ;;  %2705 = vadd.xlane.f32.xlu1 %v2704_v20  ;;  %1751 = vadd.xlane.f32.xlu0 %v1750_v54  ;;  %v1756_v12 = vsel %vm1473_vm2, %v6549_v34, 0.0  ;;  %v6554_v2 = vpop.eup %4802  ;;  %v2573_v52 = vsub.f32 %v7228_v41, %v2499_v60 }
 0x4f7   : > { %v2659_v38 = vsel %vm1473_vm2, %v6554_v2, 0.0 }
 0x4f8   : > { %v2633_v42 = vmul.f32 1.442695, %v2582_v33 }
 0x4f9   : > { %v2523_v45 = vpop.xlane.xlu1 %2522 }
 0x4fa   : > { %4810 = vpow2.f32 %v2633_v42  ;;  %1757 = vadd.xlane.f32.xlu0 %v1756_v12  ;;  %v2615_v42 = vmul.f32 1.442695, %v2573_v52 }
 0x4fb   : > { %4812 = vpow2.f32 %v2607_v43  ;;  %v7230_v43 = vld [vmem:[#allocation63_spill] sm:$0xff] }
 0x4fc   : > { %v6556_v58 = vpop.eup %4804  ;;  %4814 = vpow2.f32 %v2611_v39  ;;  %v2575_v11 = vsub.f32 %v7230_v43, %v6495_v48  ;;  %v7233_v48 = vld [vmem:[#allocation70_spill] sm:$0xff] }
 0x4fd   : > { %7227 = vst [vmem:[#allocation66_spill] sm:$0xff] %v6556_v58  ;;  %v2532_v20 = vpop.xlane.xlu1 %2531  ;;  %v2710_v7 = vsel %vm1473_vm2, %v6556_v58, 0.0  ;;  %v6564_v33 = vpop.eup %4806 }
 0x4fe   : > { %v2584_v53 = vsub.f32 %v7229_v0, %v2532_v20  ;;  %2711 = vadd.xlane.f32.xlu1 %v2710_v7  ;;  %2660 = vadd.xlane.f32.xlu0 %v2659_v38  ;;  %v2665_v60 = vsel %vm1473_vm2, %v6564_v33, 0.0  ;;  %v6570_v12 = vpop.eup %4808  ;;  %v2619_v20 = vmul.f32 1.442695, %v2575_v11  ;;  %v7232_v7 = vld [vmem:[#allocation64_spill] sm:$0xff]  ;;  %v7234_v11 = vld [vmem:[#allocation65_spill] sm:$0xff] }
 0x4ff   : > { %v2577_v0 = vsub.f32 %v7232_v7, %v6516_v59  ;;  %v2671_v38 = vsel %vm1473_vm2, %v6570_v12, 0.0 }
 0x500   : > { %v2637_v54 = vmul.f32 1.442695, %v2584_v53 }
 0x501   : > { %v2529_v46 = vpop.xlane.xlu1 %2528 }
 0x502   : > { %4816 = vpow2.f32 %v2637_v54  ;;  %2666 = vadd.xlane.f32.xlu0 %v2665_v60  ;;  %v2579_v60 = vsub.f32 %v7234_v11, %v6535_v31 }
 0x503   : > { %4818 = vpow2.f32 %v2615_v42  ;;  %v2623_v42 = vmul.f32 1.442695, %v2577_v0 }
 0x504   : > { %v6572_v41 = vpop.eup %4810  ;;  %4820 = vpow2.f32 %v2619_v20 }
 0x505   : > { %7231 = vst [vmem:[#allocation61_spill] sm:$0xff] %v6572_v41  ;;  %v2538_v39 = vpop.xlane.xlu1 %2537  ;;  %v2716_v52 = vsel %vm1473_vm2, %v6572_v41, 0.0  ;;  %v6581_v54 = vpop.eup %4812 }
 0x506   : > { %v2586_v53 = vsub.f32 %v7233_v48, %v2538_v39  ;;  %2717 = vadd.xlane.f32.xlu1 %v2716_v52  ;;  %2672 = vadd.xlane.f32.xlu0 %v2671_v38  ;;  %v2677_v7 = vsel %vm1473_vm2, %v6581_v54, 0.0  ;;  %v6587_v41 = vpop.eup %4814  ;;  %v2627_v52 = vmul.f32 1.442695, %v2579_v60  ;;  %v7236_v48 = vld [vmem:[#allocation67_spill] sm:$0xff] }
 0x507   : > { %v2581_v38 = vsub.f32 %v7236_v48, %v2523_v45  ;;  %v2683_v0 = vsel %vm1473_vm2, %v6587_v41, 0.0 }
 0x508   : > { %v2641_v43 = vmul.f32 1.442695, %v2586_v53 }
 0x509   : > { %v2535_v59 = vpop.xlane.xlu1 %2534 }
 0x50a   : > { %4822 = vpow2.f32 %v2641_v43  ;;  %2678 = vadd.xlane.f32.xlu0 %v2677_v7  ;;  %v2631_v7 = vmul.f32 1.442695, %v2581_v38 }
 0x50b   : > { %4824 = vpow2.f32 %v2623_v42  ;;  %v7237_v42 = vld [vmem:[#allocation69_spill] sm:$0xff] }
 0x50c   : > { %v6589_v39 = vpop.eup %4816  ;;  %4826 = vpow2.f32 %v2627_v52  ;;  %v2583_v60 = vsub.f32 %v7237_v42, %v2529_v46 }
 0x50d   : > { %7235 = vst [vmem:[#allocation62_spill] sm:$0xff] %v6589_v39  ;;  %v2544_v53 = vpop.xlane.xlu1 %2543  ;;  %v2722_v20 = vsel %vm1473_vm2, %v6589_v39, 0.0  ;;  %v6597_v43 = vpop.eup %4818 }
 0x50e   : > { %v2588_v31 = vsub.f32 %v6258_v8, %v2544_v53  ;;  %2723 = vadd.xlane.f32.xlu1 %v2722_v20  ;;  %2684 = vadd.xlane.f32.xlu0 %v2683_v0  ;;  %v2689_v45 = vsel %vm1473_vm2, %v6597_v43, 0.0  ;;  %v6602_v48 = vpop.eup %4820  ;;  %v2635_v53 = vmul.f32 1.442695, %v2583_v60  ;;  %v7238_v20 = vld [vmem:[#allocation71_spill] sm:$0xff] }
 0x50f   : > { %v2585_v39 = vsub.f32 %v7238_v20, %v2535_v59  ;;  %v2695_v38 = vsel %vm1473_vm2, %v6602_v48, 0.0 }
 0x510   : > { %v2645_v11 = vmul.f32 1.442695, %v2588_v31 }
 0x511   : > { %v2541_v58 = vpop.xlane.xlu1 %2540  ;;  %v2639_v42 = vmul.f32 1.442695, %v2585_v39 }
 0x512   : > { %4828 = vpow2.f32 %v2645_v11  ;;  %2690 = vadd.xlane.f32.xlu0 %v2689_v45 }
 0x513   : > { %4830 = vpow2.f32 %v2631_v7  ;;  %v7239_v7 = vld [vmem:[#allocation72_spill] sm:$0xff] }
 0x514   : > { %v6604_v8 = vpop.eup %4822  ;;  %4832 = vpow2.f32 %v2635_v53  ;;  %v2587_v60 = vsub.f32 %v7239_v7, %v2541_v58 }
 0x515   : > { %v2550_v0 = vpop.xlane.xlu1 %2549  ;;  %v2728_v52 = vsel %vm1473_vm2, %v6604_v8, 0.0  ;;  %v6612_v31 = vpop.eup %4824 }
 0x516   : > { %v2590_v46 = vsub.f32 %v6264_v61, %v2550_v0  ;;  %2729 = vadd.xlane.f32.xlu1 %v2728_v52  ;;  %2696 = vadd.xlane.f32.xlu0 %v2695_v38  ;;  %v2701_v59 = vsel %vm1473_vm2, %v6612_v31, 0.0  ;;  %v6617_v20 = vpop.eup %4826  ;;  %v2643_v0 = vmul.f32 1.442695, %v2587_v60 }
 0x517   : > { %v2707_v53 = vsel %vm1473_vm2, %v6617_v20, 0.0 }
 0x518   : > { %v2649_v11 = vmul.f32 1.442695, %v2590_v46 }
 0x519   : > { %v2547_v45 = vpop.xlane.xlu1 %2546 }
 0x51a   : > { %4834 = vpow2.f32 %v2649_v11  ;;  %2702 = vadd.xlane.f32.xlu0 %v2701_v59  ;;  %v2589_v52 = vsub.f32 %v6266_v63, %v2547_v45 }
 0x51b   : > { %4836 = vpow2.f32 %v2639_v42 }
 0x51c   : > { %v6619_v61 = vpop.eup %4828  ;;  %4838 = vpow2.f32 %v2643_v0  ;;  %v2647_v7 = vmul.f32 1.442695, %v2589_v52 }
 0x51d   : > { %7240 = vst [vmem:[#allocation68_spill] sm:$0xff] %v6619_v61  ;;  %v2556_v38 = vpop.xlane.xlu1 %2555  ;;  %v2734_v39 = vsel %vm1473_vm2, %v6619_v61, 0.0  ;;  %v6627_v46 = vpop.eup %4830 }
 0x51e   : > { %v2592_v58 = vsub.f32 %v6270_v37, %v2556_v38  ;;  %2735 = vadd.xlane.f32.xlu1 %v2734_v39  ;;  %2708 = vadd.xlane.f32.xlu0 %v2707_v53  ;;  %v2713_v60 = vsel %vm1473_vm2, %v6627_v46, 0.0  ;;  %v6632_v45 = vpop.eup %4832 }
 0x520   : > { %v2653_v11 = vmul.f32 1.442695, %v2592_v58 }
 0x521   : > { %v2553_v42 = vpop.xlane.xlu1 %2552 }
 0x522   : > { %4840 = vpow2.f32 %v2653_v11  ;;  %v2591_v63 = vsub.f32 %v6272_v35, %v2553_v42  ;;  %2714 = vadd.xlane.f32.xlu0 %v2713_v60  ;;  %v2719_v35 = vsel %vm1473_vm2, %v6632_v45, 0.0 }
 0x523   : > { %v1671_v59 = vpop.xlane.xlu0 %1670  ;;  %4842 = vpow2.f32 %v2647_v7 }
 0x524   : > { %v6634_v37 = vpop.eup %4834  ;;  %v2651_v38 = vmul.f32 1.442695, %v2591_v63 }
 0x525   : > { %7241 = vst [vmem:[#allocation63_spill] sm:$0xff] %v6634_v37  ;;  %v2559_v39 = vpop.xlane.xlu1 %2558  ;;  %v2740_v0 = vsel %vm1473_vm2, %v6634_v37, 0.0  ;;  %v6641_v58 = vpop.eup %4836  ;;  %v7248_v37 = vld [vmem:[#allocation73_spill] sm:$0xff] }
 0x526   : > { %v2593_v52 = vsub.f32 %v6278_v30, %v2559_v39  ;;  %2741 = vadd.xlane.f32.xlu1 %v2740_v0  ;;  %2720 = vadd.xlane.f32.xlu0 %v2719_v35  ;;  %4844 = vpow2.f32 %v2651_v38  ;;  %v2725_v63 = vsel %vm1473_vm2, %v6641_v58, 0.0  ;;  %v6646_v60 = vpop.eup %4838 }
 0x527   : > { %v1689_v11 = vpop.xlane.xlu0 %1688  ;;  %7242 = vst [vmem:[#allocation64_spill] sm:$0xff] %v6646_v60  ;;  %4846 = vrcp.f32 %v1671_v59 }
 0x528   : > { %v2655_v53 = vmul.f32 1.442695, %v2593_v52 }
 0x529   : > { %v2562_v42 = vpop.xlane.xlu1 %2561 }
 0x52a   : > { %v2594_v7 = vsub.f32 %v6276_v49, %v2562_v42  ;;  %2726 = vadd.xlane.f32.xlu0 %v2725_v63  ;;  %4848 = vpow2.f32 %v2655_v53  ;;  %v2731_v49 = vsel %vm1473_vm2, %v6646_v60, 0.0 }
 0x52b   : > { %v1668_v0 = vpop.xlane.xlu0 %1667 }
 0x52c   : > { %v6648_v30 = vpop.eup %4840  ;;  %v2657_v39 = vmul.f32 1.442695, %v2594_v7  ;;  %4850 = vrcp.f32 %v1668_v0 }
 0x52d   : > { %7243 = vst [vmem:[#allocation70_spill] sm:$0xff] %v6648_v30  ;;  %v2746_v52 = vsel %vm1473_vm2, %v6648_v30, 0.0  ;;  %v6654_v38 = vpop.eup %4842 }
 0x52e   : > { %4852 = vpow2.f32 %v2657_v39  ;;  %2747 = vadd.xlane.f32.xlu1 %v2746_v52  ;;  %7244 = vst [vmem:[#allocation65_spill] sm:$0xff] %v6654_v38  ;;  %2732 = vadd.xlane.f32.xlu0 %v2731_v49  ;;  %v2737_v59 = vsel %vm1473_vm2, %v6654_v38, 0.0 }
 0x52f   : > { %v1686_v35 = vpop.xlane.xlu0 %1685 }
 0x530   : > { %v6658_v42 = vpop.eup %4844 }
 0x531   : > { %7245 = vst [vmem:[#allocation67_spill] sm:$0xff] %v6658_v42  ;;  %v4847_v7 = vpop.eup %4846  ;;  %v2743_v39 = vsel %vm1473_vm2, %v6658_v42, 0.0 }
 0x532   : > { %2738 = vadd.xlane.f32.xlu0 %v2737_v59  ;;  %v1795_v61 = vmul.f32 %v4847_v7, %v7248_v37 }
 0x533   : > { %v1677_v53 = vpop.xlane.xlu0 %1676 }
 0x534   : > { %v6660_v63 = vpop.eup %4848  ;;  %4854 = vrcp.f32 %v1677_v53 }
 0x535   : > { %7246 = vst [vmem:[#allocation69_spill] sm:$0xff] %v6660_v63  ;;  %v2749_v59 = vsel %vm1473_vm2, %v6660_v63, 0.0 }
 0x536   : > { %v4851_v0 = vpop.eup %4850  ;;  %2744 = vadd.xlane.f32.xlu0 %v2743_v39  ;;  %v7249_v39 = vld [vmem:[#allocation42_spill] sm:$0xff] }
 0x537   : > { %v1695_v30 = vpop.xlane.xlu0 %1694  ;;  %v1794_v49 = vmul.f32 %v4851_v0, %v6321_v28 }
 0x538   : > { %v6664_v52 = vpop.eup %4852 }
 0x539   : > { %7247 = vst [vmem:[#allocation71_spill] sm:$0xff] %v6664_v52  ;;  %v2752_v38 = vsel %vm1473_vm2, %v6664_v52, 0.0  ;;  %4246 = vmatprep.mubr.msk.f32.mxu0 %vm1473_vm2, %v1794_v49  ;;  %v7250_v49 = vld [vmem:[#allocation76_spill] sm:$0xff] }
 0x53a   : > { %2753 = vadd.xlane.f32.xlu1 %v2752_v38  ;;  %2750 = vadd.xlane.f32.xlu0 %v2749_v59 }
 0x53b   : > { %4247 = vmatmul.mubr.msk.f32.vlgmr.msra.gmra.mrb[10].mxu0 %vm1473_vm2, %v1795_v61  ;;  %v1674_v42 = vpop.xlane.xlu0 %1673 }
 0x53c   : > { %4345 = vmatpush3.msra.mxu0 %v7249_v39  ;;  %4856 = vrcp.f32 %v1674_v42 }
 0x53d   : > { %4858 = vrcp.f32 %v1686_v35 }
 0x53e   : > { %v4855_v37 = vpop.eup %4854 }
 0x53f   : > { %v1692_v28 = vpop.xlane.xlu0 %1691  ;;  %v1797_v38 = vmul.f32 %v4855_v37, %v7250_v49 }
 0x543   : > { %v1683_v0 = vpop.xlane.xlu0 %1682 }
 0x544   : > { %4860 = vrcp.f32 %v1683_v0 }
 0x546   : > { %v4857_v7 = vpop.eup %4856 }
 0x547   : > { %v1701_v60 = vpop.xlane.xlu0 %1700  ;;  %v1796_v52 = vmul.f32 %v4857_v7, %v6351_v51  ;;  %v4859_v59 = vpop.eup %4858 }
 0x549   : > { %4249 = vmatprep.mubr.msk.f32.mxu0 %vm1473_vm2, %v1796_v52 }
 0x54a   : > { %4250 = vmatmul.mubr.msk.f32.gmra.mrb[12].mxu0 %vm1473_vm2, %v1797_v38 }
 0x54b   : > { %v1680_v61 = vpop.xlane.xlu0 %1679  ;;  %v1731_v52 = vpop.xlane.xlu1 %1730 }
 0x54c   : > { %4862 = vrcp.f32 %v1680_v61 }
 0x54d   : > { %4864 = vrcp.f32 %v1689_v11  ;;  %v7251_v11 = vld [vmem:[#allocation75_spill] sm:$0xff] }
 0x54e   : > { %4866 = vrcp.f32 %v1692_v28  ;;  %v4861_v39 = vpop.eup %4860  ;;  %v1800_v7 = vmul.f32 %v4859_v59, %v7251_v11 }
 0x54f   : > { %v1698_v53 = vpop.xlane.xlu0 %1697  ;;  %4868 = vrcp.f32 %v1695_v30  ;;  %v1799_v35 = vmul.f32 %v4861_v39, %v6367_v3  ;;  %v1737_v61 = vpop.xlane.xlu1 %1736 }
 0x550   : > { %4870 = vrcp.f32 %v1698_v53  ;;  %v7253_v53 = vld [vmem:[#allocation77_spill] sm:$0xff] }
 0x551   : > { %4872 = vrcp.f32 %v1701_v60  ;;  %v7252_v60 = vld [vmem:[#allocation74_spill] sm:$0xff] }
 0x553   : > { %v1707_v42 = vpop.xlane.xlu0 %1706 }
 0x556   : > { %v4863_v63 = vpop.eup %4862 }
 0x557   : > { %v1704_v51 = vpop.xlane.xlu0 %1703  ;;  %v1798_v37 = vmul.f32 %v4863_v63, %v6382_v32  ;;  %v4865_v0 = vpop.eup %4864 }
 0x558   : > { %4874 = vrcp.f32 %v1704_v51  ;;  %v4867_v28 = vpop.eup %4866  ;;  %v1801_v49 = vmul.f32 %v4865_v0, %v7252_v60 }
 0x559   : > { %4252 = vmatprep.mubr.msk.f32.mxu0 %vm1473_vm2, %v1798_v37  ;;  %4876 = vrcp.f32 %v1707_v42  ;;  %v4869_v38 = vpop.eup %4868  ;;  %v1802_v32 = vmul.f32 %v4867_v28, %v6359_v57  ;;  %v1743_v37 = vpop.xlane.xlu1 %1742 }
 0x55a   : > { %4253 = vmatmul.mubr.msk.f32.gmra.mrb[14].mxu0 %vm1473_vm2, %v1799_v35  ;;  %v4871_v63 = vpop.eup %4870  ;;  %v1803_v59 = vmul.f32 %v4869_v38, %v7253_v53 }
 0x55b   : > { %4255 = vmatprep.mubr.msk.f32.mxu0 %vm1473_vm2, %v1800_v7  ;;  %v1713_v30 = vpop.xlane.xlu0 %1712  ;;  %v4873_v42 = vpop.eup %4872  ;;  %v1804_v39 = vmul.f32 %v4871_v63, %v6395_v5 }
 0x55c   : > { %4878 = vrcp.f32 %v1713_v30  ;;  %v1805_v35 = vmul.f32 %v4873_v42, %v6373_v9 }
 0x55d   : > { %v1749_v60 = vpop.xlane.xlu1 %1748 }
 0x55e   : > { %4256 = vmatmul.mubr.msk.f32.gmra.mrb[16].mxu0 %vm1473_vm2, %v1801_v49 }
 0x55f   : > { %4258 = vmatprep.mubr.msk.f32.mxu0 %vm1473_vm2, %v1802_v32  ;;  %v1710_v3 = vpop.xlane.xlu0 %1709 }
 0x560   : > { %4880 = vrcp.f32 %v1710_v3 }
 0x561   : > { %v1755_v32 = vpop.xlane.xlu1 %1754 }
 0x562   : > { %v4875_v51 = vpop.eup %4874  ;;  %4259 = vmatmul.mubr.msk.f32.gmra.mrb[18].mxu0 %vm1473_vm2, %v1803_v59 }
 0x563   : > { %4261 = vmatprep.mubr.msk.f32.mxu0 %vm1473_vm2, %v1804_v39  ;;  %v1719_v57 = vpop.xlane.xlu0 %1718  ;;  %v4877_v0 = vpop.eup %4876  ;;  %v1806_v11 = vmul.f32 %v4875_v51, %v6419_v15 }
 0x564   : > { %4882 = vrcp.f32 %v1719_v57  ;;  %v1807_v5 = vmul.f32 %v4877_v0, %v6406_v55 }
 0x566   : > { %4262 = vmatmul.mubr.msk.f32.gmra.mrb[20].mxu0 %vm1473_vm2, %v1805_v35  ;;  %v4879_v28 = vpop.eup %4878 }
 0x567   : > { %4264 = vmatprep.mubr.msk.f32.mxu0 %vm1473_vm2, %v1806_v11  ;;  %v1716_v7 = vpop.xlane.xlu0 %1715  ;;  %v1809_v38 = vmul.f32 %v4879_v28, %v6432_v6  ;;  %v1761_v6 = vpop.xlane.xlu1 %1760 }
 0x568   : > { %4884 = vrcp.f32 %v1716_v7 }
 0x56a   : > { %v4881_v30 = vpop.eup %4880  ;;  %4265 = vmatmul.mubr.msk.f32.gmra.mrb[22].mxu0 %vm1473_vm2, %v1807_v5 }
 0x56b   : > { %v1725_v49 = vpop.xlane.xlu0 %1724  ;;  %v1808_v9 = vmul.f32 %v4881_v30, %v6443_v1  ;;  %v2664_v57 = vpop.xlane.xlu1 %2663 }
 0x56c   : > { %4886 = vrcp.f32 %v1725_v49 }
 0x56d   : > { %4267 = vmatprep.mubr.msk.f32.mxu0 %vm1473_vm2, %v1808_v9 }
 0x56e   : > { %4268 = vmatmul.mubr.msk.f32.gmra.mrb[24].mxu0 %vm1473_vm2, %v1809_v38  ;;  %v4883_v63 = vpop.eup %4882 }
 0x56f   : > { %v1722_v15 = vpop.xlane.xlu0 %1721  ;;  %v1811_v59 = vmul.f32 %v4883_v63, %v6456_v24  ;;  %v2670_v7 = vpop.xlane.xlu1 %2669 }
 0x570   : > { %4888 = vrcp.f32 %v1722_v15 }
 0x571   : > { %4890 = vrcp.f32 %v1731_v52 }
 0x572   : > { %v4885_v55 = vpop.eup %4884 }
 0x573   : > { %v1728_v3 = vpop.xlane.xlu0 %1727  ;;  %v1810_v53 = vmul.f32 %v4885_v55, %v6467_v16  ;;  %v2676_v49 = vpop.xlane.xlu1 %2675 }
 0x574   : > { %4892 = vrcp.f32 %v1728_v3 }
 0x575   : > { %4270 = vmatprep.mubr.msk.f32.mxu0 %vm1473_vm2, %v1810_v53  ;;  %4894 = vrcp.f32 %v1737_v61 }
 0x576   : > { %4271 = vmatmul.mubr.msk.f32.gmra.mrb[26].mxu0 %vm1473_vm2, %v1811_v59  ;;  %v4887_v42 = vpop.eup %4886 }
 0x577   : > { %v1734_v1 = vpop.xlane.xlu0 %1733  ;;  %v1813_v16 = vmul.f32 %v4887_v42, %v6478_v47  ;;  %v2682_v55 = vpop.xlane.xlu1 %2681 }
 0x578   : > { %4896 = vrcp.f32 %v1734_v1 }
 0x579   : > { %4898 = vrcp.f32 %v1743_v37 }
 0x57a   : > { %v4889_v39 = vpop.eup %4888 }
 0x57b   : > { %v1740_v51 = vpop.xlane.xlu0 %1739  ;;  %v1812_v52 = vmul.f32 %v4889_v39, %v6489_v19  ;;  %v4891_v35 = vpop.eup %4890 }
 0x57c   : > { %4900 = vrcp.f32 %v1740_v51  ;;  %v1815_v37 = vmul.f32 %v4891_v35, %v6384_v18  ;;  %v2688_v1 = vpop.xlane.xlu1 %2687 }
 0x57d   : > { %4273 = vmatprep.mubr.msk.f32.mxu0 %vm1473_vm2, %v1812_v52  ;;  %4902 = vrcp.f32 %v1749_v60 }
 0x57e   : > { %v4893_v24 = vpop.eup %4892  ;;  %4274 = vmatmul.mubr.msk.f32.gmra.mrb[28].mxu0 %vm1473_vm2, %v1813_v16 }
 0x57f   : > { %v1746_v61 = vpop.xlane.xlu0 %1745  ;;  %v1814_v0 = vmul.f32 %v4893_v24, %v6501_v29  ;;  %v4895_v11 = vpop.eup %4894 }
 0x580   : > { %4904 = vrcp.f32 %v1746_v61  ;;  %v1817_v28 = vmul.f32 %v4895_v11, %v6397_v10  ;;  %v2694_v16 = vpop.xlane.xlu1 %2693 }
 0x581   : > { %4276 = vmatprep.mubr.msk.f32.mxu0 %vm1473_vm2, %v1814_v0  ;;  %4906 = vrcp.f32 %v1755_v32 }
 0x582   : > { %v4897_v19 = vpop.eup %4896  ;;  %4277 = vmatmul.mubr.msk.f32.gmra.mrb[30].mxu0 %vm1473_vm2, %v1815_v37 }
 0x583   : > { %v1752_v47 = vpop.xlane.xlu0 %1751  ;;  %v1816_v5 = vmul.f32 %v4897_v19, %v6511_v56  ;;  %v4899_v30 = vpop.eup %4898 }
 0x584   : > { %4908 = vrcp.f32 %v1752_v47  ;;  %v1819_v9 = vmul.f32 %v4899_v30, %v6408_v27  ;;  %v2700_v37 = vpop.xlane.xlu1 %2699 }
 0x585   : > { %4279 = vmatprep.mubr.msk.f32.mxu0 %vm1473_vm2, %v1816_v5  ;;  %4910 = vrcp.f32 %v1761_v6 }
 0x586   : > { %v4901_v29 = vpop.eup %4900  ;;  %4280 = vmatmul.mubr.msk.f32.gmra.mrb[32].mxu0 %vm1473_vm2, %v1817_v28 }
 0x587   : > { %v1758_v18 = vpop.xlane.xlu0 %1757  ;;  %v1818_v60 = vmul.f32 %v4901_v29, %v6522_v13  ;;  %v4903_v38 = vpop.eup %4902 }
 0x588   : > { %4912 = vrcp.f32 %v1758_v18  ;;  %v1821_v32 = vmul.f32 %v4903_v38, %v6421_v17  ;;  %v2706_v47 = vpop.xlane.xlu1 %2705 }
 0x589   : > { %4282 = vmatprep.mubr.msk.f32.mxu0 %vm1473_vm2, %v1818_v60  ;;  %4914 = vrcp.f32 %v2664_v57 }
 0x58a   : > { %v4905_v56 = vpop.eup %4904  ;;  %4283 = vmatmul.mubr.msk.f32.gmra.mrb[34].mxu0 %vm1473_vm2, %v1819_v9 }
 0x58b   : > { %v2661_v10 = vpop.xlane.xlu0 %2660  ;;  %v1820_v15 = vmul.f32 %v4905_v56, %v6532_v26  ;;  %v4907_v63 = vpop.eup %4906 }
 0x58c   : > { %4916 = vrcp.f32 %v2661_v10  ;;  %v1823_v53 = vmul.f32 %v4907_v63, %v6434_v50  ;;  %v2712_v29 = vpop.xlane.xlu1 %2711 }
 0x58d   : > { %4285 = vmatprep.mubr.msk.f32.mxu0 %vm1473_vm2, %v1820_v15  ;;  %4918 = vrcp.f32 %v2670_v7 }
 0x58e   : > { %v4909_v13 = vpop.eup %4908  ;;  %4286 = vmatmul.mubr.msk.f32.gmra.mrb[36].mxu0 %vm1473_vm2, %v1821_v32 }
 0x58f   : > { %v2667_v27 = vpop.xlane.xlu0 %2666  ;;  %v1822_v3 = vmul.f32 %v4909_v13, %v6539_v23  ;;  %v4911_v59 = vpop.eup %4910 }
 0x590   : > { %4920 = vrcp.f32 %v2667_v27  ;;  %v1825_v42 = vmul.f32 %v4911_v59, %v6445_v40 }
 0x591   : > { %4288 = vmatprep.mubr.msk.f32.mxu0 %vm1473_vm2, %v1822_v3  ;;  %4922 = vrcp.f32 %v2676_v49 }
 0x592   : > { %v4913_v26 = vpop.eup %4912  ;;  %4289 = vmatmul.mubr.msk.f32.gmra.mrb[38].mxu0 %vm1473_vm2, %v1823_v53 }
 0x593   : > { %v2673_v17 = vpop.xlane.xlu0 %2672  ;;  %v1824_v6 = vmul.f32 %v4913_v26, %v6549_v34  ;;  %v4915_v39 = vpop.eup %4914  ;;  %v7254_v26 = vld [vmem:[#allocation66_spill] sm:$0xff] }
 0x594   : > { %4924 = vrcp.f32 %v2673_v17  ;;  %v2788_v52 = vmul.f32 %v4915_v39, %v6458_v62  ;;  %v2718_v9 = vpop.xlane.xlu1 %2717  ;;  %v7255_v39 = vld [vmem:[#allocation61_spill] sm:$0xff] }
 0x595   : > { %4291 = vmatprep.mubr.msk.f32.mxu0 %vm1473_vm2, %v1824_v6  ;;  %4926 = vrcp.f32 %v2682_v55 }
 0x596   : > { %v4917_v23 = vpop.eup %4916  ;;  %4292 = vmatmul.mubr.msk.f32.gmra.mrb[40].mxu0 %vm1473_vm2, %v1825_v42 }
 0x597   : > { %v2679_v50 = vpop.xlane.xlu0 %2678  ;;  %v2787_v51 = vmul.f32 %v4917_v23, %v6554_v2  ;;  %v4919_v57 = vpop.eup %4918 }
 0x598   : > { %4928 = vrcp.f32 %v2679_v50  ;;  %v2790_v24 = vmul.f32 %v4919_v57, %v6469_v44 }
 0x599   : > { %4346 = vmatprep.mubr.msk.f32.mxu0 %vm1473_vm2, %v2787_v51  ;;  %4930 = vrcp.f32 %v2688_v1 }
 0x59a   : > { %v4921_v34 = vpop.eup %4920  ;;  %4347 = vmatmul.mubr.msk.f32.vlgmr.msra.gmra.mrb[42].mxu0 %vm1473_vm2, %v2788_v52 }
 0x59b   : > { %v2685_v40 = vpop.xlane.xlu0 %2684  ;;  %v2789_v35 = vmul.f32 %v4921_v34, %v6564_v33  ;;  %v4923_v61 = vpop.eup %4922  ;;  %v7256_v34 = vld [vmem:[#allocation62_spill] sm:$0xff] }
 0x59c   : > { %4932 = vrcp.f32 %v2685_v40  ;;  %v2792_v11 = vmul.f32 %v4923_v61, %v6480_v22  ;;  %v2724_v15 = vpop.xlane.xlu1 %2723 }
 0x59d   : > { %4349 = vmatprep.mubr.msk.f32.mxu0 %vm1473_vm2, %v2789_v35  ;;  %4934 = vrcp.f32 %v2694_v16 }
 0x59e   : > { %v4925_v2 = vpop.eup %4924  ;;  %4350 = vmatmul.mubr.msk.f32.gmra.mrb[44].mxu0 %vm1473_vm2, %v2790_v24 }
 0x59f   : > { %v2691_v62 = vpop.xlane.xlu0 %2690  ;;  %v2791_v0 = vmul.f32 %v4925_v2, %v6570_v12  ;;  %v4927_v19 = vpop.eup %4926 }
 0x5a0   : > { %4936 = vrcp.f32 %v2691_v62  ;;  %v2794_v5 = vmul.f32 %v4927_v19, %v6491_v14  ;;  %v7258_v19 = vld [vmem:[#allocation68_spill] sm:$0xff] }
 0x5a1   : > { %4352 = vmatprep.mubr.msk.f32.mxu0 %vm1473_vm2, %v2791_v0  ;;  %4938 = vrcp.f32 %v2700_v37  ;;  %v7257_v37 = vld [vmem:[#allocation64_spill] sm:$0xff] }
 0x5a2   : > { %v4929_v33 = vpop.eup %4928  ;;  %4353 = vmatmul.mubr.msk.f32.gmra.mrb[46].mxu0 %vm1473_vm2, %v2792_v11 }
 0x5a3   : > { %v2697_v44 = vpop.xlane.xlu0 %2696  ;;  %v2793_v7 = vmul.f32 %v4929_v33, %v6581_v54  ;;  %v4931_v28 = vpop.eup %4930 }
 0x5a4   : > { %4940 = vrcp.f32 %v2697_v44  ;;  %v2796_v18 = vmul.f32 %v4931_v28, %v6503_v36  ;;  %v2730_v55 = vpop.xlane.xlu1 %2729 }
 0x5a5   : > { %4355 = vmatprep.mubr.msk.f32.mxu0 %vm1473_vm2, %v2793_v7  ;;  %4942 = vrcp.f32 %v2706_v47  ;;  %v7260_v47 = vld [vmem:[#allocation63_spill] sm:$0xff] }
 0x5a6   : > { %v4933_v12 = vpop.eup %4932  ;;  %4356 = vmatmul.mubr.msk.f32.gmra.mrb[48].mxu0 %vm1473_vm2, %v2794_v5 }
 0x5a7   : > { %v2703_v22 = vpop.xlane.xlu0 %2702  ;;  %v2795_v30 = vmul.f32 %v4933_v12, %v6587_v41  ;;  %v4935_v60 = vpop.eup %4934 }
 0x5a8   : > { %4944 = vrcp.f32 %v2703_v22  ;;  %v2798_v38 = vmul.f32 %v4935_v60, %v6513_v25  ;;  %v7261_v22 = vld [vmem:[#allocation67_spill] sm:$0xff] }
 0x5a9   : > { %4358 = vmatprep.mubr.msk.f32.mxu0 %vm1473_vm2, %v2795_v30  ;;  %4946 = vrcp.f32 %v2712_v29  ;;  %v7262_v29 = vld [vmem:[#allocation70_spill] sm:$0xff] }
 0x5aa   : > { %v4937_v54 = vpop.eup %4936  ;;  %4359 = vmatmul.mubr.msk.f32.gmra.mrb[50].mxu0 %vm1473_vm2, %v2796_v18 }
 0x5ab   : > { %v2709_v14 = vpop.xlane.xlu0 %2708  ;;  %v2797_v49 = vmul.f32 %v4937_v54, %v6597_v43  ;;  %v4939_v56 = vpop.eup %4938 }
 0x5ac   : > { %4948 = vrcp.f32 %v2709_v14  ;;  %v2800_v32 = vmul.f32 %v4939_v56, %v6524_v4  ;;  %v2736_v59 = vpop.xlane.xlu1 %2735  ;;  %v7263_v14 = vld [vmem:[#allocation71_spill] sm:$0xff]  ;;  %v7265_v56 = vmov 0.0  }
 0x5ad   : > { %4361 = vmatprep.mubr.msk.f32.mxu0 %vm1473_vm2, %v2797_v49  ;;  %4950 = vrcp.f32 %v2718_v9  ;;  %v7264_v9 = vld [vmem:[#allocation69_spill] sm:$0xff] }
 0x5ae   : > { %v4941_v41 = vpop.eup %4940  ;;  %4362 = vmatmul.mubr.msk.f32.gmra.mrb[52].mxu0 %vm1473_vm2, %v2798_v38 }
 0x5af   : > { %v2715_v36 = vpop.xlane.xlu0 %2714  ;;  %v2799_v10 = vmul.f32 %v4941_v41, %v6602_v48  ;;  %v4943_v63 = vpop.eup %4942  ;;  %v3205_v41 = vld [vmem:[%s5720_s19] sm:$0xff] }
 0x5b0   : > { %4952 = vrcp.f32 %v2715_v36  ;;  %v2802_v27 = vmul.f32 %v4943_v63, %v6541_v21  ;;  %v3206_v36 = vld [vmem:[%s5720_s19 + $0x8] sm:$0xff] }
 0x5b1   : > { %4364 = vmatprep.mubr.msk.f32.mxu0 %vm1473_vm2, %v2799_v10  ;;  %4954 = vrcp.f32 %v2724_v15  ;;  %v4509_v10 = vpack.c.bf16 %v3206_v36, %v3205_v41  ;;  %v3207_v15 = vld [vmem:[%s5720_s19 + $0x10] sm:$0xff]  ;;  %v7276_v36 = vld [vmem:[#allocation37_spill] sm:$0xff] }
 0x5b2   : > { %v4945_v43 = vpop.eup %4944  ;;  %4365 = vmatmul.mubr.msk.f32.gmra.mrb[54].mxu0 %vm1473_vm2, %v2800_v32  ;;  %v3208_v32 = vld [vmem:[%s5720_s19 + $0x18] sm:$0xff] }
 0x5b3   : > { %v2721_v25 = vpop.xlane.xlu0 %2720  ;;  %v2801_v13 = vmul.f32 %v4945_v43, %v6612_v31  ;;  %v4947_v3 = vpop.eup %4946  ;;  %4510 = vmatprep.subr.bf16.mxu1 %v4509_v10  ;;  %v4513_v63 = vpack.c.bf16 %v3208_v32, %v3207_v15  ;;  %v3209_v43 = vld [vmem:[%s5720_s19 + $0x20] sm:$0xff]  ;;  %v7277_v32 = vld [vmem:[#allocation39_spill] sm:$0xff] }
 0x5b4   : > { %4956 = vrcp.f32 %v2721_v25  ;;  %v2804_v17 = vmul.f32 %v4947_v3, %v7254_v26  ;;  %v2742_v42 = vpop.xlane.xlu1 %2741  ;;  %4512 = vmatpush3.bf16.msra.mxu1 %v4509_v10  ;;  %v3210_v25 = vld [vmem:[%s5720_s19 + $0x28] sm:$0xff] }
 0x5b5   : > { %4367 = vmatprep.mubr.msk.f32.mxu0 %vm1473_vm2, %v2801_v13  ;;  %4958 = vrcp.f32 %v2730_v55  ;;  %4514 = vmatprep.subr.bf16.mxu1 %v4513_v63  ;;  %v4517_v13 = vpack.c.bf16 %v3210_v25, %v3209_v43 }
 0x5b6   : > { %v4949_v48 = vpop.eup %4948  ;;  %4368 = vmatmul.mubr.msk.f32.gmra.mrb[56].mxu0 %vm1473_vm2, %v2802_v27  ;;  %v7266_v27 = vld [vmem:[#allocation30_spill] sm:$0xff] }
 0x5b7   : > { %v2727_v4 = vpop.xlane.xlu0 %2726  ;;  %v2803_v53 = vmul.f32 %v4949_v48, %v6617_v20  ;;  %v4951_v6 = vpop.eup %4950 }
 0x5b8   : > { %4960 = vrcp.f32 %v2727_v4  ;;  %v2806_v23 = vmul.f32 %v4951_v6, %v7255_v39  ;;  %4516 = vmatpush3.bf16.msra.mxu1 %v4513_v63  ;;  %v3211_v4 = vld [vmem:[%s5720_s19 + $0x30] sm:$0xff] }
 0x5b9   : > { %4370 = vmatprep.mubr.msk.f32.mxu0 %vm1473_vm2, %v2803_v53  ;;  %4962 = vrcp.f32 %v2736_v59  ;;  %4518 = vmatprep.subr.bf16.mxu1 %v4517_v13  ;;  %v3212_v53 = vld [vmem:[%s5720_s19 + $0x38] sm:$0xff]  ;;  %v7267_v59 = vld [vmem:[#allocation28_spill] sm:$0xff] }
 0x5ba   : > { %v4953_v31 = vpop.eup %4952  ;;  %4371 = vmatmul.mubr.msk.f32.gmra.mrb[58].mxu0 %vm1473_vm2, %v2804_v17  ;;  %v4521_v17 = vpack.c.bf16 %v3212_v53, %v3211_v4  ;;  %v7279_v4 = vld [vmem:[#allocation41_spill] sm:$0xff] }
 0x5bb   : > { %v2733_v21 = vpop.xlane.xlu0 %2732  ;;  %v2805_v1 = vmul.f32 %v4953_v31, %v6627_v46  ;;  %v4955_v50 = vpop.eup %4954  ;;  %v3213_v31 = vld [vmem:[%s5720_s19 + $0x40] sm:$0xff] }
 0x5bc   : > { %4964 = vrcp.f32 %v2733_v21  ;;  %v2748_v57 = vpop.xlane.xlu1 %2747  ;;  %v2808_v16 = vmul.f32 %v4955_v50, %v7256_v34  ;;  %4520 = vmatpush3.bf16.msra.mxu1 %v4517_v13  ;;  %v3214_v21 = vld [vmem:[%s5720_s19 + $0x48] sm:$0xff]  ;;  %v3216_v50 = vld [vmem:[%s5720_s19 + $0x58] sm:$0xff] }
 0x5bd   : > { %4373 = vmatprep.mubr.msk.f32.mxu0 %vm1473_vm2, %v2805_v1  ;;  %4966 = vrcp.f32 %v2742_v42  ;;  %4522 = vmatprep.subr.bf16.mxu1 %v4521_v17  ;;  %v4525_v1 = vpack.c.bf16 %v3214_v21, %v3213_v31  ;;  %v7280_v31 = vld [vmem:[#allocation43_spill] sm:$0xff] }
 0x5be   : > { %v4957_v20 = vpop.eup %4956  ;;  %4374 = vmatmul.mubr.msk.f32.gmra.mrb[60].mxu0 %vm1473_vm2, %v2806_v23  ;;  %v3215_v23 = vld [vmem:[%s5720_s19 + $0x50] sm:$0xff] }
 0x5bf   : > { %v2739_v51 = vpop.xlane.xlu0 %2738  ;;  %v2807_v52 = vmul.f32 %v4957_v20, %v6632_v45  ;;  %v4959_v40 = vpop.eup %4958  ;;  %v7268_v20 = vld [vmem:[#allocation32_spill] sm:$0xff] }
 0x5c0   : > { %4968 = vrcp.f32 %v2739_v51  ;;  %v2810_v61 = vmul.f32 %v4959_v40, %v6604_v8  ;;  %v7259_v8 = vld [vmem:[#allocation65_spill] sm:$0xff]  ;;  %4524 = vmatpush3.bf16.msra.mxu1 %v4521_v17 }
 0x5c1   : > { %4376 = vmatprep.mubr.msk.f32.mxu0 %vm1473_vm2, %v2807_v52  ;;  %4970 = vrcp.f32 %v2748_v57  ;;  %4526 = vmatprep.subr.bf16.mxu1 %v4525_v1  ;;  %v4529_v52 = vpack.c.bf16 %v3216_v50, %v3215_v23  ;;  %v7269_v57 = vld [vmem:[#allocation34_spill] sm:$0xff] }
 0x5c2   : > { %v4961_v46 = vpop.eup %4960  ;;  %4377 = vmatmul.mubr.msk.f32.gmra.mrb[62].mxu0 %vm1473_vm2, %v2808_v16 }
 0x5c3   : > { %v2745_v35 = vpop.xlane.xlu0 %2744  ;;  %v2809_v24 = vmul.f32 %v4961_v46, %v6641_v58  ;;  %v4963_v2 = vpop.eup %4962  ;;  %v3217_v46 = vld [vmem:[%s5720_s19 + $0x60] sm:$0xff] }
 0x5c4   : > { %4972 = vrcp.f32 %v2745_v35  ;;  %v2812_v33 = vmul.f32 %v4963_v2, %v7258_v19  ;;  %4528 = vmatpush3.bf16.msra.mxu1 %v4525_v1  ;;  %v3218_v35 = vld [vmem:[%s5720_s19 + $0x68] sm:$0xff]  ;;  %v7271_v19 = vld [vmem:[#allocation38_spill] sm:$0xff] }
 0x5c5   : > { %4379 = vmatprep.mubr.msk.f32.mxu0 %vm1473_vm2, %v2809_v24  ;;  %4530 = vmatprep.subr.bf16.mxu1 %v4529_v52  ;;  %v4533_v24 = vpack.c.bf16 %v3218_v35, %v3217_v46 }
 0x5c6   : > { %v4965_v45 = vpop.eup %4964  ;;  %4380 = vmatmul.mubr.msk.f32.gmra.mrb[64].mxu0 %vm1473_vm2, %v2810_v61 }
 0x5c7   : > { %v2754_v62 = vpop.xlane.xlu1 %2753  ;;  %v2751_v0 = vpop.xlane.xlu0 %2750  ;;  %v2811_v11 = vmul.f32 %v4965_v45, %v7257_v37  ;;  %v7270_v45 = vld [vmem:[#allocation36_spill] sm:$0xff]  ;;  %v3220_v37 = vld [vmem:[%s5720_s19 + $0x78] sm:$0xff] }
 0x5c8   : > { %4974 = vrcp.f32 %v2754_v62  ;;  %v4967_v44 = vpop.eup %4966  ;;  %4532 = vmatpush3.bf16.msra.mxu1 %v4529_v52 }
 0x5c9   : > { %4976 = vrcp.f32 %v2751_v0  ;;  %4382 = vmatprep.mubr.msk.f32.mxu0 %vm1473_vm2, %v2811_v11  ;;  %v2814_v5 = vmul.f32 %v4967_v44, %v7260_v47  ;;  %4534 = vmatprep.subr.bf16.mxu1 %v4533_v24  ;;  %v3219_v0 = vld [vmem:[%s5720_s19 + $0x70] sm:$0xff] }
 0x5ca   : > { %v4969_v58 = vpop.eup %4968  ;;  %4383 = vmatmul.mubr.msk.f32.gmra.mrb[66].mxu0 %vm1473_vm2, %v2812_v33  ;;  %v4537_v11 = vpack.c.bf16 %v3220_v37, %v3219_v0  ;;  %v7285_v37 = vld [vmem:[#allocation48_spill] sm:$0xff] }
 0x5cb   : > { %v2813_v7 = vmul.f32 %v4969_v58, %v7259_v8  ;;  %v4971_v28 = vpop.eup %4970 }
 0x5cc   : > { %v2816_v18 = vmul.f32 %v4971_v28, %v7262_v29  ;;  %4536 = vmatpush3.bf16.msra.mxu1 %v4533_v24  ;;  %v7273_v28 = vld [vmem:[#allocation31_spill] sm:$0xff] }
 0x5cd   : > { %4385 = vmatprep.mubr.msk.f32.mxu0 %vm1473_vm2, %v2813_v7  ;;  %4538 = vmatprep.subr.bf16.mxu1 %v4537_v11  ;;  %v7272_v7 = vld [vmem:[#allocation29_spill] sm:$0xff] }
 0x5ce   : > { %v4973_v12 = vpop.eup %4972  ;;  %4386 = vmatmul.mubr.msk.f32.gmra.mrb[68].mxu0 %vm1473_vm2, %v2814_v5 }
 0x5cf   : > { %v2815_v30 = vmul.f32 %v4973_v12, %v7261_v22 }
 0x5d0   : > { %4540 = vmatpush3.bf16.msra.mxu1 %v4537_v11 }
 0x5d1   : > { %4388 = vmatprep.mubr.msk.f32.mxu0 %vm1473_vm2, %v2815_v30 }
 0x5d2   : > { %v4975_v60 = vpop.eup %4974  ;;  %4389 = vmatmul.mubr.msk.f32.gmra.mrb[70].mxu0 %vm1473_vm2, %v2816_v18  ;;  %v7274_v18 = vld [vmem:[#allocation33_spill] sm:$0xff] }
 0x5d3   : > { %v4977_v54 = vpop.eup %4976  ;;  %v2818_v49 = vmul.f32 %v4975_v60, %v7263_v14  ;;  %v7275_v14 = vld [vmem:[#allocation35_spill] sm:$0xff] }
 0x5d4   : > { %v2817_v38 = vmul.f32 %v4977_v54, %v7264_v9 }
 0x5d6   : > { %4391 = vmatprep.mubr.msk.f32.mxu0 %vm1473_vm2, %v2817_v38 }
 0x5d7   : > { %4392 = vmatmul.mubr.msk.f32.gmra.mrb[72].mxu0 %vm1473_vm2, %v2818_v49 }
 0x5d8   : > { %3441 = vmatprep.mubr.f32.mxu0 %v7265_v56 }
 0x60e   : > { %v4248_v55 = vpop.f32.mrb[10].mxu0 }
 0x60f   : > { %v2148_v3 = vmul.f32 %v4248_v55, %v7266_v27  ;;  %v1988_v48 = vpop.f32.mrb[11].mxu0  ;;  %v7278_v55 = vld [vmem:[#allocation40_spill] sm:$0xff] }
 0x610   : > { %v2147_v26 = vmul.f32 %v1988_v48, %v7267_v59 }
 0x612   : > { %v2179_v6 = vadd.f32 %v2148_v3, %v2147_v26 }
 0x61d   : > { %v4251_v42 = vpop.f32.mrb[12].mxu0 }
 0x61e   : > { %v1998_v39 = vpop.f32.mrb[13].mxu0  ;;  %v2150_v34 = vmul.f32 %v4251_v42, %v7269_v57  ;;  %v7281_v42 = vld [vmem:[#allocation44_spill] sm:$0xff] }
 0x61f   : > { %v2149_v51 = vmul.f32 %v1998_v39, %v7268_v20 }
 0x621   : > { %v2180_v16 = vadd.f32 %v2179_v6, %v2149_v51 }
 0x623   : > { %v2181_v40 = vadd.f32 %v2180_v16, %v2150_v34  ;;  %v7282_v34 = vld [vmem:[#allocation45_spill] sm:$0xff] }
 0x62d   : > { %v4254_v61 = vpop.f32.mrb[14].mxu0 }
 0x62e   : > { %v2008_v2 = vpop.f32.mrb[15].mxu0  ;;  %v2152_v33 = vmul.f32 %v4254_v61, %v7271_v19 }
 0x62f   : > { %v2151_v62 = vmul.f32 %v2008_v2, %v7270_v45 }
 0x631   : > { %v2182_v44 = vadd.f32 %v2181_v40, %v2151_v62  ;;  %v4257_v58 = vpop.f32.mrb[16].mxu0  ;;  %v7283_v40 = vld [vmem:[#allocation46_spill] sm:$0xff]  ;;  %v7284_v62 = vld [vmem:[#allocation47_spill] sm:$0xff] }
 0x632   : > { %v2018_v8 = vpop.f32.mrb[17].mxu0  ;;  %v2154_v12 = vmul.f32 %v4257_v58, %v7273_v28 }
 0x633   : > { %v2153_v47 = vmul.f32 %v2018_v8, %v7272_v7  ;;  %v2183_v5 = vadd.f32 %v2182_v44, %v2152_v33  ;;  %v7286_v8 = vld [vmem:[#allocation49_spill] sm:$0xff] }
 0x635   : > { %v2184_v22 = vadd.f32 %v2183_v5, %v2153_v47  ;;  %v4260_v30 = vpop.f32.mrb[18].mxu0 }
 0x636   : > { %v2028_v29 = vpop.f32.mrb[19].mxu0  ;;  %v2156_v49 = vmul.f32 %v4260_v30, %v7275_v14 }
 0x637   : > { %v2155_v60 = vmul.f32 %v2028_v29, %v7274_v18  ;;  %v2185_v54 = vadd.f32 %v2184_v22, %v2154_v12  ;;  %v7287_v12 = vld [vmem:[#allocation50_spill] sm:$0xff] }
 0x639   : > { %v2186_v9 = vadd.f32 %v2185_v54, %v2155_v60  ;;  %v4263_v38 = vpop.f32.mrb[20].mxu0  ;;  %v7288_v54 = vld [vmem:[#allocation51_spill] sm:$0xff] }
 0x63a   : > { %v2038_v41 = vpop.f32.mrb[21].mxu0  ;;  %v2158_v63 = vmul.f32 %v4263_v38, %v7277_v32  ;;  %v7289_v38 = vld [vmem:[#allocation52_spill] sm:$0xff] }
 0x63b   : > { %v2157_v10 = vmul.f32 %v2038_v41, %v7276_v36  ;;  %v2187_v15 = vadd.f32 %v2186_v9, %v2156_v49 }
 0x63d   : > { %v2188_v43 = vadd.f32 %v2187_v15, %v2157_v10  ;;  %v4266_v25 = vpop.f32.mrb[22].mxu0 }
 0x63e   : > { %v2048_v13 = vpop.f32.mrb[23].mxu0  ;;  %v2160_v53 = vmul.f32 %v4266_v25, %v7279_v4 }
 0x63f   : > { %v2159_v3 = vmul.f32 %v2048_v13, %v7278_v55  ;;  %v2189_v48 = vadd.f32 %v2188_v43, %v2158_v63  ;;  %v7290_v43 = vld [vmem:[#allocation53_spill] sm:$0xff] }
 0x641   : > { %v2190_v26 = vadd.f32 %v2189_v48, %v2159_v3  ;;  %v4269_v17 = vpop.f32.mrb[24].mxu0  ;;  %v7291_v3 = vld [vmem:[#allocation54_spill] sm:$0xff] }
 0x642   : > { %v2058_v6 = vpop.f32.mrb[25].mxu0  ;;  %v2162_v39 = vmul.f32 %v4269_v17, %v7281_v42 }
 0x643   : > { %v2161_v21 = vmul.f32 %v2058_v6, %v7280_v31  ;;  %v2191_v1 = vadd.f32 %v2190_v26, %v2160_v53  ;;  %v7292_v6 = vld [vmem:[#allocation55_spill] sm:$0xff] }
 0x645   : > { %v2192_v23 = vadd.f32 %v2191_v1, %v2161_v21 }
 0x647   : > { %v2193_v50 = vadd.f32 %v2192_v23, %v2162_v39  ;;  %v7293_v39 = vld [vmem:[#allocation56_spill] sm:$0xff] }
 0x649   : > { %v4272_v51 = vpop.f32.mrb[26].mxu0 }
 0x64a   : > { %v2068_v52 = vpop.f32.mrb[27].mxu0  ;;  %v2164_v46 = vmul.f32 %v4272_v51, %v7283_v40 }
 0x64b   : > { %v2163_v16 = vmul.f32 %v2068_v52, %v7282_v34 }
 0x64d   : > { %v2194_v35 = vadd.f32 %v2193_v50, %v2163_v16  ;;  %v7294_v16 = vld [vmem:[#allocation57_spill] sm:$0xff] }
 0x64f   : > { %v2195_v24 = vadd.f32 %v2194_v35, %v2164_v46 }
 0x651   : > { %v4275_v61 = vpop.f32.mrb[28].mxu0 }
 0x652   : > { %v2078_v2 = vpop.f32.mrb[29].mxu0  ;;  %v2166_v11 = vmul.f32 %v4275_v61, %v7285_v37 }
 0x653   : > { %v2165_v0 = vmul.f32 %v2078_v2, %v7284_v62 }
 0x655   : > { %v2196_v33 = vadd.f32 %v2195_v24, %v2165_v0  ;;  %v4278_v44 = vpop.f32.mrb[30].mxu0  ;;  %v7295_v24 = vld [vmem:[#allocation58_spill] sm:$0xff] }
 0x656   : > { %v2088_v58 = vpop.f32.mrb[31].mxu0  ;;  %v2168_v22 = vmul.f32 %v4278_v44, %v7287_v12 }
 0x657   : > { %v2167_v47 = vmul.f32 %v2088_v58, %v7286_v8  ;;  %v2197_v5 = vadd.f32 %v2196_v33, %v2166_v11  ;;  %v7296_v33 = vld [vmem:[#allocation59_spill] sm:$0xff] }
 0x659   : > { %v2198_v30 = vadd.f32 %v2197_v5, %v2167_v47  ;;  %v4281_v29 = vpop.f32.mrb[32].mxu0  ;;  %v7297_v47 = vld [vmem:[#allocation60_spill] sm:$0xff] }
 0x65a   : > { %v2098_v60 = vpop.f32.mrb[33].mxu0  ;;  %v2170_v41 = vmul.f32 %v4281_v29, %v7289_v38 }
 0x65b   : > { %v2169_v49 = vmul.f32 %v2098_v60, %v7288_v54  ;;  %v2199_v9 = vadd.f32 %v2198_v30, %v2168_v22 }
 0x65d   : > { %v2200_v10 = vadd.f32 %v2199_v9, %v2169_v49  ;;  %v4284_v15 = vpop.f32.mrb[34].mxu0 }
 0x65e   : > { %v2108_v63 = vpop.f32.mrb[35].mxu0  ;;  %v2172_v48 = vmul.f32 %v4284_v15, %v7291_v3 }
 0x65f   : > { %v2171_v25 = vmul.f32 %v2108_v63, %v7290_v43  ;;  %v2201_v13 = vadd.f32 %v2200_v10, %v2170_v41 }
 0x661   : > { %v2202_v53 = vadd.f32 %v2201_v13, %v2171_v25  ;;  %v4287_v26 = vpop.f32.mrb[36].mxu0 }
 0x662   : > { %v2118_v17 = vpop.f32.mrb[37].mxu0  ;;  %v2174_v23 = vmul.f32 %v4287_v26, %v7293_v39 }
 0x663   : > { %v2173_v21 = vmul.f32 %v2118_v17, %v7292_v6  ;;  %v2203_v1 = vadd.f32 %v2202_v53, %v2172_v48 }
 0x665   : > { %v2204_v50 = vadd.f32 %v2203_v1, %v2173_v21  ;;  %v4290_v51 = vpop.f32.mrb[38].mxu0 }
 0x666   : > { %v2128_v52 = vpop.f32.mrb[39].mxu0  ;;  %v2176_v61 = vmul.f32 %v4290_v51, %v7295_v24 }
 0x667   : > { %v2175_v46 = vmul.f32 %v2128_v52, %v7294_v16  ;;  %v2205_v35 = vadd.f32 %v2204_v50, %v2174_v23 }
 0x669   : > { %v2206_v2 = vadd.f32 %v2205_v35, %v2175_v46  ;;  %v4293_v0 = vpop.f32.mrb[40].mxu0 }
 0x66a   : > { %v2138_v11 = vpop.f32.mrb[41].mxu0  ;;  %v2178_v5 = vmul.f32 %v4293_v0, %v7297_v47 }
 0x66b   : > { %v2177_v44 = vmul.f32 %v2138_v11, %v7296_v33  ;;  %v2207_v58 = vadd.f32 %v2206_v2, %v2176_v61 }
 0x66d   : > { %v2208_v22 = vadd.f32 %v2207_v58, %v2177_v44  ;;  %v4348_v30 = vpop.f32.mrb[42].mxu0 }
 0x66e   : > { %v3141_v29 = vmul.f32 %v4348_v30, %v7266_v27  ;;  %v2981_v60 = vpop.f32.mrb[43].mxu0 }
 0x66f   : > { %v3140_v49 = vmul.f32 %v2981_v60, %v7267_v59  ;;  %v2209_v9 = vadd.f32 %v2208_v22, %v2178_v5 }
 0x671   : > { %v3172_v41 = vadd.f32 %v3141_v29, %v3140_v49  ;;  %v4351_v10 = vpop.f32.mrb[44].mxu0  ;;  %4426 = vmatprep.mubr.f32.mxu1 %v2209_v9 }
 0x672   : > { %v2991_v15 = vpop.f32.mrb[45].mxu0  ;;  %v3143_v25 = vmul.f32 %v4351_v10, %v7269_v57 }
 0x673   : > { %v3142_v63 = vmul.f32 %v2991_v15, %v7268_v20 }
 0x675   : > { %v3173_v13 = vadd.f32 %v3172_v41, %v3142_v63  ;;  %v4354_v48 = vpop.f32.mrb[46].mxu0 }
 0x676   : > { %v3001_v53 = vpop.f32.mrb[47].mxu0  ;;  %v3145_v27 = vmul.f32 %v4354_v48, %v7271_v19 }
 0x677   : > { %v3144_v26 = vmul.f32 %v3001_v53, %v7270_v45  ;;  %v3174_v17 = vadd.f32 %v3173_v13, %v3143_v25 }
 0x679   : > { %v3175_v21 = vadd.f32 %v3174_v17, %v3144_v26  ;;  %v4357_v1 = vpop.f32.mrb[48].mxu0 }
 0x67a   : > { %v3011_v59 = vpop.f32.mrb[49].mxu0  ;;  %v3147_v51 = vmul.f32 %v4357_v1, %v7273_v28 }
 0x67b   : > { %v3146_v23 = vmul.f32 %v3011_v59, %v7272_v7  ;;  %v3176_v50 = vadd.f32 %v3175_v21, %v3145_v27 }
 0x67d   : > { %v3177_v52 = vadd.f32 %v3176_v50, %v3146_v23  ;;  %v4360_v20 = vpop.f32.mrb[50].mxu0 }
 0x67e   : > { %v3021_v46 = vpop.f32.mrb[51].mxu0  ;;  %v3149_v61 = vmul.f32 %v4360_v20, %v7275_v14 }
 0x67f   : > { %v3148_v57 = vmul.f32 %v3021_v46, %v7274_v18  ;;  %v3178_v35 = vadd.f32 %v3177_v52, %v3147_v51 }
 0x681   : > { %v3179_v45 = vadd.f32 %v3178_v35, %v3148_v57  ;;  %v4363_v2 = vpop.f32.mrb[52].mxu0 }
 0x682   : > { %v3031_v0 = vpop.f32.mrb[53].mxu0  ;;  %v3151_v44 = vmul.f32 %v4363_v2, %v7277_v32 }
 0x683   : > { %v3150_v19 = vmul.f32 %v3031_v0, %v7276_v36  ;;  %v3180_v11 = vadd.f32 %v3179_v45, %v3149_v61 }
 0x685   : > { %v3181_v7 = vadd.f32 %v3180_v11, %v3150_v19  ;;  %v4366_v58 = vpop.f32.mrb[54].mxu0 }
 0x686   : > { %v3041_v5 = vpop.f32.mrb[55].mxu0  ;;  %v3153_v30 = vmul.f32 %v4366_v58, %v7279_v4 }
 0x687   : > { %v3152_v28 = vmul.f32 %v3041_v5, %v7278_v55  ;;  %v3182_v22 = vadd.f32 %v3181_v7, %v3151_v44 }
 0x689   : > { %v3183_v18 = vadd.f32 %v3182_v22, %v3152_v28  ;;  %v4369_v29 = vpop.f32.mrb[56].mxu0  ;;  %v6881_v28 = vld [vmem:[%s5726_s6] sm:$0xff] }
 0x68a   : > { %v3051_v60 = vpop.f32.mrb[57].mxu0  ;;  %v3155_v9 = vmul.f32 %v4369_v29, %v7281_v42 }
 0x68b   : > { %v3154_v14 = vmul.f32 %v3051_v60, %v7280_v31  ;;  %v3184_v49 = vadd.f32 %v3183_v18, %v3153_v30  ;;  %v4987_v60 = vld [vmem:[#allocation2] sm:$0xff] }
 0x68d   : > { %v3185_v36 = vadd.f32 %v3184_v49, %v3154_v14  ;;  %v4372_v41 = vpop.f32.mrb[58].mxu0  ;;  %v3338_v49 = vld [vmem:[%s5722_s17 + $0x8] sm:$0xff] }
 0x68e   : > { %v3061_v10 = vpop.f32.mrb[59].mxu0  ;;  %v3157_v63 = vmul.f32 %v4372_v41, %v7283_v40 }
 0x68f   : > { %v3156_v32 = vmul.f32 %v3061_v10, %v7282_v34  ;;  %v3186_v15 = vadd.f32 %v3185_v36, %v3155_v9  ;;  %v3340_v9 = vld [vmem:[%s5722_s17 + $0x18] sm:$0xff]  ;;  %v3337_v36 = vld [vmem:[%s5722_s17] sm:$0xff]  ;;  %v3339_v10 = vld [vmem:[%s5722_s17 + $0x10] sm:$0xff] }
 0x690   : > { %v4541_v41 = vpack.c.bf16 %v3340_v9, %v3338_v49  ;;  %v3477_v49 = vld [vmem:[%s5724_s23 + $0x98] sm:$0xff] }
 0x691   : > { %v3187_v55 = vadd.f32 %v3186_v15, %v3156_v32  ;;  %v4375_v25 = vpop.f32.mrb[60].mxu0  ;;  %v3342_v32 = vld [vmem:[%s5722_s17 + $0x28] sm:$0xff]  ;;  %v3344_v15 = vld [vmem:[%s5722_s17 + $0x38] sm:$0xff] }
 0x692   : > { %v3071_v13 = vpop.f32.mrb[61].mxu0  ;;  %v3159_v53 = vmul.f32 %v4375_v25, %v7285_v37  ;;  %v3341_v25 = vld [vmem:[%s5722_s17 + $0x20] sm:$0xff]  ;;  %4542 = vmatprep.subr.bf16.mxu0 %v4541_v41  ;;  %v3460_v41 = vld [vmem:[%s5724_s23 + $0x10] sm:$0xff] }
 0x693   : > { %v3158_v4 = vmul.f32 %v3071_v13, %v7284_v62  ;;  %v3188_v48 = vadd.f32 %v3187_v55, %v3157_v63  ;;  %v4543_v63 = vpack.c.bf16 %v3339_v10, %v3337_v36  ;;  %v4545_v55 = vpack.c.bf16 %v3344_v15, %v3342_v32  ;;  %v3343_v13 = vld [vmem:[%s5722_s17 + $0x30] sm:$0xff]  ;;  %v3461_v10 = vld [vmem:[%s5724_s23 + $0x18] sm:$0xff]  ;;  %v3478_v32 = vld [vmem:[%s5724_s23 + $0xa0] sm:$0xff] }
 0x694   : > { %v3479_v15 = vld [vmem:[%s5724_s23 + $0xa8] sm:$0xff] }
 0x695   : > { %v3189_v31 = vadd.f32 %v3188_v48, %v3158_v4  ;;  %v4378_v26 = vpop.f32.mrb[62].mxu0  ;;  %v3346_v4 = vld [vmem:[%s5722_s17 + $0x48] sm:$0xff]  ;;  %v3348_v48 = vld [vmem:[%s5722_s17 + $0x58] sm:$0xff]  ;;  %4544 = vmatpush1.bf16.msra.mxu0 %v4543_v63  ;;  %v4579_v63 = vpack.c.bf16 %v3461_v10, %v3460_v41 }
 0x696   : > { %v3081_v17 = vpop.f32.mrb[63].mxu0  ;;  %v3161_v21 = vmul.f32 %v4378_v26, %v7287_v12  ;;  %4546 = vmatprep.subr.bf16.mxu0 %v4545_v55  ;;  %v3345_v26 = vld [vmem:[%s5722_s17 + $0x40] sm:$0xff]  ;;  %v4581_v55 = vpack.c.bf16 %v3479_v15, %v3478_v32 }
 0x697   : > { %v3160_v42 = vmul.f32 %v3081_v17, %v7286_v8  ;;  %v3190_v27 = vadd.f32 %v3189_v31, %v3159_v53  ;;  %v4547_v53 = vpack.c.bf16 %v3343_v13, %v3341_v25  ;;  %v4549_v31 = vpack.c.bf16 %v3348_v48, %v3346_v4  ;;  %v3347_v17 = vld [vmem:[%s5722_s17 + $0x50] sm:$0xff]  ;;  %v3462_v25 = vld [vmem:[%s5724_s23 + $0x20] sm:$0xff]  ;;  %v3463_v13 = vld [vmem:[%s5724_s23 + $0x28] sm:$0xff] }
 0x698   : > { %v3480_v4 = vld [vmem:[%s5724_s23 + $0xb0] sm:$0xff]  ;;  %v3481_v48 = vld [vmem:[%s5724_s23 + $0xb8] sm:$0xff] }
 0x699   : > { %v3191_v34 = vadd.f32 %v3190_v27, %v3160_v42  ;;  %v4381_v1 = vpop.f32.mrb[64].mxu0  ;;  %v3350_v42 = vld [vmem:[%s5722_s17 + $0x68] sm:$0xff]  ;;  %v3352_v27 = vld [vmem:[%s5722_s17 + $0x78] sm:$0xff]  ;;  %4548 = vmatpush1.bf16.msra.mxu0 %v4547_v53  ;;  %v4583_v53 = vpack.c.bf16 %v3463_v13, %v3462_v25 }
 0x69a   : > { %v3091_v59 = vpop.f32.mrb[65].mxu0  ;;  %v3163_v50 = vmul.f32 %v4381_v1, %v7289_v38  ;;  %4550 = vmatprep.subr.bf16.mxu0 %v4549_v31  ;;  %v3349_v1 = vld [vmem:[%s5722_s17 + $0x60] sm:$0xff]  ;;  %v4585_v31 = vpack.c.bf16 %v3481_v48, %v3480_v4 }
 0x69b   : > { %v3162_v40 = vmul.f32 %v3091_v59, %v7288_v54  ;;  %v3192_v23 = vadd.f32 %v3191_v34, %v3161_v21  ;;  %v4551_v21 = vpack.c.bf16 %v3347_v17, %v3345_v26  ;;  %v4553_v34 = vpack.c.bf16 %v3352_v27, %v3350_v42  ;;  %v3351_v59 = vld [vmem:[%s5722_s17 + $0x70] sm:$0xff]  ;;  %v3465_v17 = vld [vmem:[%s5724_s23 + $0x38] sm:$0xff]  ;;  %v3482_v42 = vld [vmem:[%s5724_s23 + $0xc0] sm:$0xff] }
 0x69c   : > { %v3464_v26 = vld [vmem:[%s5724_s23 + $0x30] sm:$0xff]  ;;  %v3483_v27 = vld [vmem:[%s5724_s23 + $0xc8] sm:$0xff] }
 0x69d   : > { %v3193_v62 = vadd.f32 %v3192_v23, %v3162_v40  ;;  %v4384_v51 = vpop.f32.mrb[66].mxu0  ;;  %v3354_v40 = vld [vmem:[%s5722_s17 + $0x88] sm:$0xff]  ;;  %v3356_v23 = vld [vmem:[%s5722_s17 + $0x98] sm:$0xff]  ;;  %4552 = vmatpush1.bf16.msra.mxu0 %v4551_v21  ;;  %v4587_v21 = vpack.c.bf16 %v3465_v17, %v3464_v26 }
 0x69e   : > { %v3101_v52 = vpop.f32.mrb[67].mxu0  ;;  %v3165_v46 = vmul.f32 %v4384_v51, %v7291_v3  ;;  %4554 = vmatprep.subr.bf16.mxu0 %v4553_v34  ;;  %v3353_v51 = vld [vmem:[%s5722_s17 + $0x80] sm:$0xff]  ;;  %v4589_v34 = vpack.c.bf16 %v3483_v27, %v3482_v42 }
 0x69f   : > { %v3164_v37 = vmul.f32 %v3101_v52, %v7290_v43  ;;  %v3194_v20 = vadd.f32 %v3193_v62, %v3163_v50  ;;  %v4555_v50 = vpack.c.bf16 %v3351_v59, %v3349_v1  ;;  %v4557_v62 = vpack.c.bf16 %v3356_v23, %v3354_v40  ;;  %v3355_v52 = vld [vmem:[%s5722_s17 + $0x90] sm:$0xff]  ;;  %v3466_v1 = vld [vmem:[%s5724_s23 + $0x40] sm:$0xff]  ;;  %v3467_v59 = vld [vmem:[%s5724_s23 + $0x48] sm:$0xff] }
 0x6a0   : > { %v3484_v40 = vld [vmem:[%s5724_s23 + $0xd0] sm:$0xff]  ;;  %v3485_v23 = vld [vmem:[%s5724_s23 + $0xd8] sm:$0xff] }
 0x6a1   : > { %v3195_v8 = vadd.f32 %v3194_v20, %v3164_v37  ;;  %v4387_v57 = vpop.f32.mrb[68].mxu0  ;;  %4556 = vmatpush1.bf16.msra.mxu0 %v4555_v50  ;;  %v4559_v37 = vpack.c.bf16 %v3355_v52, %v3353_v51  ;;  %v4591_v50 = vpack.c.bf16 %v3467_v59, %v3466_v1  ;;  %v3468_v51 = vld [vmem:[%s5724_s23 + $0x50] sm:$0xff]  ;;  %v3469_v52 = vld [vmem:[%s5724_s23 + $0x58] sm:$0xff] }
 0x6a2   : > { %v3111_v35 = vpop.f32.mrb[69].mxu0  ;;  %v3167_v45 = vmul.f32 %v4387_v57, %v7293_v39  ;;  %4558 = vmatprep.subr.bf16.mxu0 %v4557_v62  ;;  %v4593_v62 = vpack.c.bf16 %v3485_v23, %v3484_v40 }
 0x6a3   : > { %v3166_v12 = vmul.f32 %v3111_v35, %v7292_v6  ;;  %v3196_v61 = vadd.f32 %v3195_v8, %v3165_v46 }
 0x6a5   : > { %v3197_v54 = vadd.f32 %v3196_v61, %v3166_v12  ;;  %v4390_v2 = vpop.f32.mrb[70].mxu0  ;;  %4560 = vmatpush1.bf16.msra.mxu0 %v4559_v37  ;;  %v3486_v37 = vld [vmem:[%s5724_s23 + $0xe0] sm:$0xff] }
 0x6a6   : > { %v3121_v38 = vpop.f32.mrb[71].mxu0  ;;  %v3169_v43 = vmul.f32 %v4390_v2, %v7295_v24  ;;  %v3360_v2 = vld [vmem:[%s5722_s17 + $0xb8] sm:$0xff] }
 0x6a7   : > { %v3168_v0 = vmul.f32 %v3121_v38, %v7294_v16  ;;  %v3198_v19 = vadd.f32 %v3197_v54, %v3167_v45  ;;  %v7298_v16 = vld [vmem:[#allocation27_spill] sm:$0xff] }
 0x6a8   : > { %v3224_v24 = vrot.slane %v6881_v28, %v7298_v16  ;;  %v3358_v54 = vld [vmem:[%s5722_s17 + $0xa8] sm:$0xff] }
 0x6a9   : > { %v3199_v11 = vadd.f32 %v3198_v19, %v3168_v0  ;;  %v4561_v38 = vpack.c.bf16 %v3360_v2, %v3358_v54  ;;  %v3357_v0 = vld [vmem:[%s5722_s17 + $0xa0] sm:$0xff]  ;;  %v3359_v19 = vld [vmem:[%s5722_s17 + $0xb0] sm:$0xff] }
 0x6aa   : > { %v4393_v44 = vpop.f32.mrb[72].mxu0 }
 0x6ab   : > { %v3131_v3 = vpop.f32.mrb[73].mxu0  ;;  %v3200_v58 = vadd.f32 %v3199_v11, %v3169_v43  ;;  %v3171_v6 = vmul.f32 %v4393_v44, %v7297_v47  ;;  %v4986_v47 = vld [vmem:[#allocation2 + $0x8] sm:$0xff]  ;;  %v3362_v43 = vld [vmem:[%s5722_s17 + $0xc8] sm:$0xff]  ;;  %v4563_v11 = vpack.c.bf16 %v3359_v19, %v3357_v0  ;;  %4562 = vmatprep.subr.bf16.mxu0 %v4561_v38  ;;  %v7299_v0 = vld [vmem:[#allocation26_spill] sm:$0xff] }
 0x6ac   : > { %v3170_v7 = vmul.f32 %v3131_v3, %v7296_v33  ;;  %v3364_v44 = vld [vmem:[%s5722_s17 + $0xd8] sm:$0xff]  ;;  %v3361_v3 = vld [vmem:[%s5722_s17 + $0xc0] sm:$0xff]  ;;  %v3327_v19 = vsub.s32 1, %v7299_v0 }
 0x6ad   : > { %4564 = vmatpush1.bf16.msra.mxu0 %v4563_v11 }
 0x6ae   : > { %v3201_v5 = vadd.f32 %v3200_v58, %v3170_v7  ;;  %v3363_v7 = vld [vmem:[%s5722_s17 + $0xd0] sm:$0xff]  ;;  %v4565_v58 = vpack.c.bf16 %v3364_v44, %v3362_v43  ;;  %v3333_v43 = vsub.s32 2, %v7299_v0  ;;  %v3328_v44 = vrot.slane %v6881_v28, %v3327_v19 }
 0x6b0   : > { %v3202_v39 = vadd.f32 %v3201_v5, %v3171_v6  ;;  %v3366_v6 = vld [vmem:[%s5722_s17 + $0xe8] sm:$0xff]  ;;  %v3368_v5 = vld [vmem:[%s5722_s17 + $0xf8] sm:$0xff]  ;;  %4566 = vmatprep.subr.bf16.mxu0 %v4565_v58  ;;  %v3334_v58 = vrot.slane %v6881_v28, %v3333_v43  ;;  %v3595_v43 = vsub.s32 5, %v7299_v0 }
 0x6b1   : > { %v4569_v16 = vpack.c.bf16 %v3368_v5, %v3366_v6 }
 0x6b2   : > { %4427 = vmatmul.mubr.f32.vlgmr.msra.gmra.mrb[60].mxu1 %v3202_v39  ;;  %v4567_v39 = vpack.c.bf16 %v3363_v7, %v3361_v3 }
 0x6b4   : > { %4568 = vmatpush1.bf16.msra.mxu0 %v4567_v39 }
 0x6b5   : > { %4570 = vmatprep.subr.bf16.mxu0 %v4569_v16 }
 0x785   : > { %v4428_v22 = vpop.f32.mrb[60].mxu1 }
 0x786   : > { %v3297_v30 = vadd.f32 %v4428_v22, %v3224_v24  ;;  %v3291_v33 = vpop.f32.mrb[61].mxu1  ;;  %v3367_v22 = vld [vmem:[%s5722_s17 + $0xf0] sm:$0xff] }
 0x787   : > { %v3292_v18 = vadd.f32 %v3291_v33, %v3224_v24  ;;  %v3365_v24 = vld [vmem:[%s5722_s17 + $0xe0] sm:$0xff] }
 0x788   : > { %v3301_v29 = vadd.f32 %v4986_v47, %v3297_v30  ;;  %v4571_v30 = vpack.c.bf16 %v3367_v22, %v3365_v24  ;;  %v3474_v33 = vld [vmem:[%s5724_s23 + $0x80] sm:$0xff] }
 0x789   : > { %v3300_v14 = vadd.f32 %v4987_v60, %v3292_v18  ;;  %v3475_v18 = vld [vmem:[%s5724_s23 + $0x88] sm:$0xff]  ;;  %v3458_v47 = vld [vmem:[%s5724_s23] sm:$0xff] }
 0x78a   : > { %3304 = vadd.xlane.f32.xlu1 %v3301_v29  ;;  %4572 = vmatpush1.bf16.msra.mxu0 %v4571_v30  ;;  %v3459_v60 = vld [vmem:[%s5724_s23 + $0x8] sm:$0xff]  ;;  %v3470_v22 = vld [vmem:[%s5724_s23 + $0x60] sm:$0xff] }
 0x78b   : > { %3302 = vadd.xlane.f32.xlu0 %v3300_v14  ;;  %v4575_v9 = vpack.c.bf16 %v3459_v60, %v3458_v47  ;;  %v3471_v30 = vld [vmem:[%s5724_s23 + $0x68] sm:$0xff] }
 0x817   : > { %v3305_v20 = vpop.xlane.xlu1 %3304 }
 0x818   : > { %v3308_v46 = vmul.f32 0.0078125, %v3305_v20  ;;  %v3303_v8 = vpop.xlane.xlu0 %3302  ;;  %v3487_v20 = vld [vmem:[%s5724_s23 + $0xe8] sm:$0xff] }
 0x819   : > { %v3307_v57 = vmul.f32 0.0078125, %v3303_v8  ;;  %v4597_v8 = vpack.c.bf16 %v3487_v20, %v3486_v37 }
 0x81a   : > { %v6905_v35 = vsub.f32 %v3301_v29, %v3308_v46  ;;  %v4573_v29 = vpack.c.bf16 %v3475_v18, %v3474_v33  ;;  %v4595_v46 = vpack.c.bf16 %v3469_v52, %v3468_v51  ;;  %v4599_v33 = vpack.c.bf16 %v3471_v30, %v3470_v22  ;;  %v3488_v18 = vld [vmem:[%s5724_s23 + $0xf0] sm:$0xff] }
 0x81b   : > { %v6907_v12 = vsub.f32 %v3300_v14, %v3307_v57  ;;  %v3476_v14 = vld [vmem:[%s5724_s23 + $0x90] sm:$0xff] }
 0x81c   : > { %v3312_v61 = vmul.f32 %v6905_v35, %v6905_v35  ;;  %v4577_v36 = vpack.c.bf16 %v3477_v49, %v3476_v14  ;;  %4574 = vmatprep.subr.bf16.mxu1 %v4573_v29  ;;  %v3473_v29 = vld [vmem:[%s5724_s23 + $0x78] sm:$0xff]  ;;  %v3371_v14 = vsub.s32 3, %v7299_v0 }
 0x81d   : > { %v3311_v45 = vmul.f32 %v6907_v12, %v6907_v12  ;;  %4576 = vmatpush3.bf16.msra.mxu1 %v4575_v9  ;;  %v3204_v49 = vld [vmem:[%s5726_s6 + $0x8] sm:$0xff] }
 0x81e   : > { %3315 = vadd.xlane.f32.xlu1 %v3312_v61  ;;  %4578 = vmatprep.subr.bf16.mxu1 %v4577_v36  ;;  %v3376_v9 = vrot.slane %v3204_v49, %v3371_v14 }
 0x81f   : > { %3313 = vadd.xlane.f32.xlu0 %v3311_v45 }
 0x821   : > { %4580 = vmatpush3.bf16.msra.mxu1 %v4579_v63 }
 0x822   : > { %4582 = vmatprep.subr.bf16.mxu1 %v4581_v55 }
 0x825   : > { %4584 = vmatpush3.bf16.msra.mxu1 %v4583_v53 }
 0x826   : > { %4586 = vmatprep.subr.bf16.mxu1 %v4585_v31  ;;  %v3492_v31 = vsub.s32 4, %v7299_v0 }
 0x828   : > { %v3493_v17 = vrot.slane %v6881_v28, %v3492_v31 }
 0x829   : > { %4588 = vmatpush3.bf16.msra.mxu1 %v4587_v21 }
 0x82a   : > { %4590 = vmatprep.subr.bf16.mxu1 %v4589_v34 }
 0x82d   : > { %4592 = vmatpush3.bf16.msra.mxu1 %v4591_v50 }
 0x82e   : > { %4594 = vmatprep.subr.bf16.mxu1 %v4593_v62 }
 0x831   : > { %4596 = vmatpush3.bf16.msra.mxu1 %v4595_v46 }
 0x832   : > { %4598 = vmatprep.subr.bf16.mxu1 %v4597_v8 }
 0x835   : > { %4600 = vmatpush3.bf16.msra.mxu1 %v4599_v33 }
 0x8ab   : > { %v3316_v57 = vpop.xlane.xlu1 %3315 }
 0x8ac   : > { %v3318_v61 = vmul.f32 0.0078125, %v3316_v57  ;;  %v3314_v45 = vpop.xlane.xlu0 %3313 }
 0x8ad   : > { %v3317_v54 = vmul.f32 0.0078125, %v3314_v45 }
 0x8ae   : > { %v3320_v2 = vadd.f32 1e-05, %v3318_v61 }
 0x8af   : > { %v3319_v38 = vadd.f32 1e-05, %v3317_v54 }
 0x8b0   : > { %4978 = vrsqrt.f32 %v3320_v2 }
 0x8b1   : > { %4980 = vrsqrt.f32 %v3319_v38 }
 0x8ba   : > { %v4979_v11 = vpop.eup %4978 }
 0x8bb   : > { %v4981_v3 = vpop.eup %4980  ;;  %v3324_v6 = vmul.f32 %v4979_v11, %v6905_v35  ;;  %v3472_v35 = vld [vmem:[%s5724_s23 + $0x70] sm:$0xff]  ;;  %v3601_v11 = vsub.s32 6, %v7299_v0 }
 0x8bc   : > { %v3323_v7 = vmul.f32 %v4981_v3, %v6907_v12  ;;  %v3489_v12 = vld [vmem:[%s5724_s23 + $0xf8] sm:$0xff]  ;;  %v4603_v60 = vpack.c.bf16 %v3473_v29, %v3472_v35 }
 0x8bd   : > { %v3330_v16 = vmul.f32 %v3328_v44, %v3324_v6  ;;  %v4601_v47 = vpack.c.bf16 %v3489_v12, %v3488_v18 }
 0x8be   : > { %v3329_v5 = vmul.f32 %v3328_v44, %v3323_v7  ;;  %v3596_v44 = vrot.slane %v6881_v28, %v3595_v43  ;;  %v3602_v7 = vrot.slane %v6881_v28, %v3601_v11 }
 0x8bf   : > { %v3336_v24 = vadd.f32 %v3334_v58, %v3330_v16  ;;  %4602 = vmatprep.subr.bf16.mxu1 %v4601_v47 }
 0x8c0   : > { %v3335_v39 = vadd.f32 %v3334_v58, %v3329_v5  ;;  %4604 = vmatpush3.bf16.msra.mxu1 %v4603_v60 }
 0x8c2   : > { %3442 = vmatmul.mubr.f32.vlgmr.msra.gmra.mrb[74].mxu0 %v3335_v39 }
 0x8c3   : > { %3447 = vmatprep.mubr.f32.mxu0 %v7265_v56  ;;  %v3372_v56 = vrot.slane %v6881_v28, %v3371_v14 }
 0x8c6   : > { %3448 = vmatmul.mubr.f32.gmra.mrb[76].mxu0 %v3336_v24 }
 0x995   : > { %v3443_v36 = vpop.f32.mrb[74].mxu0 }
 0x996   : > { %v3444_v41 = vadd.f32 %v3443_v36, %v3372_v56  ;;  %v3445_v10 = vpop.f32.mrb[75].mxu0 }
 0x997   : > { %v3446_v32 = vadd.f32 %v3445_v10, %v3376_v9 }
 0x998   : > { %v3454_v55 = vmax.f32 %v3444_v41, 0.0 }
 0x999   : > { %v3455_v15 = vmax.f32 %v3446_v32, 0.0  ;;  %v3449_v63 = vpop.f32.mrb[76].mxu0 }
 0x99a   : > { %v3450_v25 = vadd.f32 %v3449_v63, %v3372_v56  ;;  %v3451_v13 = vpop.f32.mrb[77].mxu0  ;;  %v3913_v56 = vld [vmem:[#allocation7 + $0x1] ss:$0 sm:$0xff] (!%p3912_p1) }
 0x99b   : > { %v3452_v4 = vadd.f32 %v3451_v13, %v3376_v9  ;;  %3558 = vmatprep.mubr.f32.mxu1 %v3455_v15 }
 0x99c   : > { %3559 = vmatmul.mubr.f32.vlgmr.msra.gmra.mrb[62].mxu1 %v3454_v55  ;;  %v3456_v53 = vmax.f32 %v3450_v25, 0.0  ;;  %v3914_v55 = vld [vmem:[#allocation7 + $0x2] ss:$0 sm:$0xff] (!%p3912_p1) }
 0x99d   : > { %v3457_v48 = vmax.f32 %v3452_v4, 0.0 }
 0x99f   : > { %3563 = vmatprep.mubr.f32.mxu1 %v3457_v48 }
 0x9a0   : > { %3564 = vmatmul.mubr.f32.gmra.mrb[64].mxu1 %v3456_v53 }
 0xa6f   : > { %v4132_v26 = vpop.f32.mrb[62].mxu1 }
 0xa70   : > { %v4133_v42 = vpop.f32.mrb[63].mxu1 }
 0xa71   : > { %v4134_v27 = vadd.f32 %v4133_v42, %v4132_v26 }
 0xa73   : > { %v3561_v21 = vadd.f32 %v4134_v27, %v3493_v17  ;;  %v4135_v34 = vpop.f32.mrb[64].mxu1 }
 0xa74   : > { %v4136_v1 = vpop.f32.mrb[65].mxu1 }
 0xa75   : > { %v4137_v59 = vadd.f32 %v4136_v1, %v4135_v34  ;;  %v3569_v40 = vadd.f32 %v3561_v21, %v3335_v39 }
 0xa77   : > { %v3566_v23 = vadd.f32 %v4137_v59, %v3493_v17  ;;  %3571 = vadd.xlane.f32.xlu0 %v3569_v40 }
 0xa79   : > { %v3570_v50 = vadd.f32 %v3566_v23, %v3336_v24 }
 0xa7b   : > { %3573 = vadd.xlane.f32.xlu1 %v3570_v50 }
 0xb04   : > { %v3572_v62 = vpop.xlane.xlu0 %3571 }
 0xb05   : > { %v3575_v51 = vmul.f32 0.0078125, %v3572_v62 }
 0xb07   : > { %v3577_v52 = vsub.f32 %v3569_v40, %v3575_v51 }
 0xb08   : > { %v3574_v37 = vpop.xlane.xlu1 %3573 }
 0xb09   : > { %v3576_v20 = vmul.f32 0.0078125, %v3574_v37  ;;  %v3579_v46 = vmul.f32 %v3577_v52, %v3577_v52 }
 0xb0b   : > { %v3578_v8 = vsub.f32 %v3570_v50, %v3576_v20  ;;  %3581 = vadd.xlane.f32.xlu0 %v3579_v46 }
 0xb0d   : > { %v3580_v57 = vmul.f32 %v3578_v8, %v3578_v8 }
 0xb0f   : > { %3583 = vadd.xlane.f32.xlu1 %v3580_v57 }
 0xb98   : > { %v3582_v61 = vpop.xlane.xlu0 %3581 }
 0xb99   : > { %v3585_v45 = vmul.f32 0.0078125, %v3582_v61 }
 0xb9b   : > { %v3587_v54 = vadd.f32 1e-05, %v3585_v45 }
 0xb9c   : > { %v3584_v2 = vpop.xlane.xlu1 %3583 }
 0xb9d   : > { %4982 = vrsqrt.f32 %v3587_v54  ;;  %v3586_v38 = vmul.f32 0.0078125, %v3584_v2 }
 0xb9f   : > { %v3588_v19 = vadd.f32 1e-05, %v3586_v38 }
 0xba1   : > { %4984 = vrsqrt.f32 %v3588_v19 }
 0xba7   : > { %v4983_v3 = vpop.eup %4982 }
 0xba8   : > { %v3591_v58 = vmul.f32 %v4983_v3, %v3577_v52 }
 0xbaa   : > { %v3597_v6 = vmul.f32 %v3596_v44, %v3591_v58 }
 0xbab   : > { %v4985_v5 = vpop.eup %4984 }
 0xbac   : > { %v3603_v39 = vadd.f32 %v3602_v7, %v3597_v6  ;;  %v3592_v16 = vmul.f32 %v4985_v5, %v3578_v8  ;;  %3610 = sbr.rel (%p3912_p1) target bundleno = 3187 (0xc73), region = 100 }
 0xbae   : > { %3605 = vst [vmem:[#allocation2] sm:$0xff] %v3603_v39  ;;  %v3598_v24 = vmul.f32 %v3596_v44, %v3592_v16  ;;  %v3611_v30 = vrot.slane (!%p3912_p1), %v3603_v39, 4 }
 0xbb0   : > { %v3604_v22 = vadd.f32 %v3602_v7, %v3598_v24  ;;  %v3612_v0 = vadd.f32 (!%p3912_p1), %v3611_v30, %v3603_v39 }
 0xbb2   : > { %3606 = vst [vmem:[#allocation2 + $0x8] sm:$0xff] %v3604_v22  ;;  %v3617_v33 = vrot.slane (!%p3912_p1), %v3604_v22, 4  ;;  %v3613_v12 = vrot.slane (!%p3912_p1), %v3612_v0, 2 }
 0xbb4   : > { %v3618_v18 = vadd.f32 %v3617_v33, %v3604_v22  ;;  %v3614_v35 = vadd.f32 %v3613_v12, %v3612_v0 }
 0xbb6   : > { %v3619_v47 = vrot.slane %v3618_v18, 2  ;;  %v3615_v29 = vrot.slane %v3614_v35, 1 }
 0xbb8   : > { %v3620_v28 = vadd.f32 %v3619_v47, %v3618_v18  ;;  %v3616_v14 = vadd.f32 %v3615_v29, %v3614_v35 }
 0xbba   : > { %v3621_v60 = vrot.slane %v3620_v28, 1  ;;  %v3624_v9 = vmul.f32 0.125, %v3616_v14 }
 0xbbc   : > { %v3622_v49 = vadd.f32 %v3621_v60, %v3620_v28  ;;  %v3632_v41 = vmul.f32 %v3913_v56, %v3624_v9 }
 0xbbe   : > { %v3625_v36 = vmul.f32 0.125, %v3622_v49 }
 0xbc0   : > { %v3633_v10 = vmul.f32 %v3913_v56, %v3625_v36 }
 0xbc2   : > { %v3636_v32 = vrot.slane %v3633_v10, 7 }
 0xbc4   : > { %v3638_v15 = vsel %vm3637_vm3, %v3636_v32, %v3632_v41 }
 0xbc5   : > { %v3641_v63 = vsel %vm3640_vm4, %v3638_v15, 0.0 }
 0xbc6   : > { %3642 = vadd.xlane.f32.xlu0 %v3641_v63 }
 0xc53   : > { %v3643_v25 = vpop.xlane.xlu0 %3642 }
 0xc54   : > { %v3648_v13 = vadd.f32 %v3914_v55, %v3643_v25 }
 0xc56   : > { %v3649_v4 = vsub.f32 0.0, %v3648_v13 }
 0xc58   : > { %v3650_v48 = vmul.f32 1.442695, %v3649_v4 }
 0xc5a   : > { %4988 = vpow2.f32 %v3650_v48 }
 0xc64   : > { %v4989_v53 = vpop.eup %4988 }
 0xc65   : > { %v3652_v31 = vadd.f32 1.0, %v4989_v53 }
 0xc67   : > { %4990 = vrcp.f32 %v3652_v31 }
 0xc71   : > { %v4991_v26 = vpop.eup %4990 }
 0xc72   : > { %3656 = vst.msk [vmem:[%s7301_s12] sm:$0x3] %vm3655_vm5, %v4991_v26 }
 0xc73 PF: > { %s7302_s12 = sld [smem:[#allocation22_spill]]  ;;  %s7303_s30 = sld [smem:[#allocation19_spill]] }
 0xc74   : > { %s7304_s10 = sld [smem:[#allocation20_spill]]  ;;  %s7305_s11 = sld [smem:[#allocation23_spill]] }
 0xc79   : > { %p19_p10 = scmp.ge.s32.totalorder %s7302_s12, 5  }
 0xc7b   :  { %21 = sbr.rel (!%p19_p10) target bundleno = 11 (0xb), region = 159 }
 0xc82   :  { %3668 = vsyncpa [#allocation4], 1 }
 0xc83   :  { %3670 = vsyncpa [#allocation4 + $0x1], 1 }
 0xc84   :  { %3671 = vsyncpa [#allocation6], 1 }
 0xc85   :  { %3672 = vsyncpa [#allocation9], 1 }

</bundles_post_ra>
